<compile_context>
chip_gen: v7x
topology: tpu7x:2x2x1
jax: 0.10.0
libtpu: 0.0.40
codegen_flags: <defaults>
</compile_context>

<pallas_src>
import functools

import jax
import jax.numpy as jnp
import numpy as np
from jax import lax
from jax.experimental import pallas as pl
from jax.experimental.pallas import tpu as pltpu


# --------------------------------------------------------------------------
# Pallas kernel: whole forward pass for one batch tile
# --------------------------------------------------------------------------
def convnet_kernel(state_ref, locdest_ref,
                   w1big_ref, b1big_ref, w2f_ref, b2_ref, w11_ref, b11_ref,
                   wf1_ref, bf1_ref, wld_ref, bld_ref,
                   wf4s_ref, wf4ld_ref, bf4_ref, wo_ref, bo_ref, out_ref):
    f32 = jnp.float32
    bf16 = jnp.bfloat16
    relu = lambda v: jnp.maximum(v, 0.0)

    state_bf = state_ref[...].astype(bf16)                     # (TB, 128)

    # ---- conv1 + conv2 fused as two matmuls (im2col folded into W1_big) -----
    y1 = jnp.dot(state_bf, w1big_ref[...],
                 preferred_element_type=f32) + b1big_ref[...]  # (TB, 3456)
    y1 = relu(y1)
    x_fe = jnp.dot(y1.astype(bf16), w2f_ref[...],
                   preferred_element_type=f32) + b2_ref[...]   # (TB, 256)

    # ---- conv1_1 (kernel == spatial extent) -> plain linear ------------------
    x_fe1 = jnp.dot(state_bf, w11_ref[...],
                    preferred_element_type=f32) + b11_ref[...]  # (TB, 256)

    fused = relu(x_fe) + relu(x_fe1)                            # (TB, 256)

    # ---- fc1 ------------------------------------------------------------------
    x_state = relu(jnp.dot(fused.astype(bf16), wf1_ref[...],
                           preferred_element_type=f32) + bf1_ref[...])  # (TB, 512)

    # ---- fc2 & fc3 merged: block-diagonal weight on concat([loc, dest]) -------
    x_ld = relu(jnp.dot(locdest_ref[...].astype(bf16), wld_ref[...],
                        preferred_element_type=f32) + bld_ref[...])     # (TB, 64)

    # ---- fc4 on cat([x_state, x_loc, x_dest]) without materializing the concat
    h = relu(jnp.dot(x_state.astype(bf16), wf4s_ref[...], preferred_element_type=f32)
             + jnp.dot(x_ld.astype(bf16), wf4ld_ref[...], preferred_element_type=f32)
             + bf4_ref[...])                                    # (TB, 128)

    # ---- fc_out (lane-padded to 128 outputs) -----------------------------------
    out_ref[...] = jnp.dot(h.astype(bf16), wo_ref[...],
                           preferred_element_type=f32) + bo_ref[...]


# --------------------------------------------------------------------------
# Wrapper: padding + batch-tiled pallas_call (weights VMEM-resident)
# --------------------------------------------------------------------------
@functools.partial(jax.jit, static_argnames=("num_actions",))
def conv_network_forward(state, loc, dest, kp, *, num_actions):
    """state: (B, 5, 5, 5) f32;  loc, dest: (B, 3) f32  ->  (B, num_actions) f32."""
    B = state.shape[0]

    state_flat = state.reshape(B, 125)
    state_flat = jnp.pad(state_flat, ((0, 0), (0, 3)))          # lane-pad 125 -> 128
    locdest = jnp.concatenate([loc, dest], axis=-1)             # (B, 6)

    # Batch tiling: multiples of 8 (sublane); 256-row tiles for large batches.
    TILE_B = 256 if B >= 256 else ((B + 7) // 8) * 8
    B_pad = ((B + TILE_B - 1) // TILE_B) * TILE_B
    if B_pad != B:
        state_flat = jnp.pad(state_flat, ((0, B_pad - B), (0, 0)))
        locdest = jnp.pad(locdest, ((0, B_pad - B), (0, 0)))

    nout_pad = kp["wo"].shape[1]                                # 128-lane padded
    grid = (B_pad // TILE_B,)

    weights = (kp["w1big"], kp["b1big"], kp["w2f"], kp["b2"], kp["w11"], kp["b11"],
               kp["wf1"], kp["bf1"], kp["wld"], kp["bld"],
               kp["wf4s"], kp["wf4ld"], kp["bf4"], kp["wo"], kp["bo"])

    act_spec = lambda d: pl.BlockSpec((TILE_B, d), lambda i: (i, 0))   # streamed
    w_spec = lambda arr: pl.BlockSpec(arr.shape, lambda i: (0, 0))     # resident

    out = pl.pallas_call(
        convnet_kernel,
        out_shape=jax.ShapeDtypeStruct((B_pad, nout_pad), jnp.float32),
        grid=grid,
        in_specs=[act_spec(128), act_spec(6)] + [w_spec(w) for w in weights],
        out_specs=pl.BlockSpec((TILE_B, nout_pad), lambda i: (i, 0)),
        compiler_params=pltpu.CompilerParams(dimension_semantics=("parallel",)),
    )(state_flat, locdest, *weights)

    return out[:B, :num_actions]


# --------------------------------------------------------------------------
# Deterministic parameter init (PyTorch-style fan-in uniform) + kernel re-layout
# --------------------------------------------------------------------------
def init_params(key, num_actions):
    ks = jax.random.split(key, 16)

    def u(k, shape, fan_in):
        bound = 1.0 / np.sqrt(fan_in)
        return jax.random.uniform(k, shape, jnp.float32, -bound, bound)

    tp = {  # torch-convention parameters (used for the pure-JAX reference)
        "conv1_w": u(ks[0], (128, 1, 3, 3, 3), 27), "conv1_b": u(ks[1], (128,), 27),
        "conv2_w": u(ks[2], (256, 128, 3, 3, 3), 128 * 27), "conv2_b": u(ks[3], (256,), 128 * 27),
        "conv11_w": u(ks[4], (256, 1, 5, 5, 5), 125), "conv11_b": u(ks[5], (256,), 125),
        "fc1_w": u(ks[6], (512, 256), 256), "fc1_b": u(ks[7], (512,), 256),
        "fc2_w": u(ks[8], (32, 3), 3), "fc2_b": u(ks[9], (32,), 3),
        "fc3_w": u(ks[10], (32, 3), 3), "fc3_b": u(ks[11], (32,), 3),
        "fc4_w": u(ks[12], (128, 576), 576), "fc4_b": u(ks[13], (128,), 576),
        "fco_w": u(ks[14], (num_actions, 128), 128), "fco_b": u(ks[15], (num_actions,), 128),
    }

    bf16 = jnp.bfloat16

    # conv1 expanded weight: fold the im2col scatter into the weight itself.
    # S[s, p, q] = 1 iff flattened state element s = (od+kd)*25+(oh+kh)*5+(ow+kw)
    # feeds conv1 output position p = od*9+oh*3+ow at kernel offset q = kd*9+kh*3+kw.
    w1f = tp["conv1_w"].reshape(128, 27).T                       # (27, 128)
    S = np.zeros((125, 27, 27), np.float32)
    for od in range(3):
        for oh in range(3):
            for ow in range(3):
                p = od * 9 + oh * 3 + ow
                for kd in range(3):
                    for kh in range(3):
                        for kw in range(3):
                            q = kd * 9 + kh * 3 + kw
                            s = (od + kd) * 25 + (oh + kh) * 5 + (ow + kw)
                            S[s, p, q] = 1.0
    w1big = jnp.einsum("spq,qc->spc", jnp.asarray(S), w1f).reshape(125, 27 * 128)
    w1big = jnp.pad(w1big, ((0, 3), (0, 0)))                     # match 125->128 state pad
    b1big = jnp.tile(tp["conv1_b"], 27)[None, :]                 # (1, 3456)

    # conv2 flattened: W2[p*128+ci, co] = conv2_w[co, ci, pd, ph, pw], p = pd*9+ph*3+pw
    w2f = jnp.transpose(tp["conv2_w"], (2, 3, 4, 1, 0)).reshape(27 * 128, 256)

    # conv1_1: kernel == spatial extent -> linear on flattened state (pad 125->128)
    w11 = jnp.pad(tp["conv11_w"].reshape(256, 125).T, ((0, 3), (0, 0)))   # (128, 256)

    # fc2/fc3 merged: block-diagonal (6, 64)
    wld = jnp.zeros((6, 64), jnp.float32)
    wld = wld.at[:3, :32].set(tp["fc2_w"].T).at[3:, 32:].set(tp["fc3_w"].T)
    bld = jnp.concatenate([tp["fc2_b"], tp["fc3_b"]])[None, :]   # (1, 64)

    # fc4 split to avoid in-kernel concat: rows 0:512 -> x_state, 512:576 -> [x_loc|x_dest]
    wf4 = tp["fc4_w"].T                                          # (576, 128)

    # fc_out padded to 128 output lanes (unmasked stores); sliced outside the kernel.
    nout_pad = max(128, ((num_actions + 127) // 128) * 128)
    wo = jnp.zeros((128, nout_pad), jnp.float32).at[:, :num_actions].set(tp["fco_w"].T)
    bo = jnp.zeros((1, nout_pad), jnp.float32).at[:, :num_actions].set(tp["fco_b"])

    kp = {  # kernel-facing layout: bf16 matmul weights, f32 (1, N) biases
        "w1big": w1big.astype(bf16), "b1big": b1big,
        "w2f": w2f.astype(bf16), "b2": tp["conv2_b"][None, :],
        "w11": w11.astype(bf16), "b11": tp["conv11_b"][None, :],
        "wf1": tp["fc1_w"].T.astype(bf16), "bf1": tp["fc1_b"][None, :],
        "wld": wld.astype(bf16), "bld": bld,
        "wf4s": wf4[:512].astype(bf16), "wf4ld": wf4[512:].astype(bf16),
        "bf4": tp["fc4_b"][None, :],
        "wo": wo.astype(bf16), "bo": bo,
    }
    return tp, kp


# --------------------------------------------------------------------------
# Pure-JAX reference (mirrors the PyTorch forward exactly, NCDHW convs, f32)
# --------------------------------------------------------------------------
def reference_forward(state, loc, dest, tp):
    relu = lambda v: jnp.maximum(v, 0.0)

    def conv3d(x, w, b):
        dn = lax.conv_dimension_numbers(x.shape, w.shape, ("NCDHW", "OIDHW", "NCDHW"))
        y = lax.conv_general_dilated(x, w, (1, 1, 1), "VALID", dimension_numbers=dn)
        return y + b[None, :, None, None, None]

    x = state[:, None]                                     # unsqueeze(1) -> (B,1,5,5,5)
    y = relu(conv3d(x, tp["conv1_w"], tp["conv1_b"]))
    y = relu(conv3d(y, tp["conv2_w"], tp["conv2_b"]))
    y1 = relu(conv3d(x, tp["conv11_w"], tp["conv11_b"]))
    fe = (y + y1).reshape(state.shape[0], -1)              # (B, 256)
    xs = relu(fe @ tp["fc1_w"].T + tp["fc1_b"])
    xl = relu(loc @ tp["fc2_w"].T + tp["fc2_b"])
    xd = relu(dest @ tp["fc3_w"].T + tp["fc3_b"])
    cat = jnp.concatenate([xs, xl, xd], axis=-1)
    h = relu(cat @ tp["fc4_w"].T + tp["fc4_b"])
    return h @ tp["fco_w"].T + tp["fco_b"]


if __name__ == "__main__":
    B, S, NUM_ACTIONS = 2, 5, 6   # state spatial size must be 5 (fc1 expects 256 = 1*1*1*256)

    key = jax.random.PRNGKey(0)
    k_state, k_loc, k_dest, k_params = jax.random.split(key, 4)

    state = jax.random.normal(k_state, (B, S, S, S), jnp.float32)
    loc = jax.random.normal(k_loc, (B, 3), jnp.float32)
    dest = jax.random.normal(k_dest, (B, 3), jnp.float32)

    torch_params, kernel_params = init_params(k_params, NUM_ACTIONS)

    out = conv_network_forward(state, loc, dest, kernel_params, num_actions=NUM_ACTIONS)
    out = jax.block_until_ready(out)

    ref = jax.block_until_ready(reference_forward(state, loc, dest, torch_params))
    # bf16 matmul operands with f32 accumulation stay well within this tolerance.
    np.testing.assert_allclose(np.asarray(out), np.asarray(ref), rtol=2e-2, atol=2e-2)

    print("KERNEL_OK")
</pallas_src>

<mosaic_0001>
module attributes {stable_mosaic.version = 11 : i64} {
  func.func @convnet_kernel(%arg0: i32, %arg1: memref<8x128xf32, #tpu.memory_space<vmem>>, %arg2: memref<8x6xf32, #tpu.memory_space<vmem>>, %arg3: memref<128x3456xbf16, #tpu.memory_space<vmem>>, %arg4: memref<1x3456xf32, #tpu.memory_space<vmem>>, %arg5: memref<3456x256xbf16, #tpu.memory_space<vmem>>, %arg6: memref<1x256xf32, #tpu.memory_space<vmem>>, %arg7: memref<128x256xbf16, #tpu.memory_space<vmem>>, %arg8: memref<1x256xf32, #tpu.memory_space<vmem>>, %arg9: memref<256x512xbf16, #tpu.memory_space<vmem>>, %arg10: memref<1x512xf32, #tpu.memory_space<vmem>>, %arg11: memref<6x64xbf16, #tpu.memory_space<vmem>>, %arg12: memref<1x64xf32, #tpu.memory_space<vmem>>, %arg13: memref<512x128xbf16, #tpu.memory_space<vmem>>, %arg14: memref<64x128xbf16, #tpu.memory_space<vmem>>, %arg15: memref<1x128xf32, #tpu.memory_space<vmem>>, %arg16: memref<128x128xbf16, #tpu.memory_space<vmem>>, %arg17: memref<1x128xf32, #tpu.memory_space<vmem>>, %arg18: memref<8x128xf32, #tpu.memory_space<vmem>>) attributes {dimension_semantics = [#tpu.dimension_semantics<parallel>], iteration_bounds = array<i64: 1>, scalar_prefetch = 0 : i64, scratch_operands = 0 : i64, tpu.core_type = #tpu.core_type<tc>, window_params = [{transform_indices = @transform_0, window_bounds = array<i64: 8, 128>}, {transform_indices = @transform_1, window_bounds = array<i64: 8, 6>}, {pipeline_mode = #tpu.pipeline_mode<synchronous>, transform_indices = @transform_2, window_bounds = array<i64: 128, 3456>}, {pipeline_mode = #tpu.pipeline_mode<synchronous>, transform_indices = @transform_3, window_bounds = array<i64: 1, 3456>}, {pipeline_mode = #tpu.pipeline_mode<synchronous>, transform_indices = @transform_4, window_bounds = array<i64: 3456, 256>}, {pipeline_mode = #tpu.pipeline_mode<synchronous>, transform_indices = @transform_5, window_bounds = array<i64: 1, 256>}, {pipeline_mode = #tpu.pipeline_mode<synchronous>, transform_indices = @transform_6, window_bounds = array<i64: 128, 256>}, {pipeline_mode = #tpu.pipeline_mode<synchronous>, transform_indices = @transform_7, window_bounds = array<i64: 1, 256>}, {pipeline_mode = #tpu.pipeline_mode<synchronous>, transform_indices = @transform_8, window_bounds = array<i64: 256, 512>}, {pipeline_mode = #tpu.pipeline_mode<synchronous>, transform_indices = @transform_9, window_bounds = array<i64: 1, 512>}, {pipeline_mode = #tpu.pipeline_mode<synchronous>, transform_indices = @transform_10, window_bounds = array<i64: 6, 64>}, {pipeline_mode = #tpu.pipeline_mode<synchronous>, transform_indices = @transform_11, window_bounds = array<i64: 1, 64>}, {pipeline_mode = #tpu.pipeline_mode<synchronous>, transform_indices = @transform_12, window_bounds = array<i64: 512, 128>}, {pipeline_mode = #tpu.pipeline_mode<synchronous>, transform_indices = @transform_13, window_bounds = array<i64: 64, 128>}, {pipeline_mode = #tpu.pipeline_mode<synchronous>, transform_indices = @transform_14, window_bounds = array<i64: 1, 128>}, {pipeline_mode = #tpu.pipeline_mode<synchronous>, transform_indices = @transform_15, window_bounds = array<i64: 128, 128>}, {pipeline_mode = #tpu.pipeline_mode<synchronous>, transform_indices = @transform_16, window_bounds = array<i64: 1, 128>}, {transform_indices = @transform_17, window_bounds = array<i64: 8, 128>}]} {
    %c0 = arith.constant 0 : index
    %c0_0 = arith.constant 0 : index
    %0 = vector.load %arg1[%c0, %c0_0] : memref<8x128xf32, #tpu.memory_space<vmem>>, vector<8x128xf32>
    %1 = arith.truncf %0 : vector<8x128xf32> to vector<8x128xbf16>
    %c0_1 = arith.constant 0 : index
    %c0_2 = arith.constant 0 : index
    %2 = vector.load %arg3[%c0_1, %c0_2] : memref<128x3456xbf16, #tpu.memory_space<vmem>>, vector<128x3456xbf16>
    %cst = arith.constant dense<0.000000e+00> : vector<8x3456xf32>
    %3 = tpu.matmul %1, %2, %cst {dimension_numbers = #tpu.dot_dimension_numbers<[1], [0], [0], [1], [0, 0, 1, 1], [], []>} : vector<8x128xbf16>, vector<128x3456xbf16>, vector<8x3456xf32> -> vector<8x3456xf32>
    %c0_3 = arith.constant 0 : index
    %c0_4 = arith.constant 0 : index
    %4 = vector.load %arg4[%c0_3, %c0_4] : memref<1x3456xf32, #tpu.memory_space<vmem>>, vector<1x3456xf32>
    %5 = vector.broadcast %4 : vector<1x3456xf32> to vector<8x3456xf32>
    %6 = arith.addf %3, %5 : vector<8x3456xf32>
    %cst_5 = arith.constant 0.000000e+00 : f32
    %7 = vector.broadcast %cst_5 : f32 to vector<8x3456xf32>
    %8 = arith.maximumf %6, %7 : vector<8x3456xf32>
    %9 = arith.truncf %8 : vector<8x3456xf32> to vector<8x3456xbf16>
    %c0_6 = arith.constant 0 : index
    %c0_7 = arith.constant 0 : index
    %10 = vector.load %arg5[%c0_6, %c0_7] : memref<3456x256xbf16, #tpu.memory_space<vmem>>, vector<3456x256xbf16>
    %cst_8 = arith.constant dense<0.000000e+00> : vector<8x256xf32>
    %11 = tpu.matmul %9, %10, %cst_8 {dimension_numbers = #tpu.dot_dimension_numbers<[1], [0], [0], [1], [0, 0, 1, 1], [], []>} : vector<8x3456xbf16>, vector<3456x256xbf16>, vector<8x256xf32> -> vector<8x256xf32>
    %c0_9 = arith.constant 0 : index
    %c0_10 = arith.constant 0 : index
    %12 = vector.load %arg6[%c0_9, %c0_10] : memref<1x256xf32, #tpu.memory_space<vmem>>, vector<1x256xf32>
    %13 = vector.broadcast %12 : vector<1x256xf32> to vector<8x256xf32>
    %14 = arith.addf %11, %13 : vector<8x256xf32>
    %c0_11 = arith.constant 0 : index
    %c0_12 = arith.constant 0 : index
    %15 = vector.load %arg7[%c0_11, %c0_12] : memref<128x256xbf16, #tpu.memory_space<vmem>>, vector<128x256xbf16>
    %cst_13 = arith.constant dense<0.000000e+00> : vector<8x256xf32>
    %16 = tpu.matmul %1, %15, %cst_13 {dimension_numbers = #tpu.dot_dimension_numbers<[1], [0], [0], [1], [0, 0, 1, 1], [], []>} : vector<8x128xbf16>, vector<128x256xbf16>, vector<8x256xf32> -> vector<8x256xf32>
    %c0_14 = arith.constant 0 : index
    %c0_15 = arith.constant 0 : index
    %17 = vector.load %arg8[%c0_14, %c0_15] : memref<1x256xf32, #tpu.memory_space<vmem>>, vector<1x256xf32>
    %18 = vector.broadcast %17 : vector<1x256xf32> to vector<8x256xf32>
    %19 = arith.addf %16, %18 : vector<8x256xf32>
    %cst_16 = arith.constant 0.000000e+00 : f32
    %20 = vector.broadcast %cst_16 : f32 to vector<8x256xf32>
    %21 = arith.maximumf %14, %20 : vector<8x256xf32>
    %cst_17 = arith.constant 0.000000e+00 : f32
    %22 = vector.broadcast %cst_17 : f32 to vector<8x256xf32>
    %23 = arith.maximumf %19, %22 : vector<8x256xf32>
    %24 = arith.addf %21, %23 : vector<8x256xf32>
    %25 = arith.truncf %24 : vector<8x256xf32> to vector<8x256xbf16>
    %c0_18 = arith.constant 0 : index
    %c0_19 = arith.constant 0 : index
    %26 = vector.load %arg9[%c0_18, %c0_19] : memref<256x512xbf16, #tpu.memory_space<vmem>>, vector<256x512xbf16>
    %cst_20 = arith.constant dense<0.000000e+00> : vector<8x512xf32>
    %27 = tpu.matmul %25, %26, %cst_20 {dimension_numbers = #tpu.dot_dimension_numbers<[1], [0], [0], [1], [0, 0, 1, 1], [], []>} : vector<8x256xbf16>, vector<256x512xbf16>, vector<8x512xf32> -> vector<8x512xf32>
    %c0_21 = arith.constant 0 : index
    %c0_22 = arith.constant 0 : index
    %28 = vector.load %arg10[%c0_21, %c0_22] : memref<1x512xf32, #tpu.memory_space<vmem>>, vector<1x512xf32>
    %29 = vector.broadcast %28 : vector<1x512xf32> to vector<8x512xf32>
    %30 = arith.addf %27, %29 : vector<8x512xf32>
    %cst_23 = arith.constant 0.000000e+00 : f32
    %31 = vector.broadcast %cst_23 : f32 to vector<8x512xf32>
    %32 = arith.maximumf %30, %31 : vector<8x512xf32>
    %c0_24 = arith.constant 0 : index
    %c0_25 = arith.constant 0 : index
    %33 = vector.load %arg2[%c0_24, %c0_25] : memref<8x6xf32, #tpu.memory_space<vmem>>, vector<8x6xf32>
    %34 = arith.truncf %33 : vector<8x6xf32> to vector<8x6xbf16>
    %c0_26 = arith.constant 0 : index
    %c0_27 = arith.constant 0 : index
    %35 = vector.load %arg11[%c0_26, %c0_27] : memref<6x64xbf16, #tpu.memory_space<vmem>>, vector<6x64xbf16>
    %cst_28 = arith.constant dense<0.000000e+00> : vector<8x64xf32>
    %36 = tpu.matmul %34, %35, %cst_28 {dimension_numbers = #tpu.dot_dimension_numbers<[1], [0], [0], [1], [0, 0, 1, 1], [], []>} : vector<8x6xbf16>, vector<6x64xbf16>, vector<8x64xf32> -> vector<8x64xf32>
    %c0_29 = arith.constant 0 : index
    %c0_30 = arith.constant 0 : index
    %37 = vector.load %arg12[%c0_29, %c0_30] : memref<1x64xf32, #tpu.memory_space<vmem>>, vector<1x64xf32>
    %38 = vector.broadcast %37 : vector<1x64xf32> to vector<8x64xf32>
    %39 = arith.addf %36, %38 : vector<8x64xf32>
    %cst_31 = arith.constant 0.000000e+00 : f32
    %40 = vector.broadcast %cst_31 : f32 to vector<8x64xf32>
    %41 = arith.maximumf %39, %40 : vector<8x64xf32>
    %42 = arith.truncf %32 : vector<8x512xf32> to vector<8x512xbf16>
    %c0_32 = arith.constant 0 : index
    %c0_33 = arith.constant 0 : index
    %43 = vector.load %arg13[%c0_32, %c0_33] : memref<512x128xbf16, #tpu.memory_space<vmem>>, vector<512x128xbf16>
    %cst_34 = arith.constant dense<0.000000e+00> : vector<8x128xf32>
    %44 = tpu.matmul %42, %43, %cst_34 {dimension_numbers = #tpu.dot_dimension_numbers<[1], [0], [0], [1], [0, 0, 1, 1], [], []>} : vector<8x512xbf16>, vector<512x128xbf16>, vector<8x128xf32> -> vector<8x128xf32>
    %45 = arith.truncf %41 : vector<8x64xf32> to vector<8x64xbf16>
    %c0_35 = arith.constant 0 : index
    %c0_36 = arith.constant 0 : index
    %46 = vector.load %arg14[%c0_35, %c0_36] : memref<64x128xbf16, #tpu.memory_space<vmem>>, vector<64x128xbf16>
    %cst_37 = arith.constant dense<0.000000e+00> : vector<8x128xf32>
    %47 = tpu.matmul %45, %46, %cst_37 {dimension_numbers = #tpu.dot_dimension_numbers<[1], [0], [0], [1], [0, 0, 1, 1], [], []>} : vector<8x64xbf16>, vector<64x128xbf16>, vector<8x128xf32> -> vector<8x128xf32>
    %48 = arith.addf %44, %47 : vector<8x128xf32>
    %c0_38 = arith.constant 0 : index
    %c0_39 = arith.constant 0 : index
    %49 = vector.load %arg15[%c0_38, %c0_39] : memref<1x128xf32, #tpu.memory_space<vmem>>, vector<1x128xf32>
    %50 = vector.broadcast %49 : vector<1x128xf32> to vector<8x128xf32>
    %51 = arith.addf %48, %50 : vector<8x128xf32>
    %cst_40 = arith.constant 0.000000e+00 : f32
    %52 = vector.broadcast %cst_40 : f32 to vector<8x128xf32>
    %53 = arith.maximumf %51, %52 : vector<8x128xf32>
    %54 = arith.truncf %53 : vector<8x128xf32> to vector<8x128xbf16>
    %c0_41 = arith.constant 0 : index
    %c0_42 = arith.constant 0 : index
    %55 = vector.load %arg16[%c0_41, %c0_42] : memref<128x128xbf16, #tpu.memory_space<vmem>>, vector<128x128xbf16>
    %cst_43 = arith.constant dense<0.000000e+00> : vector<8x128xf32>
    %56 = tpu.matmul %54, %55, %cst_43 {dimension_numbers = #tpu.dot_dimension_numbers<[1], [0], [0], [1], [0, 0, 1, 1], [], []>} : vector<8x128xbf16>, vector<128x128xbf16>, vector<8x128xf32> -> vector<8x128xf32>
    %c0_44 = arith.constant 0 : index
    %c0_45 = arith.constant 0 : index
    %57 = vector.load %arg17[%c0_44, %c0_45] : memref<1x128xf32, #tpu.memory_space<vmem>>, vector<1x128xf32>
    %58 = vector.broadcast %57 : vector<1x128xf32> to vector<8x128xf32>
    %59 = arith.addf %56, %58 : vector<8x128xf32>
    %c0_46 = arith.constant 0 : index
    %c0_47 = arith.constant 0 : index
    %60 = vector.load %arg18[%c0_46, %c0_47] : memref<8x128xf32, #tpu.memory_space<vmem>>, vector<8x128xf32>
    tpu.vector_store %arg18[%c0_46, %c0_47], %59 {strides = array<i32>} : memref<8x128xf32, #tpu.memory_space<vmem>>, vector<8x128xf32>,
    return
  }
  func.func @transform_0(%arg0: i32) -> (i32, i32) {
    %c0_i32 = arith.constant 0 : i32
    %c0_i32_0 = arith.constant 0 : i32
    return %arg0, %c0_i32 : i32, i32
  }
  func.func @transform_1(%arg0: i32) -> (i32, i32) {
    %c0_i32 = arith.constant 0 : i32
    %c0_i32_0 = arith.constant 0 : i32
    return %arg0, %c0_i32 : i32, i32
  }
  func.func @transform_2(%arg0: i32) -> (i32, i32) {
    %c0_i32 = arith.constant 0 : i32
    %c0_i32_0 = arith.constant 0 : i32
    %c0_i32_1 = arith.constant 0 : i32
    return %c0_i32, %c0_i32_0 : i32, i32
  }
  func.func @transform_3(%arg0: i32) -> (i32, i32) {
    %c0_i32 = arith.constant 0 : i32
    %c0_i32_0 = arith.constant 0 : i32
    %c0_i32_1 = arith.constant 0 : i32
    return %c0_i32, %c0_i32_0 : i32, i32
  }
  func.func @transform_4(%arg0: i32) -> (i32, i32) {
    %c0_i32 = arith.constant 0 : i32
    %c0_i32_0 = arith.constant 0 : i32
    %c0_i32_1 = arith.constant 0 : i32
    return %c0_i32, %c0_i32_0 : i32, i32
  }
  func.func @transform_5(%arg0: i32) -> (i32, i32) {
    %c0_i32 = arith.constant 0 : i32
    %c0_i32_0 = arith.constant 0 : i32
    %c0_i32_1 = arith.constant 0 : i32
    return %c0_i32, %c0_i32_0 : i32, i32
  }
  func.func @transform_6(%arg0: i32) -> (i32, i32) {
    %c0_i32 = arith.constant 0 : i32
    %c0_i32_0 = arith.constant 0 : i32
    %c0_i32_1 = arith.constant 0 : i32
    return %c0_i32, %c0_i32_0 : i32, i32
  }
  func.func @transform_7(%arg0: i32) -> (i32, i32) {
    %c0_i32 = arith.constant 0 : i32
    %c0_i32_0 = arith.constant 0 : i32
    %c0_i32_1 = arith.constant 0 : i32
    return %c0_i32, %c0_i32_0 : i32, i32
  }
  func.func @transform_8(%arg0: i32) -> (i32, i32) {
    %c0_i32 = arith.constant 0 : i32
    %c0_i32_0 = arith.constant 0 : i32
    %c0_i32_1 = arith.constant 0 : i32
    return %c0_i32, %c0_i32_0 : i32, i32
  }
  func.func @transform_9(%arg0: i32) -> (i32, i32) {
    %c0_i32 = arith.constant 0 : i32
    %c0_i32_0 = arith.constant 0 : i32
    %c0_i32_1 = arith.constant 0 : i32
    return %c0_i32, %c0_i32_0 : i32, i32
  }
  func.func @transform_10(%arg0: i32) -> (i32, i32) {
    %c0_i32 = arith.constant 0 : i32
    %c0_i32_0 = arith.constant 0 : i32
    %c0_i32_1 = arith.constant 0 : i32
    return %c0_i32, %c0_i32_0 : i32, i32
  }
  func.func @transform_11(%arg0: i32) -> (i32, i32) {
    %c0_i32 = arith.constant 0 : i32
    %c0_i32_0 = arith.constant 0 : i32
    %c0_i32_1 = arith.constant 0 : i32
    return %c0_i32, %c0_i32_0 : i32, i32
  }
  func.func @transform_12(%arg0: i32) -> (i32, i32) {
    %c0_i32 = arith.constant 0 : i32
    %c0_i32_0 = arith.constant 0 : i32
    %c0_i32_1 = arith.constant 0 : i32
    return %c0_i32, %c0_i32_0 : i32, i32
  }
  func.func @transform_13(%arg0: i32) -> (i32, i32) {
    %c0_i32 = arith.constant 0 : i32
    %c0_i32_0 = arith.constant 0 : i32
    %c0_i32_1 = arith.constant 0 : i32
    return %c0_i32, %c0_i32_0 : i32, i32
  }
  func.func @transform_14(%arg0: i32) -> (i32, i32) {
    %c0_i32 = arith.constant 0 : i32
    %c0_i32_0 = arith.constant 0 : i32
    %c0_i32_1 = arith.constant 0 : i32
    return %c0_i32, %c0_i32_0 : i32, i32
  }
  func.func @transform_15(%arg0: i32) -> (i32, i32) {
    %c0_i32 = arith.constant 0 : i32
    %c0_i32_0 = arith.constant 0 : i32
    %c0_i32_1 = arith.constant 0 : i32
    return %c0_i32, %c0_i32_0 : i32, i32
  }
  func.func @transform_16(%arg0: i32) -> (i32, i32) {
    %c0_i32 = arith.constant 0 : i32
    %c0_i32_0 = arith.constant 0 : i32
    %c0_i32_1 = arith.constant 0 : i32
    return %c0_i32, %c0_i32_0 : i32, i32
  }
  func.func @transform_17(%arg0: i32) -> (i32, i32) {
    %c0_i32 = arith.constant 0 : i32
    %c0_i32_0 = arith.constant 0 : i32
    return %arg0, %c0_i32 : i32, i32
  }
}

</mosaic_0001>

<bundles_post_ra>
// kernel: conv_network_forward.1
= control target key start
LH: loop header
LB: loop body
LE: loop exit
PB: predicated region body
PF: predicated region fallthrough
CT: control target
= control target key end

     0   :  { %s9784_s0 = inlined_call_operand.vmem [shape: f32[8,128], index: 0, kind: input, shape index: {}]   ;;  %s9785_s1 = inlined_call_operand.vmem [shape: f32[8,6], index: 1, kind: input, shape index: {}]   ;;  %s9786_s2 = inlined_call_operand.hbm [shape: bf16[128,3456], index: 2, kind: input, shape index: {}]   ;;  %s9787_s3 = inlined_call_operand.hbm [shape: f32[1,3456], index: 3, kind: input, shape index: {}]   ;;  %s9788_s4 = inlined_call_operand.hbm [shape: bf16[3456,256], index: 4, kind: input, shape index: {}]   ;;  %s9789_s5 = inlined_call_operand.hbm [shape: f32[1,256], index: 5, kind: input, shape index: {}]   ;;  %s9790_s6 = inlined_call_operand.hbm [shape: bf16[128,256], index: 6, kind: input, shape index: {}]   ;;  %s9791_s7 = inlined_call_operand.hbm [shape: f32[1,256], index: 7, kind: input, shape index: {}]   ;;  %s9792_s8 = inlined_call_operand.hbm [shape: bf16[256,512], index: 8, kind: input, shape index: {}]   ;;  %s9793_s9 = inlined_call_operand.hbm [shape: f32[1,512], index: 9, kind: input, shape index: {}]   ;;  %s9794_s10 = inlined_call_operand.hbm [shape: bf16[6,64], index: 10, kind: input, shape index: {}]   ;;  %s9795_s11 = inlined_call_operand.hbm [shape: f32[1,64], index: 11, kind: input, shape index: {}]   ;;  %s9796_s12 = inlined_call_operand.hbm [shape: bf16[512,128], index: 12, kind: input, shape index: {}]   ;;  %s9797_s13 = inlined_call_operand.hbm [shape: bf16[64,128], index: 13, kind: input, shape index: {}]   ;;  %s9798_s14 = inlined_call_operand.hbm [shape: f32[1,128], index: 14, kind: input, shape index: {}]   ;;  %s9799_s15 = inlined_call_operand.hbm [shape: bf16[128,128], index: 15, kind: input, shape index: {}]   ;;  %s9800_s16 = inlined_call_operand.hbm [shape: f32[1,128], index: 16, kind: input, shape index: {}]   ;;  %s9801_s17 = inlined_call_operand.vmem [shape: f32[8,128], index: 17, kind: output, shape index: {}]  }
   0x1   :  { %9802 = sst [smem:[#allocation33_spill]] %s9784_s0 }
   0x2   :  { %9803 = sst [smem:[#allocation34_spill]] %s9785_s1 }
   0x3   :  { %22 = vsyncpa [#allocation3], 0 }
   0x4   :  { %23 = vsyncpa [#allocation5], 0 }
   0x5   :  { %24 = vsyncpa [#allocation8], 0 }
   0x6   :  { %25 = vsyncpa [#allocation11], 0 }
   0x7   :  { %26 = vsyncpa [#allocation14], 0 }
   0x8   :  { %27 = vsyncpa [#allocation17], 0 }
   0x9   :  { %28 = vsyncpa [#allocation20], 0 }
   0xa   :  { %29 = vsyncpa [#allocation23], 0  ;;  %s9226_s24 = smov [#allocation4]   ;;  %s9227_s26 = smov [#allocation7]  }
   0xb   :  { %s52_s25 = sshll.u32 %s9226_s24, 4  ;;  %s74_s27 = sshll.u32 %s9227_s26, 4  ;;  %s53_s25 = int_to_ptr.vmem [resolvable:$true] %s52_s25  ;;  %s75_s27 = int_to_ptr.vmem [resolvable:$true] %s74_s27 }
   0xc   :  { %s8880_s0 = scalar_lea.hbm %s9787_s3, 432 }
   0xd   :  { %p8881_p0 = scmp.ne.s32.totalorder %s9787_s3, %s8880_s0  ;;  %p8884_p1 = scmp.lt.u32.totalorder %s8880_s0, %s9787_s3 }
   0xf   :  { %p8886_p2 = pnand %p8884_p1, %p8881_p0 }
  0x11   :  { %8889 = shalt.err (!%p8886_p2)
}
  0x12   :  { %s8890_s20 = scalar_lea.vmem %s53_s25, 432  ;;  %s8894_s21 = scalar_lea.vmem %s53_s25, 448 }
  0x13   :  { %p8891_p3 = scmp.ne.s32.totalorder %s53_s25, %s8890_s20  ;;  %p8895_p4 = scmp.lt.s32.totalorder %s53_s25, %s53_s25 }
  0x14   :  { %p8896_p5 = scmp.lt.s32.totalorder %s8894_s21, %s8890_s20 }
  0x16   :  { %p8897_p6 = por %p8896_p5, %p8895_p4 }
  0x18   :  { %p8898_p7 = pnand %p8897_p6, %p8891_p3 }
  0x1a   :  { %8901 = shalt.err (!%p8898_p7)
}
  0x1b   :  { %55 = dma.hbm_to_vmem [thread:$0]  %s9787_s3, 432, %s53_s25, [#allocation5]  }
  0x1c   :  { %s8902_s28 = scalar_lea.hbm %s9789_s5, 32 }
  0x1d   :  { %p8903_p8 = scmp.ne.s32.totalorder %s9789_s5, %s8902_s28  ;;  %p8906_p9 = scmp.lt.u32.totalorder %s8902_s28, %s9789_s5 }
  0x1f   :  { %p8908_p10 = pnand %p8906_p9, %p8903_p8 }
  0x21   :  { %8911 = shalt.err (!%p8908_p10)
}
  0x22   :  { %s8912_s19 = scalar_lea.vmem %s75_s27, 32  ;;  %p8917_p12 = scmp.lt.s32.totalorder %s75_s27, %s75_s27 }
  0x23   :  { %p8913_p11 = scmp.ne.s32.totalorder %s75_s27, %s8912_s19  ;;  %p8918_p13 = scmp.lt.s32.totalorder %s8912_s19, %s8912_s19 }
  0x25   :  { %p8919_p0 = por %p8918_p13, %p8917_p12 }
  0x27   :  { %p8920_p1 = pnand %p8919_p0, %p8913_p11 }
  0x29   :  { %8923 = shalt.err (!%p8920_p1)
}
  0x2a   :  { %77 = dma.hbm_to_vmem [thread:$0]  %s9789_s5, 32, %s75_s27, [#allocation8]  }
  0x2b   :  { %s9228_s1 = smov [#allocation10]   ;;  %s9229_s21 = smov [#allocation13]  }
  0x2c   :  { %s96_s20 = sshll.u32 %s9228_s1, 4  ;;  %s118_s22 = sshll.u32 %s9229_s21, 4  ;;  %s97_s20 = int_to_ptr.vmem [resolvable:$true] %s96_s20  ;;  %s119_s22 = int_to_ptr.vmem [resolvable:$true] %s118_s22 }
  0x2d   :  { %s8924_s26 = scalar_lea.hbm %s9791_s7, 32 }
  0x2e   :  { %p8925_p2 = scmp.ne.s32.totalorder %s9791_s7, %s8924_s26  ;;  %p8928_p3 = scmp.lt.u32.totalorder %s8924_s26, %s9791_s7 }
  0x30   :  { %p8930_p4 = pnand %p8928_p3, %p8925_p2 }
  0x32   :  { %8933 = shalt.err (!%p8930_p4)
}
  0x33   :  { %s8934_s5 = scalar_lea.vmem %s97_s20, 32  ;;  %p8939_p6 = scmp.lt.s32.totalorder %s97_s20, %s97_s20 }
  0x34   :  { %p8935_p5 = scmp.ne.s32.totalorder %s97_s20, %s8934_s5  ;;  %p8940_p7 = scmp.lt.s32.totalorder %s8934_s5, %s8934_s5 }
  0x36   :  { %p8941_p8 = por %p8940_p7, %p8939_p6 }
  0x38   :  { %p8942_p9 = pnand %p8941_p8, %p8935_p5 }
  0x3a   :  { %8945 = shalt.err (!%p8942_p9)
}
  0x3b   :  { %99 = dma.hbm_to_vmem [thread:$0]  %s9791_s7, 32, %s97_s20, [#allocation11]  }
  0x3c   :  { %s8946_s25 = scalar_lea.hbm %s9793_s9, 64 }
  0x3d   :  { %p8947_p10 = scmp.ne.s32.totalorder %s9793_s9, %s8946_s25  ;;  %p8950_p11 = scmp.lt.u32.totalorder %s8946_s25, %s9793_s9 }
  0x3f   :  { %p8952_p12 = pnand %p8950_p11, %p8947_p10 }
  0x41   :  { %8955 = shalt.err (!%p8952_p12)
}
  0x42   :  { %s8956_s26 = scalar_lea.vmem %s119_s22, 64  ;;  %p8961_p0 = scmp.lt.s32.totalorder %s119_s22, %s119_s22 }
  0x43   :  { %p8957_p13 = scmp.ne.s32.totalorder %s119_s22, %s8956_s26  ;;  %p8962_p1 = scmp.lt.s32.totalorder %s8956_s26, %s8956_s26 }
  0x45   :  { %p8963_p2 = por %p8962_p1, %p8961_p0 }
  0x47   :  { %p8964_p3 = pnand %p8963_p2, %p8957_p13 }
  0x49   :  { %8967 = shalt.err (!%p8964_p3)
}
  0x4a   :  { %121 = dma.hbm_to_vmem [thread:$0]  %s9793_s9, 64, %s119_s22, [#allocation14]  }
  0x4b   :  { %s9230_s28 = smov [#allocation16]   ;;  %s8968_s5 = scalar_lea.hbm %s9795_s11, 16 }
  0x4c   :  { %s138_s29 = sshll.u32 %s9230_s28, 4  ;;  %p8969_p4 = scmp.ne.s32.totalorder %s9795_s11, %s8968_s5  ;;  %s139_s29 = int_to_ptr.vmem [resolvable:$true] %s138_s29 }
  0x4d   :  { %p8972_p5 = scmp.lt.u32.totalorder %s8968_s5, %s9795_s11 }
  0x4f   :  { %p8974_p6 = pnand %p8972_p5, %p8969_p4 }
  0x51   :  { %8977 = shalt.err (!%p8974_p6)
}
  0x52   :  { %s8978_s25 = scalar_lea.vmem %s139_s29, 16  ;;  %s8982_s9 = scalar_lea.vmem %s139_s29, 32 }
  0x53   :  { %p8979_p7 = scmp.ne.s32.totalorder %s139_s29, %s8978_s25  ;;  %p8983_p8 = scmp.lt.s32.totalorder %s139_s29, %s139_s29 }
  0x54   :  { %p8984_p9 = scmp.lt.s32.totalorder %s8982_s9, %s8978_s25 }
  0x56   :  { %p8985_p10 = por %p8984_p9, %p8983_p8 }
  0x58   :  { %p8986_p11 = pnand %p8985_p10, %p8979_p7 }
  0x5a   :  { %8989 = shalt.err (!%p8986_p11)
}
  0x5b   :  { %141 = dma.hbm_to_vmem [thread:$0]  %s9795_s11, 16, %s139_s29, [#allocation17]  }
  0x5c   :  { %s9231_s21 = smov [#allocation19]   ;;  %s9232_s24 = smov [#allocation22]  }
  0x5d   :  { %s159_s23 = sshll.u32 %s9231_s21, 4  ;;  %s181_s26 = sshll.u32 %s9232_s24, 4  ;;  %s160_s23 = int_to_ptr.vmem [resolvable:$true] %s159_s23  ;;  %s182_s26 = int_to_ptr.vmem [resolvable:$true] %s181_s26 }
  0x5e   :  { %s8990_s28 = scalar_lea.hbm %s9797_s13, 512 }
  0x5f   :  { %p8991_p12 = scmp.ne.s32.totalorder %s9797_s13, %s8990_s28  ;;  %p8994_p13 = scmp.lt.u32.totalorder %s8990_s28, %s9797_s13 }
  0x61   :  { %p8996_p0 = pnand %p8994_p13, %p8991_p12 }
  0x63   :  { %8999 = shalt.err (!%p8996_p0)
}
  0x64   :  { %s9000_s11 = scalar_lea.vmem %s160_s23, 512  ;;  %p9005_p2 = scmp.lt.s32.totalorder %s160_s23, %s160_s23 }
  0x65   :  { %p9001_p1 = scmp.ne.s32.totalorder %s160_s23, %s9000_s11  ;;  %p9006_p3 = scmp.lt.s32.totalorder %s9000_s11, %s9000_s11 }
  0x67   :  { %p9007_p4 = por %p9006_p3, %p9005_p2 }
  0x69   :  { %p9008_p5 = pnand %p9007_p4, %p9001_p1 }
  0x6b   :  { %9011 = shalt.err (!%p9008_p5)
}
  0x6c   :  { %s9233_s29 = smov 64   ;;  %s9234_s18 = smov 4  }
  0x6d   :  { %165 = dma.hbm_to_vmem [thread:$0]  %s9797_s13, 512, %s160_s23, [#allocation20], %s9233_s29, %s9233_s29, %s9234_s18  }
  0x6e   :  { %s9012_s22 = scalar_lea.hbm %s9799_s15, 1024 }
  0x6f   :  { %p9013_p6 = scmp.ne.s32.totalorder %s9799_s15, %s9012_s22  ;;  %p9016_p7 = scmp.lt.u32.totalorder %s9012_s22, %s9799_s15 }
  0x71   :  { %p9018_p8 = pnand %p9016_p7, %p9013_p6 }
  0x73   :  { %9021 = shalt.err (!%p9018_p8)
}
  0x74   :  { %s9022_s20 = scalar_lea.vmem %s182_s26, 1024  ;;  %p9027_p10 = scmp.lt.s32.totalorder %s182_s26, %s182_s26 }
  0x75   :  { %p9023_p9 = scmp.ne.s32.totalorder %s182_s26, %s9022_s20  ;;  %p9028_p11 = scmp.lt.s32.totalorder %s9022_s20, %s9022_s20 }
  0x77   :  { %p9029_p12 = por %p9028_p11, %p9027_p10 }
  0x79   :  { %p9030_p13 = pnand %p9029_p12, %p9023_p9 }
  0x7b   :  { %9033 = shalt.err (!%p9030_p13)
}
  0x7c   :  { %187 = dma.hbm_to_vmem [thread:$0]  %s9799_s15, 1024, %s182_s26, [#allocation23], %s9233_s29, %s9233_s29, %s9234_s18  }
  0x7d   :  { %s9235_s28 = smov [#allocation2]   ;;  %s9034_s27 = scalar_lea.hbm %s9786_s2, 27648 }
  0x7e   :  { %s39_s0 = sshll.u32 %s9235_s28, 4  ;;  %p9035_p0 = scmp.ne.s32.totalorder %s9786_s2, %s9034_s27  ;;  %s40_s0 = int_to_ptr.vmem [resolvable:$true] %s39_s0 }
  0x7f   :  { %p9038_p1 = scmp.lt.u32.totalorder %s9034_s27, %s9786_s2 }
  0x81   :  { %p9040_p2 = pnand %p9038_p1, %p9035_p0 }
  0x83   :  { %9043 = shalt.err (!%p9040_p2)
}
  0x84   :  { %s9044_s9 = scalar_lea.vmem %s40_s0, 27648  ;;  %p9049_p4 = scmp.lt.s32.totalorder %s40_s0, %s40_s0 }
  0x85   :  { %p9045_p3 = scmp.ne.s32.totalorder %s40_s0, %s9044_s9  ;;  %p9050_p5 = scmp.lt.s32.totalorder %s9044_s9, %s9044_s9 }
  0x87   :  { %p9051_p6 = por %p9050_p5, %p9049_p4 }
  0x89   :  { %p9052_p7 = pnand %p9051_p6, %p9045_p3 }
  0x8b   :  { %9055 = shalt.err (!%p9052_p7)
}
  0x8c   :  { %s9236_s15 = smov 1728   ;;  %s9237_s26 = smov 108  }
  0x8d   :  { %45 = dma.hbm_to_vmem [thread:$0]  %s9786_s2, 27648, %s40_s0, [#allocation3], %s9236_s15, %s9236_s15, %s9237_s26  }
  0x8e   :  { %s9238_s21 = smov [#allocation6]   ;;  %s9056_s13 = scalar_lea.hbm %s9788_s4, 55296 }
  0x8f   :  { %s61_s24 = sshll.u32 %s9238_s21, 4  ;;  %p9057_p8 = scmp.ne.s32.totalorder %s9788_s4, %s9056_s13  ;;  %s62_s24 = int_to_ptr.vmem [resolvable:$true] %s61_s24 }
  0x90   :  { %p9060_p9 = scmp.lt.u32.totalorder %s9056_s13, %s9788_s4 }
  0x92   :  { %p9062_p10 = pnand %p9060_p9, %p9057_p8 }
  0x94   :  { %9065 = shalt.err (!%p9062_p10)
}
  0x95   :  { %s9066_s27 = scalar_lea.vmem %s62_s24, 55296  ;;  %p9071_p12 = scmp.lt.s32.totalorder %s62_s24, %s62_s24 }
  0x96   :  { %p9067_p11 = scmp.ne.s32.totalorder %s62_s24, %s9066_s27  ;;  %p9072_p13 = scmp.lt.s32.totalorder %s9066_s27, %s9066_s27 }
  0x98   :  { %p9073_p0 = por %p9072_p13, %p9071_p12 }
  0x9a   :  { %p9074_p1 = pnand %p9073_p0, %p9067_p11 }
  0x9c   :  { %9077 = shalt.err (!%p9074_p1)
}
  0x9d   :  { %s9239_s2 = smov 128   ;;  %s9240_s0 = smov 8  }
  0x9e   :  { %67 = dma.hbm_to_vmem [thread:$0]  %s9788_s4, 55296, %s62_s24, [#allocation5], %s9239_s2, %s9239_s2, %s9240_s0  }
  0x9f   :  { %s9241_s3 = smov [#allocation9]   ;;  %s9242_s9 = smov [#allocation12]  }
  0xa0   :  { %s83_s25 = sshll.u32 %s9241_s3, 4  ;;  %s105_s15 = sshll.u32 %s9242_s9, 4  ;;  %s84_s25 = int_to_ptr.vmem [resolvable:$true] %s83_s25  ;;  %s106_s15 = int_to_ptr.vmem [resolvable:$true] %s105_s15 }
  0xa1   :  { %s9078_s1 = scalar_lea.hbm %s9790_s6, 2048 }
  0xa2   :  { %p9079_p2 = scmp.ne.s32.totalorder %s9790_s6, %s9078_s1  ;;  %p9082_p3 = scmp.lt.u32.totalorder %s9078_s1, %s9790_s6 }
  0xa4   :  { %p9084_p4 = pnand %p9082_p3, %p9079_p2 }
  0xa6   :  { %9087 = shalt.err (!%p9084_p4)
}
  0xa7   :  { %s9088_s4 = scalar_lea.vmem %s84_s25, 2048  ;;  %p9093_p6 = scmp.lt.s32.totalorder %s84_s25, %s84_s25 }
  0xa8   :  { %p9089_p5 = scmp.ne.s32.totalorder %s84_s25, %s9088_s4  ;;  %p9094_p7 = scmp.lt.s32.totalorder %s9088_s4, %s9088_s4 }
  0xaa   :  { %p9095_p8 = por %p9094_p7, %p9093_p6 }
  0xac   :  { %p9096_p9 = pnand %p9095_p8, %p9089_p5 }
  0xae   :  { %9099 = shalt.err (!%p9096_p9)
}
  0xaf   :  { %89 = dma.hbm_to_vmem [thread:$0]  %s9790_s6, 2048, %s84_s25, [#allocation8], %s9239_s2, %s9239_s2, %s9240_s0  }
  0xb0   :  { %s9100_s5 = scalar_lea.hbm %s9792_s8, 8192 }
  0xb1   :  { %p9101_p10 = scmp.ne.s32.totalorder %s9792_s8, %s9100_s5  ;;  %p9104_p11 = scmp.lt.u32.totalorder %s9100_s5, %s9792_s8 }
  0xb3   :  { %p9106_p12 = pnand %p9104_p11, %p9101_p10 }
  0xb5   :  { %9109 = shalt.err (!%p9106_p12)
}
  0xb6   :  { %s9110_s9 = scalar_lea.vmem %s106_s15, 8192  ;;  %p9115_p0 = scmp.lt.s32.totalorder %s106_s15, %s106_s15 }
  0xb7   :  { %p9111_p13 = scmp.ne.s32.totalorder %s106_s15, %s9110_s9  ;;  %p9116_p1 = scmp.lt.s32.totalorder %s9110_s9, %s9110_s9 }
  0xb9   :  { %p9117_p2 = por %p9116_p1, %p9115_p0 }
  0xbb   :  { %p9118_p3 = pnand %p9117_p2, %p9111_p13 }
  0xbd   :  { %9121 = shalt.err (!%p9118_p3)
}
  0xbe   :  { %s9243_s6 = smov 256   ;;  %s9244_s2 = smov 16  }
  0xbf   :  { %111 = dma.hbm_to_vmem [thread:$0]  %s9792_s8, 8192, %s106_s15, [#allocation11], %s9243_s6, %s9243_s6, %s9244_s2  }
  0xc0   :  { %s9245_s26 = smov [#allocation15]   ;;  %s9246_s1 = smov [#allocation18]  }
  0xc1   :  { %s128_s22 = sshll.u32 %s9245_s26, 4  ;;  %s147_s21 = sshll.u32 %s9246_s1, 4  ;;  %s129_s22 = int_to_ptr.vmem [resolvable:$true] %s128_s22  ;;  %s148_s21 = int_to_ptr.vmem [resolvable:$true] %s147_s21 }
  0xc2   :  { %s9122_s13 = scalar_lea.hbm %s9794_s10, 64 }
  0xc3   :  { %p9123_p4 = scmp.ne.s32.totalorder %s9794_s10, %s9122_s13  ;;  %p9126_p5 = scmp.lt.u32.totalorder %s9122_s13, %s9794_s10 }
  0xc5   :  { %p9128_p6 = pnand %p9126_p5, %p9123_p4 }
  0xc7   :  { %9131 = shalt.err (!%p9128_p6)
}
  0xc8   :  { %s9132_s8 = scalar_lea.vmem %s129_s22, 64  ;;  %p9137_p8 = scmp.lt.s32.totalorder %s129_s22, %s129_s22 }
  0xc9   :  { %p9133_p7 = scmp.ne.s32.totalorder %s129_s22, %s9132_s8  ;;  %p9138_p9 = scmp.lt.s32.totalorder %s9132_s8, %s9132_s8 }
  0xcb   :  { %p9139_p10 = por %p9138_p9, %p9137_p8 }
  0xcd   :  { %p9140_p11 = pnand %p9139_p10, %p9133_p7 }
  0xcf   :  { %9143 = shalt.err (!%p9140_p11)
}
  0xd0   :  { %131 = dma.hbm_to_vmem [thread:$0]  %s9794_s10, 64, %s129_s22, [#allocation14]  }
  0xd1   :  { %s9144_s11 = scalar_lea.hbm %s9796_s12, 4096 }
  0xd2   :  { %p9145_p12 = scmp.ne.s32.totalorder %s9796_s12, %s9144_s11  ;;  %p9148_p13 = scmp.lt.u32.totalorder %s9144_s11, %s9796_s12 }
  0xd4   :  { %p9150_p0 = pnand %p9148_p13, %p9145_p12 }
  0xd6   :  { %9153 = shalt.err (!%p9150_p0)
}
  0xd7   :  { %s9154_s2 = scalar_lea.vmem %s148_s21, 4096  ;;  %p9159_p2 = scmp.lt.s32.totalorder %s148_s21, %s148_s21 }
  0xd8   :  { %p9155_p1 = scmp.ne.s32.totalorder %s148_s21, %s9154_s2  ;;  %p9160_p3 = scmp.lt.s32.totalorder %s9154_s2, %s9154_s2 }
  0xda   :  { %p9161_p4 = por %p9160_p3, %p9159_p2 }
  0xdc   :  { %p9162_p5 = pnand %p9161_p4, %p9155_p1 }
  0xde   :  { %9165 = shalt.err (!%p9162_p5)
}
  0xdf   :  { %153 = dma.hbm_to_vmem [thread:$0]  %s9796_s12, 4096, %s148_s21, [#allocation17], %s9233_s29, %s9233_s29, %s9234_s18  }
  0xe0   :  { %s9247_s25 = smov [#allocation21]   ;;  %s9248_s22 = smov [#allocation24]  }
  0xe1   :  { %s172_s26 = sshll.u32 %s9247_s25, 4  ;;  %s194_s1 = sshll.u32 %s9248_s22, 4  ;;  %s173_s26 = int_to_ptr.vmem [resolvable:$true] %s172_s26  ;;  %s195_s1 = int_to_ptr.vmem [resolvable:$true] %s194_s1 }
  0xe2   :  { %s9166_s13 = scalar_lea.hbm %s9798_s14, 16 }
  0xe3   :  { %p9167_p6 = scmp.ne.s32.totalorder %s9798_s14, %s9166_s13  ;;  %p9170_p7 = scmp.lt.u32.totalorder %s9166_s13, %s9798_s14 }
  0xe5   :  { %p9172_p8 = pnand %p9170_p7, %p9167_p6 }
  0xe7   :  { %9175 = shalt.err (!%p9172_p8)
}
  0xe8   :  { %s9176_s12 = scalar_lea.vmem %s173_s26, 16  ;;  %s9180_s29 = scalar_lea.vmem %s173_s26, 32 }
  0xe9   :  { %p9177_p9 = scmp.ne.s32.totalorder %s173_s26, %s9176_s12  ;;  %p9181_p10 = scmp.lt.s32.totalorder %s173_s26, %s173_s26 }
  0xea   :  { %p9182_p11 = scmp.lt.s32.totalorder %s9180_s29, %s9176_s12 }
  0xec   :  { %p9183_p12 = por %p9182_p11, %p9181_p10 }
  0xee   :  { %p9184_p13 = pnand %p9183_p12, %p9177_p9 }
  0xf0   :  { %9187 = shalt.err (!%p9184_p13)
}
  0xf1   :  { %175 = dma.hbm_to_vmem [thread:$0]  %s9798_s14, 16, %s173_s26, [#allocation20]  }
  0xf2   :  { %s9188_s30 = scalar_lea.hbm %s9800_s16, 16 }
  0xf3   :  { %p9189_p0 = scmp.ne.s32.totalorder %s9800_s16, %s9188_s30  ;;  %p9192_p1 = scmp.lt.u32.totalorder %s9188_s30, %s9800_s16 }
  0xf5   :  { %p9194_p2 = pnand %p9192_p1, %p9189_p0 }
  0xf7   :  { %9197 = shalt.err (!%p9194_p2)
}
  0xf8   :  { %s9198_s3 = scalar_lea.vmem %s195_s1, 16  ;;  %s9202_s9 = scalar_lea.vmem %s195_s1, 32 }
  0xf9   :  { %p9199_p3 = scmp.ne.s32.totalorder %s195_s1, %s9198_s3  ;;  %p9203_p4 = scmp.lt.s32.totalorder %s195_s1, %s195_s1 }
  0xfa   :  { %p9204_p5 = scmp.lt.s32.totalorder %s9202_s9, %s9198_s3 }
  0xfc   :  { %p9205_p6 = por %p9204_p5, %p9203_p4 }
  0xfe   :  { %p9206_p7 = pnand %p9205_p6, %p9199_p3 }
 0x100   :  { %9209 = shalt.err (!%p9206_p7)
}
 0x101   :  { %197 = dma.hbm_to_vmem [thread:$0]  %s9800_s16, 16, %s195_s1, [#allocation23]  }
 0x102   :  { %9210 = dma.done.wait [#allocation3], 27648  }
 0x103   :  { %9211 = vsyncadd [#allocation3], 4294939648 }
 0x104   :  { %9212 = dma.done.wait [#allocation5], 55728  }
 0x105   :  { %9213 = vsyncadd [#allocation5], 4294911568 }
 0x106   :  { %9214 = dma.done.wait [#allocation8], 2080  }
 0x107   :  { %9215 = vsyncadd [#allocation8], 4294965216 }
 0x108   :  { %9216 = dma.done.wait [#allocation11], 8224  }
 0x109   :  { %9217 = vsyncadd [#allocation11], 4294959072 }
 0x10a   :  { %9218 = dma.done.wait [#allocation14], 128  }
 0x10b   :  { %9219 = vsyncadd [#allocation14], 4294967168 }
 0x10c   :  { %9220 = dma.done.wait [#allocation17], 4112  }
 0x10d   :  { %9221 = vsyncadd [#allocation17], 4294963184 }
 0x10e   :  { %9222 = dma.done.wait [#allocation20], 528  }
 0x10f   :  { %9223 = vsyncadd [#allocation20], 4294966768 }
 0x110   :  { %9224 = dma.done.wait [#allocation23], 1040  }
 0x111   :  { %9225 = vsyncadd [#allocation23], 4294966256  ;;  %v9249_v0 = vmov 0   ;;  %v7747_v1 = vld [vmem:[#allocation2 + $0x4] ss:$108 sps:$4 sm:$0xff]   ;;  %s9804_s10 = sld [smem:[#allocation33_spill]] }
 0x112   :  { %1733 = vmatprep.mubr.bf16.mxu1 %v9249_v0  ;;  %1815 = vmatprep.mubr.bf16.mxu0 %v9249_v0  ;;  %v7749_v2 = vld [vmem:[#allocation2 + $0x14] ss:$108 sps:$4 sm:$0xff]   ;;  %v7752_v4 = vld [vmem:[#allocation2 + $0x10] ss:$108 sps:$4 sm:$0xff]   ;;  %v7755_v6 = vld [vmem:[#allocation2 + $0xec] ss:$108 sps:$4 sm:$0xff]  }
 0x113   :  { %1701 = vmatprep.subr.bf16.mxu1 %v7747_v1  ;;  %v7751_v3 = vld [vmem:[#allocation2] ss:$108 sps:$4 sm:$0xff]   ;;  %1783 = vmatprep.subr.bf16.mxu0 %v7749_v2  ;;  %v7753_v5 = vld [vmem:[#allocation2 + $0xdc] ss:$108 sps:$4 sm:$0xff]   ;;  %v7757_v7 = vld [vmem:[#allocation2 + $0xd8] ss:$108 sps:$4 sm:$0xff]  }
 0x114   :  { %1702 = vmatpush1.bf16.msra.mxu1 %v7751_v3  ;;  %1784 = vmatpush1.bf16.msra.mxu0 %v7752_v4  ;;  %v7758_v8 = vld [vmem:[#allocation2 + $0xe8] ss:$108 sps:$4 sm:$0xff]   ;;  %v7761_v10 = vld [vmem:[#allocation2 + $0x1c4] ss:$108 sps:$4 sm:$0xff]   ;;  %v7764_v12 = vld [vmem:[#allocation2 + $0x1c0] ss:$108 sps:$4 sm:$0xff]  }
 0x115   :  { %1703 = vmatprep.subr.bf16.mxu1 %v7753_v5  ;;  %1785 = vmatprep.subr.bf16.mxu0 %v7755_v6  ;;  %v7759_v9 = vld [vmem:[#allocation2 + $0x1b4] ss:$108 sps:$4 sm:$0xff]   ;;  %v7763_v11 = vld [vmem:[#allocation2 + $0x1b0] ss:$108 sps:$4 sm:$0xff]   ;;  %v7765_v13 = vld [vmem:[#allocation2 + $0x28c] ss:$108 sps:$4 sm:$0xff]  }
 0x116   :  { %v7767_v14 = vld [vmem:[#allocation2 + $0x29c] ss:$108 sps:$4 sm:$0xff]   ;;  %v7770_v16 = vld [vmem:[#allocation2 + $0x298] ss:$108 sps:$4 sm:$0xff]   ;;  %v7773_v18 = vld [vmem:[#allocation2 + $0x374] ss:$108 sps:$4 sm:$0xff]  }
 0x117   :  { %v7769_v15 = vld [vmem:[#allocation2 + $0x288] ss:$108 sps:$4 sm:$0xff]   ;;  %v7771_v17 = vld [vmem:[#allocation2 + $0x364] ss:$108 sps:$4 sm:$0xff]   ;;  %v7775_v19 = vld [vmem:[#allocation2 + $0x360] ss:$108 sps:$4 sm:$0xff]  }
 0x118   :  { %1704 = vmatpush1.bf16.msra.mxu1 %v7757_v7  ;;  %1786 = vmatpush1.bf16.msra.mxu0 %v7758_v8  ;;  %v7776_v20 = vld [vmem:[#allocation2 + $0x370] ss:$108 sps:$4 sm:$0xff]   ;;  %v7779_v22 = vld [vmem:[#allocation2 + $0x44c] ss:$108 sps:$4 sm:$0xff]   ;;  %v7782_v24 = vld [vmem:[#allocation2 + $0x448] ss:$108 sps:$4 sm:$0xff]  }
 0x119   :  { %1705 = vmatprep.subr.bf16.mxu1 %v7759_v9  ;;  %1787 = vmatprep.subr.bf16.mxu0 %v7761_v10  ;;  %v7777_v21 = vld [vmem:[#allocation2 + $0x43c] ss:$108 sps:$4 sm:$0xff]   ;;  %v7781_v23 = vld [vmem:[#allocation2 + $0x438] ss:$108 sps:$4 sm:$0xff]   ;;  %v7783_v25 = vld [vmem:[#allocation2 + $0x514] ss:$108 sps:$4 sm:$0xff]  }
 0x11a   :  { %v7785_v26 = vld [vmem:[#allocation2 + $0x524] ss:$108 sps:$4 sm:$0xff]   ;;  %v7788_v28 = vld [vmem:[#allocation2 + $0x520] ss:$108 sps:$4 sm:$0xff]   ;;  %v7791_v30 = vld [vmem:[#allocation2 + $0x5fc] ss:$108 sps:$4 sm:$0xff]  }
 0x11b   :  { %v7787_v27 = vld [vmem:[#allocation2 + $0x510] ss:$108 sps:$4 sm:$0xff]   ;;  %v7789_v29 = vld [vmem:[#allocation2 + $0x5ec] ss:$108 sps:$4 sm:$0xff]   ;;  %v7793_v31 = vld [vmem:[#allocation2 + $0x5e8] ss:$108 sps:$4 sm:$0xff]  }
 0x11c   :  { %1706 = vmatpush1.bf16.msra.mxu1 %v7763_v11  ;;  %1788 = vmatpush1.bf16.msra.mxu0 %v7764_v12  ;;  %v7794_v32 = vld [vmem:[#allocation2 + $0x5f8] ss:$108 sps:$4 sm:$0xff]   ;;  %v7795_v37 = vld [vmem:[#allocation2 + $0x8] ss:$108 sps:$4 sm:$0xff]   ;;  %v7798_v38 = vld [vmem:[#allocation2 + $0x20] ss:$108 sps:$4 sm:$0xff]  }
 0x11d   :  { %1707 = vmatprep.subr.bf16.mxu1 %v7765_v13  ;;  %1789 = vmatprep.subr.bf16.mxu0 %v7767_v14  ;;  %v244_v33 = vld [vmem:[%s9804_s10] sm:$0xff]  ;;  %v7797_v34 = vld [vmem:[#allocation2 + $0xc] ss:$108 sps:$4 sm:$0xff]   ;;  %v7806_v40 = vld [vmem:[#allocation2 + $0xfc] ss:$108 sps:$4 sm:$0xff]   ;;  %vm9251_vm0 = vmmov 0  }
 0x11e   :  { %v7800_v35 = vld [vmem:[#allocation2 + $0x24] ss:$108 sps:$4 sm:$0xff]   ;;  %v9536_v36 = vpack.c.bf16 %v244_v33, %v244_v33  ;;  %v7801_v41 = vld [vmem:[#allocation2 + $0xe0] ss:$108 sps:$4 sm:$0xff]   ;;  %v7809_v43 = vld [vmem:[#allocation2 + $0x1bc] ss:$108 sps:$4 sm:$0xff]  }
 0x11f   :  { %v7803_v39 = vld [vmem:[#allocation2 + $0xe4] ss:$108 sps:$4 sm:$0xff]   ;;  %v7812_v44 = vld [vmem:[#allocation2 + $0x1d4] ss:$108 sps:$4 sm:$0xff]   ;;  %v7818_v48 = vld [vmem:[#allocation2 + $0x2ac] ss:$108 sps:$4 sm:$0xff]  }
 0x120   :  { %1708 = vmatpush1.bf16.msra.mxu1 %v7769_v15  ;;  %1790 = vmatpush1.bf16.msra.mxu0 %v7770_v16  ;;  %v7804_v42 = vld [vmem:[#allocation2 + $0xf8] ss:$108 sps:$4 sm:$0xff]   ;;  %v7810_v46 = vld [vmem:[#allocation2 + $0x1d0] ss:$108 sps:$4 sm:$0xff]   ;;  %v7815_v47 = vld [vmem:[#allocation2 + $0x294] ss:$108 sps:$4 sm:$0xff]  }
 0x121   :  { %1709 = vmatprep.subr.bf16.mxu1 %v7771_v17  ;;  %1791 = vmatprep.subr.bf16.mxu0 %v7773_v18  ;;  %v7807_v45 = vld [vmem:[#allocation2 + $0x1b8] ss:$108 sps:$4 sm:$0xff]   ;;  %v7813_v49 = vld [vmem:[#allocation2 + $0x290] ss:$108 sps:$4 sm:$0xff]   ;;  %v7816_v50 = vld [vmem:[#allocation2 + $0x2a8] ss:$108 sps:$4 sm:$0xff]  }
 0x122   :  { %v7821_v51 = vld [vmem:[#allocation2 + $0x36c] ss:$108 sps:$4 sm:$0xff]   ;;  %v7824_v52 = vld [vmem:[#allocation2 + $0x384] ss:$108 sps:$4 sm:$0xff]   ;;  %v7819_v53 = vld [vmem:[#allocation2 + $0x368] ss:$108 sps:$4 sm:$0xff]  }
 0x123   :  { %v7822_v54 = vld [vmem:[#allocation2 + $0x380] ss:$108 sps:$4 sm:$0xff]   ;;  %v7827_v55 = vld [vmem:[#allocation2 + $0x444] ss:$108 sps:$4 sm:$0xff]   ;;  %v7830_v56 = vld [vmem:[#allocation2 + $0x45c] ss:$108 sps:$4 sm:$0xff]  }
 0x124   :  { %1710 = vmatpush1.bf16.msra.mxu1 %v7775_v19  ;;  %1792 = vmatpush1.bf16.msra.mxu0 %v7776_v20  ;;  %v7825_v57 = vld [vmem:[#allocation2 + $0x440] ss:$108 sps:$4 sm:$0xff]   ;;  %v7828_v58 = vld [vmem:[#allocation2 + $0x458] ss:$108 sps:$4 sm:$0xff]   ;;  %v7833_v59 = vld [vmem:[#allocation2 + $0x51c] ss:$108 sps:$4 sm:$0xff]  }
 0x125   :  { %1711 = vmatprep.subr.bf16.mxu1 %v7777_v21  ;;  %1793 = vmatprep.subr.bf16.mxu0 %v7779_v22  ;;  %v7836_v60 = vld [vmem:[#allocation2 + $0x534] ss:$108 sps:$4 sm:$0xff]   ;;  %v7831_v61 = vld [vmem:[#allocation2 + $0x518] ss:$108 sps:$4 sm:$0xff]   ;;  %v7834_v62 = vld [vmem:[#allocation2 + $0x530] ss:$108 sps:$4 sm:$0xff]  }
 0x126   :  { %v7839_v63 = vld [vmem:[#allocation2 + $0x5f4] ss:$108 sps:$4 sm:$0xff]   ;;  %v7842_v1 = vld [vmem:[#allocation2 + $0x60c] ss:$108 sps:$4 sm:$0xff]   ;;  %v7837_v2 = vld [vmem:[#allocation2 + $0x5f0] ss:$108 sps:$4 sm:$0xff]  }
 0x127   :  { %v7840_v3 = vld [vmem:[#allocation2 + $0x608] ss:$108 sps:$4 sm:$0xff]   ;;  %v7843_v6 = vld [vmem:[#allocation2 + $0x18] ss:$108 sps:$4 sm:$0xff]   ;;  %v7864_v7 = vld [vmem:[#allocation2 + $0x30] ss:$108 sps:$4 sm:$0xff]  }
 0x128   :  { %1712 = vmatpush1.bf16.msra.mxu1 %v7781_v23  ;;  %1794 = vmatpush1.bf16.msra.mxu0 %v7782_v24  ;;  %v7845_v4 = vld [vmem:[#allocation2 + $0x1c] ss:$108 sps:$4 sm:$0xff]   ;;  %v7866_v5 = vld [vmem:[#allocation2 + $0x34] ss:$108 sps:$4 sm:$0xff]   ;;  %v7872_v9 = vld [vmem:[#allocation2 + $0x10c] ss:$108 sps:$4 sm:$0xff]  }
 0x129   :  { %1713 = vmatprep.subr.bf16.mxu1 %v7783_v25  ;;  %1795 = vmatprep.subr.bf16.mxu0 %v7785_v26  ;;  %v7848_v8 = vld [vmem:[#allocation2 + $0xf4] ss:$108 sps:$4 sm:$0xff]   ;;  %v7846_v10 = vld [vmem:[#allocation2 + $0xf0] ss:$108 sps:$4 sm:$0xff]   ;;  %v7851_v12 = vld [vmem:[#allocation2 + $0x1cc] ss:$108 sps:$4 sm:$0xff]  }
 0x12a   :  { %v7870_v11 = vld [vmem:[#allocation2 + $0x108] ss:$108 sps:$4 sm:$0xff]   ;;  %v7878_v13 = vld [vmem:[#allocation2 + $0x1e4] ss:$108 sps:$4 sm:$0xff]   ;;  %v7876_v15 = vld [vmem:[#allocation2 + $0x1e0] ss:$108 sps:$4 sm:$0xff]  }
 0x12b   :  { %v7849_v14 = vld [vmem:[#allocation2 + $0x1c8] ss:$108 sps:$4 sm:$0xff]   ;;  %v7854_v16 = vld [vmem:[#allocation2 + $0x2a4] ss:$108 sps:$4 sm:$0xff]   ;;  %v7852_v18 = vld [vmem:[#allocation2 + $0x2a0] ss:$108 sps:$4 sm:$0xff]  }
 0x12c   :  { %1714 = vmatpush1.bf16.msra.mxu1 %v7787_v27  ;;  %1796 = vmatpush1.bf16.msra.mxu0 %v7788_v28  ;;  %v7884_v17 = vld [vmem:[#allocation2 + $0x2bc] ss:$108 sps:$4 sm:$0xff]   ;;  %v7882_v19 = vld [vmem:[#allocation2 + $0x2b8] ss:$108 sps:$4 sm:$0xff]   ;;  %v7890_v21 = vld [vmem:[#allocation2 + $0x394] ss:$108 sps:$4 sm:$0xff]  }
 0x12d   :  { %1715 = vmatprep.subr.bf16.mxu1 %v7789_v29  ;;  %1797 = vmatprep.subr.bf16.mxu0 %v7791_v30  ;;  %v7857_v20 = vld [vmem:[#allocation2 + $0x37c] ss:$108 sps:$4 sm:$0xff]   ;;  %v7855_v22 = vld [vmem:[#allocation2 + $0x378] ss:$108 sps:$4 sm:$0xff]   ;;  %v7860_v24 = vld [vmem:[#allocation2 + $0x454] ss:$108 sps:$4 sm:$0xff]  }
 0x12e   :  { %v7888_v23 = vld [vmem:[#allocation2 + $0x390] ss:$108 sps:$4 sm:$0xff]   ;;  %v7896_v25 = vld [vmem:[#allocation2 + $0x46c] ss:$108 sps:$4 sm:$0xff]   ;;  %v7894_v27 = vld [vmem:[#allocation2 + $0x468] ss:$108 sps:$4 sm:$0xff]  }
 0x12f   :  { %v7858_v26 = vld [vmem:[#allocation2 + $0x450] ss:$108 sps:$4 sm:$0xff]   ;;  %v7863_v28 = vld [vmem:[#allocation2 + $0x52c] ss:$108 sps:$4 sm:$0xff]   ;;  %v7861_v30 = vld [vmem:[#allocation2 + $0x528] ss:$108 sps:$4 sm:$0xff]  }
 0x130   :  { %1716 = vmatpush1.bf16.msra.mxu1 %v7793_v31  ;;  %1798 = vmatpush1.bf16.msra.mxu0 %v7794_v32  ;;  %v7902_v29 = vld [vmem:[#allocation2 + $0x544] ss:$108 sps:$4 sm:$0xff]   ;;  %v7900_v31 = vld [vmem:[#allocation2 + $0x540] ss:$108 sps:$4 sm:$0xff]   ;;  %v7908_v33 = vld [vmem:[#allocation2 + $0x61c] ss:$108 sps:$4 sm:$0xff]  }
 0x131   :  { %1742 = vmatprep.subr.bf16.mxu1 %v7797_v34  ;;  %1865 = vmatprep.subr.bf16.mxu0 %v7800_v35  ;;  %v7869_v32 = vld [vmem:[#allocation2 + $0x604] ss:$108 sps:$4 sm:$0xff]   ;;  %v7867_v34 = vld [vmem:[#allocation2 + $0x600] ss:$108 sps:$4 sm:$0xff]   ;;  %vm6169_vm1 = vcmask 1042432   ;;  %s9805_s26 = sld [smem:[#allocation34_spill]] }
 0x132   :  { %v7906_v35 = vld [vmem:[#allocation2 + $0x618] ss:$108 sps:$4 sm:$0xff]   ;;  %vm6165_vm2 = vcmask 48128   ;;  %vm6315_vm3 = vcmask 523264  }
 0x133   :  { %1734 = vmatmul.mubr.bf16.vlgmr.msra.gmra.mrb[0].mxu1 %v9536_v36  ;;  %1816 = vmatmul.mubr.bf16.vlgmr.msra.gmra.mrb[0].mxu0 %v9536_v36 }
 0x134   :  { %1743 = vmatpush1.bf16.msra.mxu1 %v7795_v37  ;;  %1866 = vmatpush1.bf16.msra.mxu0 %v7798_v38  ;;  %v7875_v37 = vld [vmem:[#allocation2 + $0x2c] ss:$108 sps:$4 sm:$0xff]   ;;  %v7914_v38 = vld [vmem:[#allocation2 + $0x44] ss:$108 sps:$4 sm:$0xff]  }
 0x135   :  { %1744 = vmatprep.subr.bf16.mxu1 %v7803_v39  ;;  %1867 = vmatprep.subr.bf16.mxu0 %v7806_v40  ;;  %v7873_v39 = vld [vmem:[#allocation2 + $0x28] ss:$108 sps:$4 sm:$0xff]   ;;  %v7912_v40 = vld [vmem:[#allocation2 + $0x40] ss:$108 sps:$4 sm:$0xff]  }
 0x136   :  { %1774 = vmatprep.mubr.bf16.mxu1 %v9249_v0  ;;  %1897 = vmatprep.mubr.bf16.mxu0 %v9249_v0 }
 0x138   :  { %1745 = vmatpush1.bf16.msra.mxu1 %v7801_v41  ;;  %1868 = vmatpush1.bf16.msra.mxu0 %v7804_v42  ;;  %v7881_v41 = vld [vmem:[#allocation2 + $0x104] ss:$108 sps:$4 sm:$0xff]   ;;  %v7920_v42 = vld [vmem:[#allocation2 + $0x11c] ss:$108 sps:$4 sm:$0xff]  }
 0x139   :  { %1746 = vmatprep.subr.bf16.mxu1 %v7809_v43  ;;  %1869 = vmatprep.subr.bf16.mxu0 %v7812_v44  ;;  %v7879_v43 = vld [vmem:[#allocation2 + $0x100] ss:$108 sps:$4 sm:$0xff]   ;;  %v7918_v44 = vld [vmem:[#allocation2 + $0x118] ss:$108 sps:$4 sm:$0xff]  }
 0x13c   :  { %1747 = vmatpush1.bf16.msra.mxu1 %v7807_v45  ;;  %1870 = vmatpush1.bf16.msra.mxu0 %v7810_v46  ;;  %v7887_v45 = vld [vmem:[#allocation2 + $0x1dc] ss:$108 sps:$4 sm:$0xff]   ;;  %v7926_v46 = vld [vmem:[#allocation2 + $0x1f4] ss:$108 sps:$4 sm:$0xff]  }
 0x13d   :  { %1748 = vmatprep.subr.bf16.mxu1 %v7815_v47  ;;  %1871 = vmatprep.subr.bf16.mxu0 %v7818_v48  ;;  %v7885_v47 = vld [vmem:[#allocation2 + $0x1d8] ss:$108 sps:$4 sm:$0xff]   ;;  %v7924_v48 = vld [vmem:[#allocation2 + $0x1f0] ss:$108 sps:$4 sm:$0xff]  }
 0x140   :  { %1749 = vmatpush1.bf16.msra.mxu1 %v7813_v49  ;;  %1872 = vmatpush1.bf16.msra.mxu0 %v7816_v50  ;;  %v7893_v49 = vld [vmem:[#allocation2 + $0x2b4] ss:$108 sps:$4 sm:$0xff]   ;;  %v7932_v50 = vld [vmem:[#allocation2 + $0x2cc] ss:$108 sps:$4 sm:$0xff]  }
 0x141   :  { %1750 = vmatprep.subr.bf16.mxu1 %v7821_v51  ;;  %1873 = vmatprep.subr.bf16.mxu0 %v7824_v52  ;;  %v7891_v51 = vld [vmem:[#allocation2 + $0x2b0] ss:$108 sps:$4 sm:$0xff]   ;;  %v7930_v52 = vld [vmem:[#allocation2 + $0x2c8] ss:$108 sps:$4 sm:$0xff]  }
 0x144   :  { %1751 = vmatpush1.bf16.msra.mxu1 %v7819_v53  ;;  %1874 = vmatpush1.bf16.msra.mxu0 %v7822_v54  ;;  %v7899_v53 = vld [vmem:[#allocation2 + $0x38c] ss:$108 sps:$4 sm:$0xff]   ;;  %v7938_v54 = vld [vmem:[#allocation2 + $0x3a4] ss:$108 sps:$4 sm:$0xff]  }
 0x145   :  { %1752 = vmatprep.subr.bf16.mxu1 %v7827_v55  ;;  %1875 = vmatprep.subr.bf16.mxu0 %v7830_v56  ;;  %v7897_v55 = vld [vmem:[#allocation2 + $0x388] ss:$108 sps:$4 sm:$0xff]   ;;  %v7936_v56 = vld [vmem:[#allocation2 + $0x3a0] ss:$108 sps:$4 sm:$0xff]  }
 0x148   :  { %1753 = vmatpush1.bf16.msra.mxu1 %v7825_v57  ;;  %1876 = vmatpush1.bf16.msra.mxu0 %v7828_v58  ;;  %v7905_v57 = vld [vmem:[#allocation2 + $0x464] ss:$108 sps:$4 sm:$0xff]   ;;  %v7944_v58 = vld [vmem:[#allocation2 + $0x47c] ss:$108 sps:$4 sm:$0xff]  }
 0x149   :  { %1754 = vmatprep.subr.bf16.mxu1 %v7833_v59  ;;  %1877 = vmatprep.subr.bf16.mxu0 %v7836_v60  ;;  %v7903_v59 = vld [vmem:[#allocation2 + $0x460] ss:$108 sps:$4 sm:$0xff]   ;;  %v7942_v60 = vld [vmem:[#allocation2 + $0x478] ss:$108 sps:$4 sm:$0xff]  }
 0x14c   :  { %1755 = vmatpush1.bf16.msra.mxu1 %v7831_v61  ;;  %1878 = vmatpush1.bf16.msra.mxu0 %v7834_v62  ;;  %v7911_v61 = vld [vmem:[#allocation2 + $0x53c] ss:$108 sps:$4 sm:$0xff]   ;;  %v7950_v62 = vld [vmem:[#allocation2 + $0x554] ss:$108 sps:$4 sm:$0xff]  }
 0x14d   :  { %1756 = vmatprep.subr.bf16.mxu1 %v7839_v63  ;;  %1879 = vmatprep.subr.bf16.mxu0 %v7842_v1  ;;  %v7909_v63 = vld [vmem:[#allocation2 + $0x538] ss:$108 sps:$4 sm:$0xff]   ;;  %v7948_v1 = vld [vmem:[#allocation2 + $0x550] ss:$108 sps:$4 sm:$0xff]  }
 0x150   :  { %1757 = vmatpush1.bf16.msra.mxu1 %v7837_v2  ;;  %1880 = vmatpush1.bf16.msra.mxu0 %v7840_v3  ;;  %v7917_v2 = vld [vmem:[#allocation2 + $0x614] ss:$108 sps:$4 sm:$0xff]   ;;  %v7956_v3 = vld [vmem:[#allocation2 + $0x62c] ss:$108 sps:$4 sm:$0xff]  }
 0x151   :  { %1824 = vmatprep.subr.bf16.mxu1 %v7845_v4  ;;  %1947 = vmatprep.subr.bf16.mxu0 %v7866_v5  ;;  %v7915_v4 = vld [vmem:[#allocation2 + $0x610] ss:$108 sps:$4 sm:$0xff]   ;;  %v7954_v5 = vld [vmem:[#allocation2 + $0x628] ss:$108 sps:$4 sm:$0xff]  }
 0x153   :  { %1775 = vmatmul.mubr.bf16.vlgmr.msra.gmra.mrb[4].mxu1 %v9536_v36  ;;  %1898 = vmatmul.mubr.bf16.vlgmr.msra.gmra.mrb[4].mxu0 %v9536_v36 }
 0x154   :  { %1825 = vmatpush1.bf16.msra.mxu1 %v7843_v6  ;;  %1948 = vmatpush1.bf16.msra.mxu0 %v7864_v7  ;;  %v7923_v6 = vld [vmem:[#allocation2 + $0x3c] ss:$108 sps:$4 sm:$0xff]   ;;  %v7962_v7 = vld [vmem:[#allocation2 + $0x54] ss:$108 sps:$4 sm:$0xff]  }
 0x155   :  { %1826 = vmatprep.subr.bf16.mxu1 %v7848_v8  ;;  %1949 = vmatprep.subr.bf16.mxu0 %v7872_v9  ;;  %v7921_v8 = vld [vmem:[#allocation2 + $0x38] ss:$108 sps:$4 sm:$0xff]   ;;  %v7960_v9 = vld [vmem:[#allocation2 + $0x50] ss:$108 sps:$4 sm:$0xff]  }
 0x156   :  { %1856 = vmatprep.mubr.bf16.mxu1 %v9249_v0  ;;  %1979 = vmatprep.mubr.bf16.mxu0 %v9249_v0 }
 0x158   :  { %1827 = vmatpush1.bf16.msra.mxu1 %v7846_v10  ;;  %1950 = vmatpush1.bf16.msra.mxu0 %v7870_v11  ;;  %v7929_v10 = vld [vmem:[#allocation2 + $0x114] ss:$108 sps:$4 sm:$0xff]   ;;  %v7968_v11 = vld [vmem:[#allocation2 + $0x12c] ss:$108 sps:$4 sm:$0xff]  }
 0x159   :  { %1828 = vmatprep.subr.bf16.mxu1 %v7851_v12  ;;  %1951 = vmatprep.subr.bf16.mxu0 %v7878_v13  ;;  %v7927_v12 = vld [vmem:[#allocation2 + $0x110] ss:$108 sps:$4 sm:$0xff]   ;;  %v7966_v13 = vld [vmem:[#allocation2 + $0x128] ss:$108 sps:$4 sm:$0xff]  }
 0x15c   :  { %1829 = vmatpush1.bf16.msra.mxu1 %v7849_v14  ;;  %1952 = vmatpush1.bf16.msra.mxu0 %v7876_v15  ;;  %v7935_v14 = vld [vmem:[#allocation2 + $0x1ec] ss:$108 sps:$4 sm:$0xff]   ;;  %v7974_v15 = vld [vmem:[#allocation2 + $0x204] ss:$108 sps:$4 sm:$0xff]  }
 0x15d   :  { %1830 = vmatprep.subr.bf16.mxu1 %v7854_v16  ;;  %1953 = vmatprep.subr.bf16.mxu0 %v7884_v17  ;;  %v7933_v16 = vld [vmem:[#allocation2 + $0x1e8] ss:$108 sps:$4 sm:$0xff]   ;;  %v7972_v17 = vld [vmem:[#allocation2 + $0x200] ss:$108 sps:$4 sm:$0xff]  }
 0x160   :  { %1831 = vmatpush1.bf16.msra.mxu1 %v7852_v18  ;;  %1954 = vmatpush1.bf16.msra.mxu0 %v7882_v19  ;;  %v7941_v18 = vld [vmem:[#allocation2 + $0x2c4] ss:$108 sps:$4 sm:$0xff]   ;;  %v7980_v19 = vld [vmem:[#allocation2 + $0x2dc] ss:$108 sps:$4 sm:$0xff]  }
 0x161   :  { %1832 = vmatprep.subr.bf16.mxu1 %v7857_v20  ;;  %1955 = vmatprep.subr.bf16.mxu0 %v7890_v21  ;;  %v7939_v20 = vld [vmem:[#allocation2 + $0x2c0] ss:$108 sps:$4 sm:$0xff]   ;;  %v7978_v21 = vld [vmem:[#allocation2 + $0x2d8] ss:$108 sps:$4 sm:$0xff]  }
 0x164   :  { %1833 = vmatpush1.bf16.msra.mxu1 %v7855_v22  ;;  %1956 = vmatpush1.bf16.msra.mxu0 %v7888_v23  ;;  %v7947_v22 = vld [vmem:[#allocation2 + $0x39c] ss:$108 sps:$4 sm:$0xff]   ;;  %v7986_v23 = vld [vmem:[#allocation2 + $0x3b4] ss:$108 sps:$4 sm:$0xff]  }
 0x165   :  { %1834 = vmatprep.subr.bf16.mxu1 %v7860_v24  ;;  %1957 = vmatprep.subr.bf16.mxu0 %v7896_v25  ;;  %v7945_v24 = vld [vmem:[#allocation2 + $0x398] ss:$108 sps:$4 sm:$0xff]   ;;  %v7953_v25 = vld [vmem:[#allocation2 + $0x474] ss:$108 sps:$4 sm:$0xff]  }
 0x168   :  { %1835 = vmatpush1.bf16.msra.mxu1 %v7858_v26  ;;  %1958 = vmatpush1.bf16.msra.mxu0 %v7894_v27  ;;  %v7984_v26 = vld [vmem:[#allocation2 + $0x3b0] ss:$108 sps:$4 sm:$0xff]   ;;  %v7992_v27 = vld [vmem:[#allocation2 + $0x48c] ss:$108 sps:$4 sm:$0xff]  }
 0x169   :  { %1836 = vmatprep.subr.bf16.mxu1 %v7863_v28  ;;  %1959 = vmatprep.subr.bf16.mxu0 %v7902_v29  ;;  %v7951_v28 = vld [vmem:[#allocation2 + $0x470] ss:$108 sps:$4 sm:$0xff]   ;;  %v7959_v29 = vld [vmem:[#allocation2 + $0x54c] ss:$108 sps:$4 sm:$0xff]  }
 0x16c   :  { %1837 = vmatpush1.bf16.msra.mxu1 %v7861_v30  ;;  %1960 = vmatpush1.bf16.msra.mxu0 %v7900_v31  ;;  %v7990_v30 = vld [vmem:[#allocation2 + $0x488] ss:$108 sps:$4 sm:$0xff]   ;;  %v7998_v31 = vld [vmem:[#allocation2 + $0x564] ss:$108 sps:$4 sm:$0xff]  }
 0x16d   :  { %1838 = vmatprep.subr.bf16.mxu1 %v7869_v32  ;;  %1961 = vmatprep.subr.bf16.mxu0 %v7908_v33  ;;  %v7957_v32 = vld [vmem:[#allocation2 + $0x548] ss:$108 sps:$4 sm:$0xff]   ;;  %v7996_v33 = vld [vmem:[#allocation2 + $0x560] ss:$108 sps:$4 sm:$0xff]  }
 0x170   :  { %1839 = vmatpush1.bf16.msra.mxu1 %v7867_v34  ;;  %1962 = vmatpush1.bf16.msra.mxu0 %v7906_v35  ;;  %v7965_v34 = vld [vmem:[#allocation2 + $0x624] ss:$108 sps:$4 sm:$0xff]   ;;  %v8004_v35 = vld [vmem:[#allocation2 + $0x63c] ss:$108 sps:$4 sm:$0xff]  }
 0x171   :  { %1906 = vmatprep.subr.bf16.mxu1 %v7875_v37  ;;  %2029 = vmatprep.subr.bf16.mxu0 %v7914_v38  ;;  %v7963_v37 = vld [vmem:[#allocation2 + $0x620] ss:$108 sps:$4 sm:$0xff]  }
 0x172   :  { %v7971_v38 = vld [vmem:[#allocation2 + $0x4c] ss:$108 sps:$4 sm:$0xff]  }
 0x173   :  { %1857 = vmatmul.mubr.bf16.vlgmr.msra.gmra.mrb[8].mxu1 %v9536_v36  ;;  %1980 = vmatmul.mubr.bf16.vlgmr.msra.gmra.mrb[8].mxu0 %v9536_v36 }
 0x174   :  { %1907 = vmatpush1.bf16.msra.mxu1 %v7873_v39  ;;  %2030 = vmatpush1.bf16.msra.mxu0 %v7912_v40  ;;  %v8002_v39 = vld [vmem:[#allocation2 + $0x638] ss:$108 sps:$4 sm:$0xff]  }
 0x175   :  { %1908 = vmatprep.subr.bf16.mxu1 %v7881_v41  ;;  %2031 = vmatprep.subr.bf16.mxu0 %v7920_v42  ;;  %v8010_v40 = vld [vmem:[#allocation2 + $0x64] ss:$108 sps:$4 sm:$0xff]   ;;  %v7969_v41 = vld [vmem:[#allocation2 + $0x48] ss:$108 sps:$4 sm:$0xff]   ;;  %v8008_v42 = vld [vmem:[#allocation2 + $0x60] ss:$108 sps:$4 sm:$0xff]  }
 0x176   :  { %1938 = vmatprep.mubr.bf16.mxu1 %v9249_v0  ;;  %2061 = vmatprep.mubr.bf16.mxu0 %v9249_v0 }
 0x178   :  { %1909 = vmatpush1.bf16.msra.mxu1 %v7879_v43  ;;  %2032 = vmatpush1.bf16.msra.mxu0 %v7918_v44  ;;  %v7977_v43 = vld [vmem:[#allocation2 + $0x124] ss:$108 sps:$4 sm:$0xff]   ;;  %v8016_v44 = vld [vmem:[#allocation2 + $0x13c] ss:$108 sps:$4 sm:$0xff]  }
 0x179   :  { %1910 = vmatprep.subr.bf16.mxu1 %v7887_v45  ;;  %2033 = vmatprep.subr.bf16.mxu0 %v7926_v46  ;;  %v7975_v45 = vld [vmem:[#allocation2 + $0x120] ss:$108 sps:$4 sm:$0xff]   ;;  %v8014_v46 = vld [vmem:[#allocation2 + $0x138] ss:$108 sps:$4 sm:$0xff]  }
 0x17c   :  { %1911 = vmatpush1.bf16.msra.mxu1 %v7885_v47  ;;  %2034 = vmatpush1.bf16.msra.mxu0 %v7924_v48  ;;  %v7983_v47 = vld [vmem:[#allocation2 + $0x1fc] ss:$108 sps:$4 sm:$0xff]   ;;  %v8022_v48 = vld [vmem:[#allocation2 + $0x214] ss:$108 sps:$4 sm:$0xff]  }
 0x17d   :  { %1912 = vmatprep.subr.bf16.mxu1 %v7893_v49  ;;  %2035 = vmatprep.subr.bf16.mxu0 %v7932_v50  ;;  %v7981_v49 = vld [vmem:[#allocation2 + $0x1f8] ss:$108 sps:$4 sm:$0xff]   ;;  %v8020_v50 = vld [vmem:[#allocation2 + $0x210] ss:$108 sps:$4 sm:$0xff]  }
 0x180   :  { %1913 = vmatpush1.bf16.msra.mxu1 %v7891_v51  ;;  %2036 = vmatpush1.bf16.msra.mxu0 %v7930_v52  ;;  %v7989_v51 = vld [vmem:[#allocation2 + $0x2d4] ss:$108 sps:$4 sm:$0xff]   ;;  %v8028_v52 = vld [vmem:[#allocation2 + $0x2ec] ss:$108 sps:$4 sm:$0xff]  }
 0x181   :  { %1914 = vmatprep.subr.bf16.mxu1 %v7899_v53  ;;  %2037 = vmatprep.subr.bf16.mxu0 %v7938_v54  ;;  %v7987_v53 = vld [vmem:[#allocation2 + $0x2d0] ss:$108 sps:$4 sm:$0xff]   ;;  %v7995_v54 = vld [vmem:[#allocation2 + $0x3ac] ss:$108 sps:$4 sm:$0xff]  }
 0x184   :  { %1915 = vmatpush1.bf16.msra.mxu1 %v7897_v55  ;;  %2038 = vmatpush1.bf16.msra.mxu0 %v7936_v56  ;;  %v8026_v55 = vld [vmem:[#allocation2 + $0x2e8] ss:$108 sps:$4 sm:$0xff]   ;;  %v8034_v56 = vld [vmem:[#allocation2 + $0x3c4] ss:$108 sps:$4 sm:$0xff]  }
 0x185   :  { %1916 = vmatprep.subr.bf16.mxu1 %v7905_v57  ;;  %2039 = vmatprep.subr.bf16.mxu0 %v7944_v58  ;;  %v7993_v57 = vld [vmem:[#allocation2 + $0x3a8] ss:$108 sps:$4 sm:$0xff]   ;;  %v8001_v58 = vld [vmem:[#allocation2 + $0x484] ss:$108 sps:$4 sm:$0xff]  }
 0x188   :  { %1917 = vmatpush1.bf16.msra.mxu1 %v7903_v59  ;;  %2040 = vmatpush1.bf16.msra.mxu0 %v7942_v60  ;;  %v8032_v59 = vld [vmem:[#allocation2 + $0x3c0] ss:$108 sps:$4 sm:$0xff]   ;;  %v8040_v60 = vld [vmem:[#allocation2 + $0x49c] ss:$108 sps:$4 sm:$0xff]  }
 0x189   :  { %1918 = vmatprep.subr.bf16.mxu1 %v7911_v61  ;;  %2041 = vmatprep.subr.bf16.mxu0 %v7950_v62  ;;  %v7999_v61 = vld [vmem:[#allocation2 + $0x480] ss:$108 sps:$4 sm:$0xff]   ;;  %v8007_v62 = vld [vmem:[#allocation2 + $0x55c] ss:$108 sps:$4 sm:$0xff]  }
 0x18c   :  { %1919 = vmatpush1.bf16.msra.mxu1 %v7909_v63  ;;  %2042 = vmatpush1.bf16.msra.mxu0 %v7948_v1  ;;  %v8038_v63 = vld [vmem:[#allocation2 + $0x498] ss:$108 sps:$4 sm:$0xff]   ;;  %v8046_v1 = vld [vmem:[#allocation2 + $0x574] ss:$108 sps:$4 sm:$0xff]  }
 0x18d   :  { %1920 = vmatprep.subr.bf16.mxu1 %v7917_v2  ;;  %2043 = vmatprep.subr.bf16.mxu0 %v7956_v3  ;;  %v8005_v2 = vld [vmem:[#allocation2 + $0x558] ss:$108 sps:$4 sm:$0xff]   ;;  %v8013_v3 = vld [vmem:[#allocation2 + $0x634] ss:$108 sps:$4 sm:$0xff]  }
 0x190   :  { %1921 = vmatpush1.bf16.msra.mxu1 %v7915_v4  ;;  %2044 = vmatpush1.bf16.msra.mxu0 %v7954_v5  ;;  %v8044_v4 = vld [vmem:[#allocation2 + $0x570] ss:$108 sps:$4 sm:$0xff]   ;;  %v8052_v5 = vld [vmem:[#allocation2 + $0x64c] ss:$108 sps:$4 sm:$0xff]  }
 0x191   :  { %1988 = vmatprep.subr.bf16.mxu1 %v7923_v6  ;;  %2111 = vmatprep.subr.bf16.mxu0 %v7962_v7  ;;  %v8011_v6 = vld [vmem:[#allocation2 + $0x630] ss:$108 sps:$4 sm:$0xff]  }
 0x192   :  { %v8019_v7 = vld [vmem:[#allocation2 + $0x5c] ss:$108 sps:$4 sm:$0xff]  }
 0x193   :  { %1939 = vmatmul.mubr.bf16.vlgmr.msra.gmra.mrb[12].mxu1 %v9536_v36  ;;  %2062 = vmatmul.mubr.bf16.vlgmr.msra.gmra.mrb[12].mxu0 %v9536_v36 }
 0x194   :  { %1989 = vmatpush1.bf16.msra.mxu1 %v7921_v8  ;;  %2112 = vmatpush1.bf16.msra.mxu0 %v7960_v9  ;;  %v8050_v8 = vld [vmem:[#allocation2 + $0x648] ss:$108 sps:$4 sm:$0xff]  }
 0x195   :  { %1990 = vmatprep.subr.bf16.mxu1 %v7929_v10  ;;  %2113 = vmatprep.subr.bf16.mxu0 %v7968_v11  ;;  %v8058_v9 = vld [vmem:[#allocation6 + $0x404] ss:$8 sps:$4 sm:$0xff]   ;;  %v8017_v10 = vld [vmem:[#allocation2 + $0x58] ss:$108 sps:$4 sm:$0xff]  }
 0x196   :  { %2020 = vmatprep.mubr.bf16.mxu1 %v9249_v0  ;;  %2143 = vmatprep.mubr.bf16.mxu0 %v9249_v0  ;;  %v8025_v11 = vld [vmem:[#allocation2 + $0x134] ss:$108 sps:$4 sm:$0xff]  }
 0x198   :  { %1991 = vmatpush1.bf16.msra.mxu1 %v7927_v12  ;;  %2114 = vmatpush1.bf16.msra.mxu0 %v7966_v13  ;;  %v8056_v12 = vld [vmem:[#allocation6 + $0x400] ss:$8 sps:$4 sm:$0xff]   ;;  %v8064_v13 = vld [vmem:[#allocation6 + $0x414] ss:$8 sps:$4 sm:$0xff]  }
 0x199   :  { %1992 = vmatprep.subr.bf16.mxu1 %v7935_v14  ;;  %2115 = vmatprep.subr.bf16.mxu0 %v7974_v15  ;;  %v8023_v14 = vld [vmem:[#allocation2 + $0x130] ss:$108 sps:$4 sm:$0xff]   ;;  %v8031_v15 = vld [vmem:[#allocation2 + $0x20c] ss:$108 sps:$4 sm:$0xff]  }
 0x19c   :  { %1993 = vmatpush1.bf16.msra.mxu1 %v7933_v16  ;;  %2116 = vmatpush1.bf16.msra.mxu0 %v7972_v17  ;;  %v8062_v16 = vld [vmem:[#allocation6 + $0x410] ss:$8 sps:$4 sm:$0xff]   ;;  %v8068_v17 = vld [vmem:[#allocation6 + $0x424] ss:$8 sps:$4 sm:$0xff]  }
 0x19d   :  { %1994 = vmatprep.subr.bf16.mxu1 %v7941_v18  ;;  %2117 = vmatprep.subr.bf16.mxu0 %v7980_v19  ;;  %v8029_v18 = vld [vmem:[#allocation2 + $0x208] ss:$108 sps:$4 sm:$0xff]   ;;  %v8037_v19 = vld [vmem:[#allocation2 + $0x2e4] ss:$108 sps:$4 sm:$0xff]  }
 0x1a0   :  { %1995 = vmatpush1.bf16.msra.mxu1 %v7939_v20  ;;  %2118 = vmatpush1.bf16.msra.mxu0 %v7978_v21  ;;  %v8066_v20 = vld [vmem:[#allocation6 + $0x420] ss:$8 sps:$4 sm:$0xff]   ;;  %v8072_v21 = vld [vmem:[#allocation6 + $0x434] ss:$8 sps:$4 sm:$0xff]  }
 0x1a1   :  { %1996 = vmatprep.subr.bf16.mxu1 %v7947_v22  ;;  %2119 = vmatprep.subr.bf16.mxu0 %v7986_v23  ;;  %v8035_v22 = vld [vmem:[#allocation2 + $0x2e0] ss:$108 sps:$4 sm:$0xff]   ;;  %v8043_v23 = vld [vmem:[#allocation2 + $0x3bc] ss:$108 sps:$4 sm:$0xff]  }
 0x1a4   :  { %1997 = vmatpush1.bf16.msra.mxu1 %v7945_v24  ;;  %2120 = vmatpush1.bf16.msra.mxu0 %v7984_v26  ;;  %v8070_v24 = vld [vmem:[#allocation6 + $0x430] ss:$8 sps:$4 sm:$0xff]   ;;  %v8041_v26 = vld [vmem:[#allocation2 + $0x3b8] ss:$108 sps:$4 sm:$0xff]  }
 0x1a5   :  { %1998 = vmatprep.subr.bf16.mxu1 %v7953_v25  ;;  %2121 = vmatprep.subr.bf16.mxu0 %v7992_v27  ;;  %v8076_v25 = vld [vmem:[#allocation6 + $0x444] ss:$8 sps:$4 sm:$0xff]  }
 0x1a6   :  { %v8049_v27 = vld [vmem:[#allocation2 + $0x494] ss:$108 sps:$4 sm:$0xff]  }
 0x1a8   :  { %1999 = vmatpush1.bf16.msra.mxu1 %v7951_v28  ;;  %2122 = vmatpush1.bf16.msra.mxu0 %v7990_v30  ;;  %v8074_v28 = vld [vmem:[#allocation6 + $0x440] ss:$8 sps:$4 sm:$0xff]  }
 0x1a9   :  { %2000 = vmatprep.subr.bf16.mxu1 %v7959_v29  ;;  %2123 = vmatprep.subr.bf16.mxu0 %v7998_v31  ;;  %v8080_v29 = vld [vmem:[#allocation6 + $0x454] ss:$8 sps:$4 sm:$0xff]  }
 0x1aa   :  { %v8047_v30 = vld [vmem:[#allocation2 + $0x490] ss:$108 sps:$4 sm:$0xff]   ;;  %v8055_v31 = vld [vmem:[#allocation2 + $0x56c] ss:$108 sps:$4 sm:$0xff]  }
 0x1ac   :  { %2001 = vmatpush1.bf16.msra.mxu1 %v7957_v32  ;;  %2124 = vmatpush1.bf16.msra.mxu0 %v7996_v33  ;;  %v8078_v32 = vld [vmem:[#allocation6 + $0x450] ss:$8 sps:$4 sm:$0xff]   ;;  %v8084_v33 = vld [vmem:[#allocation6 + $0x464] ss:$8 sps:$4 sm:$0xff]  }
 0x1ad   :  { %2002 = vmatprep.subr.bf16.mxu1 %v7965_v34  ;;  %2125 = vmatprep.subr.bf16.mxu0 %v8004_v35  ;;  %v8053_v34 = vld [vmem:[#allocation2 + $0x568] ss:$108 sps:$4 sm:$0xff]   ;;  %v8061_v35 = vld [vmem:[#allocation2 + $0x644] ss:$108 sps:$4 sm:$0xff]  }
 0x1b0   :  { %2003 = vmatpush1.bf16.msra.mxu1 %v7963_v37  ;;  %2126 = vmatpush1.bf16.msra.mxu0 %v8002_v39  ;;  %v8082_v37 = vld [vmem:[#allocation6 + $0x460] ss:$8 sps:$4 sm:$0xff]   ;;  %v8059_v39 = vld [vmem:[#allocation2 + $0x640] ss:$108 sps:$4 sm:$0xff]  }
 0x1b1   :  { %2070 = vmatprep.subr.bf16.mxu1 %v7971_v38  ;;  %2193 = vmatprep.subr.bf16.mxu0 %v8010_v40  ;;  %v8088_v38 = vld [vmem:[#allocation6 + $0x474] ss:$8 sps:$4 sm:$0xff]   ;;  %v8086_v40 = vld [vmem:[#allocation6 + $0x470] ss:$8 sps:$4 sm:$0xff]  }
 0x1b3   :  { %2021 = vmatmul.mubr.bf16.vlgmr.msra.gmra.mrb[16].mxu1 %v9536_v36  ;;  %2144 = vmatmul.mubr.bf16.vlgmr.msra.gmra.mrb[16].mxu0 %v9536_v36 }
 0x1b4   :  { %2071 = vmatpush1.bf16.msra.mxu1 %v7969_v41  ;;  %2194 = vmatpush1.bf16.msra.mxu0 %v8008_v42  ;;  %v8092_v41 = vld [vmem:[#allocation6 + $0x484] ss:$8 sps:$4 sm:$0xff]  }
 0x1b5   :  { %2072 = vmatprep.subr.bf16.mxu1 %v7977_v43  ;;  %2195 = vmatprep.subr.bf16.mxu0 %v8016_v44  ;;  %v8065_v42 = vld [vmem:[#allocation2 + $0x68] ss:$108 sps:$4 sm:$0xff]   ;;  %v8090_v43 = vld [vmem:[#allocation6 + $0x480] ss:$8 sps:$4 sm:$0xff]   ;;  %v9250_v44 = vmov 0.0  }
 0x1b6   :  { %2102 = vmatprep.mubr.bf16.mxu1 %v9249_v0  ;;  %2225 = vmatprep.mubr.bf16.mxu0 %v9249_v0 }
 0x1b8   :  { %2073 = vmatpush1.bf16.msra.mxu1 %v7975_v45  ;;  %2196 = vmatpush1.bf16.msra.mxu0 %v8014_v46  ;;  %v8096_v45 = vld [vmem:[#allocation6 + $0x494] ss:$8 sps:$4 sm:$0xff]   ;;  %v8069_v46 = vld [vmem:[#allocation2 + $0x140] ss:$108 sps:$4 sm:$0xff]  }
 0x1b9   :  { %2074 = vmatprep.subr.bf16.mxu1 %v7983_v47  ;;  %2197 = vmatprep.subr.bf16.mxu0 %v8022_v48  ;;  %v8094_v47 = vld [vmem:[#allocation6 + $0x490] ss:$8 sps:$4 sm:$0xff]   ;;  %v8102_v48 = vld [vmem:[#allocation6 + $0x4a4] ss:$8 sps:$4 sm:$0xff]  }
 0x1bc   :  { %2075 = vmatpush1.bf16.msra.mxu1 %v7981_v49  ;;  %2198 = vmatpush1.bf16.msra.mxu0 %v8020_v50  ;;  %v478_v49 = vlaneseq  ;;  %v8073_v50 = vld [vmem:[#allocation2 + $0x218] ss:$108 sps:$4 sm:$0xff]  }
 0x1bd   :  { %2076 = vmatprep.subr.bf16.mxu1 %v7989_v51  ;;  %2199 = vmatprep.subr.bf16.mxu0 %v8028_v52  ;;  %v8100_v51 = vld [vmem:[#allocation6 + $0x4a0] ss:$8 sps:$4 sm:$0xff]   ;;  %v8108_v52 = vld [vmem:[#allocation6 + $0x4b4] ss:$8 sps:$4 sm:$0xff]  }
 0x1c0   :  { %2077 = vmatpush1.bf16.msra.mxu1 %v7987_v53  ;;  %2200 = vmatpush1.bf16.msra.mxu0 %v8026_v55  ;;  %v9567_v53 = vshrl.u32 %v478_v49, 7  ;;  %v8106_v55 = vld [vmem:[#allocation6 + $0x4b0] ss:$8 sps:$4 sm:$0xff]  }
 0x1c1   :  { %2078 = vmatprep.subr.bf16.mxu1 %v7995_v54  ;;  %2201 = vmatprep.subr.bf16.mxu0 %v8034_v56  ;;  %v8077_v54 = vld [vmem:[#allocation2 + $0x2f0] ss:$108 sps:$4 sm:$0xff]   ;;  %v8114_v56 = vld [vmem:[#allocation6 + $0x4c4] ss:$8 sps:$4 sm:$0xff]  }
 0x1c4   :  { %2079 = vmatpush1.bf16.msra.mxu1 %v7993_v57  ;;  %2202 = vmatpush1.bf16.msra.mxu0 %v8032_v59  ;;  %v8081_v57 = vld [vmem:[#allocation2 + $0x3c8] ss:$108 sps:$4 sm:$0xff]   ;;  %v9573_v59 = vld [vmem:[#allocation4] sm:$0xff] }
 0x1c5   :  { %2080 = vmatprep.subr.bf16.mxu1 %v8001_v58  ;;  %2203 = vmatprep.subr.bf16.mxu0 %v8040_v60  ;;  %v9571_v58 = vsub.s32 4, %v9567_v53  ;;  %v9576_v60 = vsub.s32 5, %v9567_v53 }
 0x1c8   :  { %2081 = vmatpush1.bf16.msra.mxu1 %v7999_v61  ;;  %2204 = vmatpush1.bf16.msra.mxu0 %v8038_v63  ;;  %v8112_v61 = vld [vmem:[#allocation6 + $0x4c0] ss:$8 sps:$4 sm:$0xff]   ;;  %v9580_v63 = vsub.s32 1, %v9567_v53 }
 0x1c9   :  { %2082 = vmatprep.subr.bf16.mxu1 %v8007_v62  ;;  %2205 = vmatprep.subr.bf16.mxu0 %v8046_v1  ;;  %v8120_v62 = vld [vmem:[#allocation6 + $0x4d4] ss:$8 sps:$4 sm:$0xff]   ;;  %v497_v1 = vrot.slane %v9573_v59, %v9571_v58 }
 0x1cc   :  { %2083 = vmatpush1.bf16.msra.mxu1 %v8005_v2  ;;  %2206 = vmatpush1.bf16.msra.mxu0 %v8044_v4  ;;  %v501_v2 = vrot.slane %v9573_v59, %v9576_v60  ;;  %v8118_v4 = vld [vmem:[#allocation6 + $0x4d0] ss:$8 sps:$4 sm:$0xff]  }
 0x1cd   :  { %2084 = vmatprep.subr.bf16.mxu1 %v8013_v3  ;;  %2207 = vmatprep.subr.bf16.mxu0 %v8052_v5  ;;  %v8085_v3 = vld [vmem:[#allocation2 + $0x4a0] ss:$108 sps:$4 sm:$0xff]  }
 0x1ce   :  { %v8126_v5 = vld [vmem:[#allocation6 + $0x4e4] ss:$8 sps:$4 sm:$0xff]  }
 0x1d0   :  { %2085 = vmatpush1.bf16.msra.mxu1 %v8011_v6  ;;  %2208 = vmatpush1.bf16.msra.mxu0 %v8050_v8  ;;  %v485_v8 = vrot.slane %v9573_v59, %v9580_v63 }
 0x1d1   :  { %2152 = vmatprep.subr.bf16.mxu1 %v8019_v7  ;;  %5096 = vmatprep.subr.bf16.mxu0 %v8058_v9 }
 0x1d3   :  { %2103 = vmatmul.mubr.bf16.vlgmr.msra.gmra.mrb[20].mxu1 %v9536_v36  ;;  %2226 = vmatmul.mubr.bf16.vlgmr.msra.gmra.mrb[20].mxu0 %v9536_v36 }
 0x1d4   :  { %2153 = vmatpush1.bf16.msra.mxu1 %v8017_v10  ;;  %5097 = vmatpush1.bf16.msra.mxu0 %v8056_v12 }
 0x1d5   :  { %2154 = vmatprep.subr.bf16.mxu1 %v8025_v11  ;;  %5098 = vmatprep.subr.bf16.mxu0 %v8064_v13 }
 0x1d6   :  { %2184 = vmatprep.mubr.bf16.mxu1 %v9249_v0 }
 0x1d8   :  { %2155 = vmatpush1.bf16.msra.mxu1 %v8023_v14  ;;  %5099 = vmatpush1.bf16.msra.mxu0 %v8062_v16  ;;  %v8124_v16 = vld [vmem:[#allocation6 + $0x4e0] ss:$8 sps:$4 sm:$0xff]  }
 0x1d9   :  { %2156 = vmatprep.subr.bf16.mxu1 %v8031_v15  ;;  %5100 = vmatprep.subr.bf16.mxu0 %v8068_v17  ;;  %v8089_v15 = vld [vmem:[#allocation2 + $0x578] ss:$108 sps:$4 sm:$0xff]  }
 0x1dc   :  { %2157 = vmatpush1.bf16.msra.mxu1 %v8029_v18  ;;  %5101 = vmatpush1.bf16.msra.mxu0 %v8066_v20 }
 0x1dd   :  { %2158 = vmatprep.subr.bf16.mxu1 %v8037_v19  ;;  %5102 = vmatprep.subr.bf16.mxu0 %v8072_v21  ;;  %v8132_v19 = vld [vmem:[#allocation6 + $0x4f4] ss:$8 sps:$4 sm:$0xff]  }
 0x1de   :  { %v8093_v21 = vld [vmem:[#allocation2 + $0x650] ss:$108 sps:$4 sm:$0xff]  }
 0x1e0   :  { %2159 = vmatpush1.bf16.msra.mxu1 %v8035_v22  ;;  %5103 = vmatpush1.bf16.msra.mxu0 %v8070_v24  ;;  %v8130_v22 = vld [vmem:[#allocation6 + $0x4f0] ss:$8 sps:$4 sm:$0xff]   ;;  %v8138_v24 = vld [vmem:[#allocation6 + $0x504] ss:$8 sps:$4 sm:$0xff]  }
 0x1e1   :  { %2160 = vmatprep.subr.bf16.mxu1 %v8043_v23  ;;  %5104 = vmatprep.subr.bf16.mxu0 %v8076_v25  ;;  %v8099_v23 = vld [vmem:[#allocation6 + $0x4] ss:$8 sps:$4 sm:$0xff]  }
 0x1e4   :  { %2161 = vmatpush1.bf16.msra.mxu1 %v8041_v26  ;;  %5105 = vmatpush1.bf16.msra.mxu0 %v8074_v28  ;;  %v8097_v26 = vld [vmem:[#allocation6] ss:$8 sps:$4 sm:$0xff]  }
 0x1e5   :  { %2162 = vmatprep.subr.bf16.mxu1 %v8049_v27  ;;  %5106 = vmatprep.subr.bf16.mxu0 %v8080_v29  ;;  %v8105_v27 = vld [vmem:[#allocation6 + $0x14] ss:$8 sps:$4 sm:$0xff]   ;;  %v8103_v29 = vld [vmem:[#allocation6 + $0x10] ss:$8 sps:$4 sm:$0xff]  }
 0x1e8   :  { %2163 = vmatpush1.bf16.msra.mxu1 %v8047_v30  ;;  %5107 = vmatpush1.bf16.msra.mxu0 %v8078_v32  ;;  %v8111_v30 = vld [vmem:[#allocation6 + $0x24] ss:$8 sps:$4 sm:$0xff]   ;;  %v8117_v32 = vld [vmem:[#allocation6 + $0x34] ss:$8 sps:$4 sm:$0xff]  }
 0x1e9   :  { %2164 = vmatprep.subr.bf16.mxu1 %v8055_v31  ;;  %5108 = vmatprep.subr.bf16.mxu0 %v8084_v33  ;;  %v8109_v31 = vld [vmem:[#allocation6 + $0x20] ss:$8 sps:$4 sm:$0xff]   ;;  %v8115_v33 = vld [vmem:[#allocation6 + $0x30] ss:$8 sps:$4 sm:$0xff]  }
 0x1ec   :  { %2165 = vmatpush1.bf16.msra.mxu1 %v8053_v34  ;;  %5109 = vmatpush1.bf16.msra.mxu0 %v8082_v37  ;;  %v8123_v34 = vld [vmem:[#allocation6 + $0x44] ss:$8 sps:$4 sm:$0xff]   ;;  %v8121_v37 = vld [vmem:[#allocation6 + $0x40] ss:$8 sps:$4 sm:$0xff]  }
 0x1ed   :  { %2166 = vmatprep.subr.bf16.mxu1 %v8061_v35  ;;  %5110 = vmatprep.subr.bf16.mxu0 %v8088_v38  ;;  %v9599_v35 = vsub.s32 2, %v9567_v53  ;;  %v9601_v38 = vld [vmem:[#allocation4 + $0x8] sm:$0xff] }
 0x1f0   :  { %2167 = vmatpush1.bf16.msra.mxu1 %v8059_v39  ;;  %5111 = vmatpush1.bf16.msra.mxu0 %v8086_v40  ;;  %v9604_v39 = vsub.s32 3, %v9567_v53  ;;  %v9607_v40 = vsub.s32 0, %v9567_v53 }
 0x1f1   :  { %7611 = vmatprep.subr.bf16.mxu1 %v9250_v44  ;;  %5112 = vmatprep.subr.bf16.mxu0 %v8092_v41  ;;  %v8129_v41 = vld [vmem:[#allocation6 + $0x54] ss:$8 sps:$4 sm:$0xff]  }
 0x1f3   :  { %2185 = vmatmul.mubr.bf16.vlgmr.msra.gmra.mrb[24].mxu1 %v9536_v36 }
 0x1f4   :  { %7612 = vmatpush3.bf16.msra.mxu1 %v8065_v42  ;;  %5113 = vmatpush1.bf16.msra.mxu0 %v8090_v43  ;;  %v489_v42 = vrot.slane %v9573_v59, %v9599_v35  ;;  %v513_v43 = vrot.slane %v9601_v38, %v9607_v40 }
 0x1f5   :  { %7613 = vmatprep.subr.bf16.mxu1 %v9250_v44  ;;  %7627 = vmatprep.mubr.msk.bf16.mxu1 %vm9251_vm0, %v9250_v44 }
 0x1f6   :  { %5114 = vmatprep.subr.bf16.mxu0 %v8096_v45  ;;  %v493_v45 = vrot.slane %v9573_v59, %v9604_v39 }
 0x1f8   :  { %7614 = vmatpush3.bf16.msra.mxu1 %v8069_v46  ;;  %5115 = vmatpush1.bf16.msra.mxu0 %v8094_v47  ;;  %v517_v46 = vrot.slane %v9601_v38, %v9580_v63  ;;  %v8127_v47 = vld [vmem:[#allocation6 + $0x50] ss:$8 sps:$4 sm:$0xff]  }
 0x1f9   :  { %7615 = vmatprep.subr.bf16.mxu1 %v9250_v44  ;;  %5116 = vmatprep.subr.bf16.mxu0 %v8102_v48  ;;  %v8135_v48 = vld [vmem:[#allocation6 + $0x64] ss:$8 sps:$4 sm:$0xff]  }
 0x1fc   :  { %7616 = vmatpush3.bf16.msra.mxu1 %v8073_v50  ;;  %5117 = vmatpush1.bf16.msra.mxu0 %v8100_v51 }
 0x1fd   :  { %7617 = vmatprep.subr.bf16.mxu1 %v9250_v44  ;;  %5118 = vmatprep.subr.bf16.mxu0 %v8108_v52 }
 0x200   :  { %7618 = vmatpush3.bf16.msra.mxu1 %v8077_v54  ;;  %5119 = vmatpush1.bf16.msra.mxu0 %v8106_v55 }
 0x201   :  { %7619 = vmatprep.subr.bf16.mxu1 %v9250_v44  ;;  %5120 = vmatprep.subr.bf16.mxu0 %v8114_v56 }
 0x204   :  { %7620 = vmatpush3.bf16.msra.mxu1 %v8081_v57  ;;  %5121 = vmatpush1.bf16.msra.mxu0 %v8112_v61 }
 0x205   :  { %7621 = vmatprep.subr.bf16.mxu1 %v9250_v44  ;;  %5122 = vmatprep.subr.bf16.mxu0 %v8120_v62 }
 0x206   :  { %v9587_v6 = vpop.f32.mrb[0].mxu1  ;;  %v1817_v7 = vpop.f32.mrb[0].mxu0 }
 0x207   :  { %v9591_v9 = vadd.f32 %v1817_v7, %v497_v1  ;;  %v1737_v10 = vpop.f32.mrb[1].mxu1  ;;  %v1819_v11 = vpop.f32.mrb[1].mxu0  ;;  %v8133_v1 = vld [vmem:[#allocation6 + $0x60] ss:$8 sps:$4 sm:$0xff]  }
 0x208   :  { %v9593_v12 = vadd.f32 %v1819_v11, %v501_v2  ;;  %v1739_v13 = vpop.f32.mrb[2].mxu1  ;;  %v1821_v14 = vpop.f32.mrb[2].mxu0  ;;  %7622 = vmatpush3.bf16.msra.mxu1 %v8085_v3  ;;  %5123 = vmatpush1.bf16.msra.mxu0 %v8118_v4  ;;  %v1738_v20 = vadd.f32 %v1737_v10, %v485_v8  ;;  %v8136_v8 = vld [vmem:[#allocation6 + $0x500] ss:$8 sps:$4 sm:$0xff]   ;;  %v8139_v10 = vld [vmem:[#allocation6 + $0x70] ss:$8 sps:$4 sm:$0xff]  }
 0x209   :  { %v1740_v17 = vpop.f32.mrb[3].mxu1  ;;  %v1822_v18 = vpop.f32.mrb[3].mxu0  ;;  %7623 = vmatprep.subr.bf16.mxu1 %v9250_v44  ;;  %5124 = vmatprep.subr.bf16.mxu0 %v8126_v5  ;;  %v8141_v5 = vld [vmem:[#allocation6 + $0x74] ss:$8 sps:$4 sm:$0xff]  }
 0x20a   :  { %v2275_v25 = vmax.f32 %v1738_v20, 0.0  ;;  %v8144_v11 = vld [vmem:[#allocation6 + $0x514] ss:$8 sps:$4 sm:$0xff]   ;;  %v8145_v17 = vld [vmem:[#allocation6 + $0x80] ss:$8 sps:$4 sm:$0xff]  }
 0x20b   :  { %v8150_v18 = vld [vmem:[#allocation6 + $0x524] ss:$8 sps:$4 sm:$0xff]   ;;  %v8148_v20 = vld [vmem:[#allocation6 + $0x520] ss:$8 sps:$4 sm:$0xff]  }
 0x20c   :  { %7624 = vmatpush3.bf16.msra.mxu1 %v8089_v15  ;;  %5125 = vmatpush1.bf16.msra.mxu0 %v8124_v16  ;;  %v2302_v28 = vpack.c.bf16 %v2275_v25, %v2275_v25  ;;  %v8147_v15 = vld [vmem:[#allocation6 + $0x84] ss:$8 sps:$4 sm:$0xff]   ;;  %v8142_v16 = vld [vmem:[#allocation6 + $0x510] ss:$8 sps:$4 sm:$0xff]   ;;  %v8157_v25 = vld [vmem:[#allocation6 + $0xa0] ss:$8 sps:$4 sm:$0xff]  }
 0x20d   :  { %7625 = vmatprep.subr.bf16.mxu1 %v9250_v44  ;;  %5126 = vmatprep.subr.bf16.mxu0 %v8132_v19  ;;  %v8153_v19 = vld [vmem:[#allocation6 + $0x94] ss:$8 sps:$4 sm:$0xff]  }
 0x210   :  { %7626 = vmatpush3.bf16.msra.mxu1 %v8093_v21  ;;  %5127 = vmatpush1.bf16.msra.mxu0 %v8130_v22  ;;  %v8151_v21 = vld [vmem:[#allocation6 + $0x90] ss:$8 sps:$4 sm:$0xff]   ;;  %v8156_v22 = vld [vmem:[#allocation6 + $0x534] ss:$8 sps:$4 sm:$0xff]  }
 0x211   :  { %4932 = vmatprep.subr.bf16.mxu1 %v8099_v23  ;;  %5137 = vmatprep.subr.bf16.mxu0 %v8138_v24  ;;  %v8159_v23 = vld [vmem:[#allocation6 + $0xa4] ss:$8 sps:$4 sm:$0xff]   ;;  %v8154_v24 = vld [vmem:[#allocation6 + $0x530] ss:$8 sps:$4 sm:$0xff]  }
 0x213   :  { %7628 = vmatmul.mubr.bf16.vlgmr.msra.gmra.mrb[28].mxu1 %v9536_v36 }
 0x214   :  { %4933 = vmatpush1.bf16.msra.mxu1 %v8097_v26  ;;  %4964 = vmatprep.mubr.bf16.mxu1 %v2302_v28  ;;  %v8162_v26 = vld [vmem:[#allocation6 + $0x544] ss:$8 sps:$4 sm:$0xff]   ;;  %v8160_v28 = vld [vmem:[#allocation6 + $0x540] ss:$8 sps:$4 sm:$0xff]  }
 0x215   :  { %4934 = vmatprep.subr.bf16.mxu1 %v8105_v27  ;;  %v8165_v27 = vld [vmem:[#allocation6 + $0xb4] ss:$8 sps:$4 sm:$0xff]  }
 0x218   :  { %4935 = vmatpush1.bf16.msra.mxu1 %v8103_v29  ;;  %v8163_v29 = vld [vmem:[#allocation6 + $0xb0] ss:$8 sps:$4 sm:$0xff]  }
 0x219   :  { %4936 = vmatprep.subr.bf16.mxu1 %v8111_v30  ;;  %v8168_v30 = vld [vmem:[#allocation6 + $0x554] ss:$8 sps:$4 sm:$0xff]  }
 0x21c   :  { %4937 = vmatpush1.bf16.msra.mxu1 %v8109_v31  ;;  %v8171_v31 = vld [vmem:[#allocation6 + $0xc4] ss:$8 sps:$4 sm:$0xff]  }
 0x21d   :  { %4938 = vmatprep.subr.bf16.mxu1 %v8117_v32  ;;  %v9622_v32 = vsub.s32 6, %v9567_v53 }
 0x220   :  { %4939 = vmatpush1.bf16.msra.mxu1 %v8115_v33  ;;  %v8166_v33 = vld [vmem:[#allocation6 + $0x550] ss:$8 sps:$4 sm:$0xff]  }
 0x221   :  { %4940 = vmatprep.subr.bf16.mxu1 %v8123_v34  ;;  %v8169_v34 = vld [vmem:[#allocation6 + $0xc0] ss:$8 sps:$4 sm:$0xff]  }
 0x224   :  { %4941 = vmatpush1.bf16.msra.mxu1 %v8121_v37  ;;  %v9625_v37 = vsub.s32 7, %v9567_v53  ;;  %v8180_v53 = vld [vmem:[#allocation6 + $0x574] ss:$8 sps:$4 sm:$0xff]  }
 0x225   :  { %4942 = vmatprep.subr.bf16.mxu1 %v8129_v41  ;;  %v8174_v41 = vld [vmem:[#allocation6 + $0x564] ss:$8 sps:$4 sm:$0xff]  }
 0x226   :  { %v1776_v49 = vpop.f32.mrb[4].mxu1  ;;  %v1899_v50 = vpop.f32.mrb[4].mxu0 }
 0x227   :  { %v9617_v51 = vadd.f32 %v1776_v49, %v489_v42  ;;  %v1900_v52 = vadd.f32 %v1899_v50, %v513_v43  ;;  %v1778_v54 = vpop.f32.mrb[5].mxu1  ;;  %v1901_v55 = vpop.f32.mrb[5].mxu0  ;;  %v8177_v42 = vld [vmem:[#allocation6 + $0xd4] ss:$8 sps:$4 sm:$0xff]   ;;  %v505_v43 = vrot.slane %v9573_v59, %v9622_v32  ;;  %v8183_v49 = vld [vmem:[#allocation6 + $0xe4] ss:$8 sps:$4 sm:$0xff]  }
 0x228   :  { %v9619_v56 = vadd.f32 %v1778_v54, %v493_v45  ;;  %v1902_v57 = vadd.f32 %v1901_v55, %v517_v46  ;;  %v1780_v61 = vpop.f32.mrb[6].mxu1  ;;  %v1903_v62 = vpop.f32.mrb[6].mxu0  ;;  %4943 = vmatpush1.bf16.msra.mxu1 %v8127_v47  ;;  %v8172_v45 = vld [vmem:[#allocation6 + $0x560] ss:$8 sps:$4 sm:$0xff]   ;;  %v509_v46 = vrot.slane %v9573_v59, %v9625_v37  ;;  %v8175_v47 = vld [vmem:[#allocation6 + $0xd0] ss:$8 sps:$4 sm:$0xff]  }
 0x229   :  { %v2282_v2 = vmax.f32 %v1900_v52, 0.0  ;;  %v1781_v3 = vpop.f32.mrb[7].mxu1  ;;  %v1904_v4 = vpop.f32.mrb[7].mxu0  ;;  %4944 = vmatprep.subr.bf16.mxu1 %v8135_v48  ;;  %v481_v48 = vrot.slane %v9573_v59, %v9607_v40 }
 0x22a   :  { %v2283_v7 = vmax.f32 %v1902_v57, 0.0 }
 0x22b   :  { %v2309_v14 = vpack.c.bf16 %v2282_v2, %v2282_v2  ;;  %v8181_v2 = vld [vmem:[#allocation6 + $0xe0] ss:$8 sps:$4 sm:$0xff]   ;;  %v1736_v3 = vadd.f32 %v9587_v6, %v481_v48  ;;  %v525_v48 = vrot.slane %v9601_v38, %v9604_v39 }
 0x22c   :  { %v2310_v13 = vpack.c.bf16 %v2283_v7, %v2283_v7  ;;  %4945 = vmatpush1.bf16.msra.mxu1 %v8133_v1  ;;  %v8178_v1 = vld [vmem:[#allocation6 + $0x570] ss:$8 sps:$4 sm:$0xff]   ;;  %v8189_v7 = vld [vmem:[#allocation6 + $0xf4] ss:$8 sps:$4 sm:$0xff]   ;;  %v8193_v6 = vld [vmem:[#allocation6 + $0x100] ss:$8 sps:$4 sm:$0xff]  }
 0x22d   :  { %4946 = vmatprep.subr.bf16.mxu1 %v8141_v5  ;;  %v8186_v5 = vld [vmem:[#allocation6 + $0x584] ss:$8 sps:$4 sm:$0xff]  }
 0x22e   :  { %5128 = vmatprep.mubr.bf16.mxu0 %v2310_v13  ;;  %v2274_v13 = vmax.f32 %v1736_v3, 0.0 }
 0x22f   :  { %5129 = vmatmul.mubr.bf16.vlgmr.msra.gmra.mrb[24].mxu0 %v2309_v14  ;;  %v8192_v14 = vld [vmem:[#allocation6 + $0x594] ss:$8 sps:$4 sm:$0xff]  }
 0x230   :  { %5138 = vmatpush1.bf16.msra.mxu0 %v8136_v8  ;;  %4947 = vmatpush1.bf16.msra.mxu1 %v8139_v10  ;;  %v8184_v10 = vld [vmem:[#allocation6 + $0x580] ss:$8 sps:$4 sm:$0xff]  }
 0x231   :  { %5139 = vmatprep.subr.bf16.mxu0 %v8144_v11  ;;  %4948 = vmatprep.subr.bf16.mxu1 %v8147_v15  ;;  %v8187_v11 = vld [vmem:[#allocation6 + $0xf0] ss:$8 sps:$4 sm:$0xff]   ;;  %v8195_v15 = vld [vmem:[#allocation6 + $0x104] ss:$8 sps:$4 sm:$0xff]  }
 0x234   :  { %5140 = vmatpush1.bf16.msra.mxu0 %v8142_v16  ;;  %4949 = vmatpush1.bf16.msra.mxu1 %v8145_v17  ;;  %v8190_v16 = vld [vmem:[#allocation6 + $0x590] ss:$8 sps:$4 sm:$0xff]   ;;  %v2277_v17 = vmax.f32 %v9619_v56, 0.0 }
 0x235   :  { %5141 = vmatprep.subr.bf16.mxu0 %v8150_v18  ;;  %4950 = vmatprep.subr.bf16.mxu1 %v8153_v19  ;;  %v8198_v18 = vld [vmem:[#allocation6 + $0x5a4] ss:$8 sps:$4 sm:$0xff]   ;;  %v2301_v19 = vpack.c.bf16 %v2274_v13, %v2274_v13  ;;  %v8202_v56 = vld [vmem:[#allocation6 + $0x5b0] ss:$8 sps:$4 sm:$0xff]  }
 0x238   :  { %5142 = vmatpush1.bf16.msra.mxu0 %v8148_v20  ;;  %4951 = vmatpush1.bf16.msra.mxu1 %v8151_v21  ;;  %v8196_v20 = vld [vmem:[#allocation6 + $0x5a0] ss:$8 sps:$4 sm:$0xff]   ;;  %v8201_v21 = vld [vmem:[#allocation6 + $0x114] ss:$8 sps:$4 sm:$0xff]  }
 0x239   :  { %5143 = vmatprep.subr.bf16.mxu0 %v8156_v22  ;;  %4952 = vmatprep.subr.bf16.mxu1 %v8159_v23  ;;  %v2304_v22 = vpack.c.bf16 %v2277_v17, %v2277_v17  ;;  %v8199_v23 = vld [vmem:[#allocation6 + $0x110] ss:$8 sps:$4 sm:$0xff]   ;;  %v8232_v17 = vld [vmem:[#allocation6 + $0x600] ss:$8 sps:$4 sm:$0xff]  }
 0x23c   :  { %5144 = vmatpush1.bf16.msra.mxu0 %v8154_v24  ;;  %4953 = vmatpush1.bf16.msra.mxu1 %v8157_v25  ;;  %v8204_v24 = vld [vmem:[#allocation6 + $0x5b4] ss:$8 sps:$4 sm:$0xff]   ;;  %v8207_v25 = vld [vmem:[#allocation6 + $0x124] ss:$8 sps:$4 sm:$0xff]  }
 0x23d   :  { %5145 = vmatprep.subr.bf16.mxu0 %v8162_v26  ;;  %4954 = vmatprep.subr.bf16.mxu1 %v8165_v27  ;;  %v8205_v26 = vld [vmem:[#allocation6 + $0x120] ss:$8 sps:$4 sm:$0xff]   ;;  %v8210_v27 = vld [vmem:[#allocation6 + $0x5c4] ss:$8 sps:$4 sm:$0xff]  }
 0x240   :  { %5146 = vmatpush1.bf16.msra.mxu0 %v8160_v28  ;;  %4955 = vmatpush1.bf16.msra.mxu1 %v8163_v29  ;;  %v8213_v28 = vld [vmem:[#allocation6 + $0x134] ss:$8 sps:$4 sm:$0xff]   ;;  %v8208_v29 = vld [vmem:[#allocation6 + $0x5c0] ss:$8 sps:$4 sm:$0xff]  }
 0x241   :  { %5147 = vmatprep.subr.bf16.mxu0 %v8168_v30  ;;  %4956 = vmatprep.subr.bf16.mxu1 %v8171_v31  ;;  %v8211_v30 = vld [vmem:[#allocation6 + $0x130] ss:$8 sps:$4 sm:$0xff]   ;;  %v8216_v31 = vld [vmem:[#allocation6 + $0x5d4] ss:$8 sps:$4 sm:$0xff]  }
 0x244   :  { %5148 = vmatpush1.bf16.msra.mxu0 %v8166_v33  ;;  %4957 = vmatpush1.bf16.msra.mxu1 %v8169_v34  ;;  %v8219_v33 = vld [vmem:[#allocation6 + $0x144] ss:$8 sps:$4 sm:$0xff]   ;;  %v8214_v34 = vld [vmem:[#allocation6 + $0x5d0] ss:$8 sps:$4 sm:$0xff]  }
 0x245   :  { %5149 = vmatprep.subr.bf16.mxu0 %v8174_v41  ;;  %4958 = vmatprep.subr.bf16.mxu1 %v8177_v42  ;;  %v8217_v41 = vld [vmem:[#allocation6 + $0x140] ss:$8 sps:$4 sm:$0xff]   ;;  %v8222_v42 = vld [vmem:[#allocation6 + $0x5e4] ss:$8 sps:$4 sm:$0xff]  }
 0x246   :  { %v1858_v50 = vpop.f32.mrb[8].mxu1  ;;  %v9633_v52 = vpop.f32.mrb[8].mxu0 }
 0x247   :  { %v9635_v54 = vadd.f32 %v1858_v50, %v505_v43  ;;  %v1860_v55 = vpop.f32.mrb[9].mxu1  ;;  %v9637_v57 = vpop.f32.mrb[9].mxu0  ;;  %v8225_v43 = vld [vmem:[#allocation6 + $0x154] ss:$8 sps:$4 sm:$0xff]   ;;  %v8231_v50 = vld [vmem:[#allocation6 + $0x164] ss:$8 sps:$4 sm:$0xff]  }
 0x248   :  { %v9639_v61 = vadd.f32 %v1860_v55, %v509_v46  ;;  %5150 = vmatpush1.bf16.msra.mxu0 %v8172_v45  ;;  %v1862_v62 = vpop.f32.mrb[10].mxu1  ;;  %4959 = vmatpush1.bf16.msra.mxu1 %v8175_v47  ;;  %v1985_v59 = vpop.f32.mrb[10].mxu0  ;;  %v533_v45 = vrot.slane %v9601_v38, %v9576_v60  ;;  %v521_v46 = vrot.slane %v9601_v38, %v9599_v35  ;;  %v8220_v47 = vld [vmem:[#allocation6 + $0x5e0] ss:$8 sps:$4 sm:$0xff]  }
 0x249   :  { %v1863_v4 = vpop.f32.mrb[11].mxu1  ;;  %5151 = vmatprep.subr.bf16.mxu0 %v8180_v53  ;;  %4960 = vmatprep.subr.bf16.mxu1 %v8183_v49  ;;  %v1986_v8 = vpop.f32.mrb[11].mxu0  ;;  %v8223_v53 = vld [vmem:[#allocation6 + $0x150] ss:$8 sps:$4 sm:$0xff]   ;;  %v8228_v49 = vld [vmem:[#allocation6 + $0x5f4] ss:$8 sps:$4 sm:$0xff]  }
 0x24a   :  { %v8226_v62 = vld [vmem:[#allocation6 + $0x5f0] ss:$8 sps:$4 sm:$0xff]   ;;  %v8229_v38 = vld [vmem:[#allocation6 + $0x160] ss:$8 sps:$4 sm:$0xff]   ;;  %v8234_v8 = vld [vmem:[#allocation6 + $0x604] ss:$8 sps:$4 sm:$0xff]  }
 0x24c   :  { %5152 = vmatpush1.bf16.msra.mxu0 %v8178_v1  ;;  %4961 = vmatpush1.bf16.msra.mxu1 %v8181_v2  ;;  %v1984_v2 = vadd.f32 %v9637_v57, %v533_v45  ;;  %v8235_v57 = vld [vmem:[#allocation6 + $0x170] ss:$8 sps:$4 sm:$0xff]   ;;  %v8267_v45 = vld [vmem:[#allocation6 + $0x1c4] ss:$8 sps:$4 sm:$0xff]  }
 0x24d   :  { %5153 = vmatprep.subr.bf16.mxu0 %v8186_v5  ;;  %4962 = vmatprep.subr.bf16.mxu1 %v8189_v7 }
 0x250   :  { %5154 = vmatpush1.bf16.msra.mxu0 %v8184_v10  ;;  %4963 = vmatpush1.bf16.msra.mxu1 %v8187_v11 }
 0x251   :  { %5155 = vmatprep.subr.bf16.mxu0 %v8192_v14  ;;  %4973 = vmatprep.subr.bf16.mxu1 %v8195_v15  ;;  %v8237_v14 = vld [vmem:[#allocation6 + $0x174] ss:$8 sps:$4 sm:$0xff]  }
 0x253   :  { %4965 = vmatmul.mubr.bf16.vlgmr.msra.gmra.mrb[32].mxu1 %v2301_v19 }
 0x254   :  { %5156 = vmatpush1.bf16.msra.mxu0 %v8190_v16  ;;  %4974 = vmatpush1.bf16.msra.mxu1 %v8193_v6  ;;  %v2287_v6 = vmax.f32 %v1984_v2, 0.0  ;;  %v8274_v2 = vld [vmem:[#allocation6 + $0x670] ss:$8 sps:$4 sm:$0xff]  }
 0x255   :  { %5005 = vmatprep.mubr.bf16.mxu1 %v2304_v22  ;;  %5157 = vmatprep.subr.bf16.mxu0 %v8198_v18  ;;  %v8243_v22 = vld [vmem:[#allocation6 + $0x184] ss:$8 sps:$4 sm:$0xff]  }
 0x256   :  { %4975 = vmatprep.subr.bf16.mxu1 %v8201_v21  ;;  %v8238_v21 = vld [vmem:[#allocation6 + $0x610] ss:$8 sps:$4 sm:$0xff]  }
 0x258   :  { %5158 = vmatpush1.bf16.msra.mxu0 %v8196_v20  ;;  %4976 = vmatpush1.bf16.msra.mxu1 %v8199_v23  ;;  %v8240_v20 = vld [vmem:[#allocation6 + $0x614] ss:$8 sps:$4 sm:$0xff]   ;;  %v2314_v23 = vpack.c.bf16 %v2287_v6, %v2287_v6 }
 0x259   :  { %5159 = vmatprep.subr.bf16.mxu0 %v8204_v24  ;;  %4977 = vmatprep.subr.bf16.mxu1 %v8207_v25  ;;  %v8241_v24 = vld [vmem:[#allocation6 + $0x180] ss:$8 sps:$4 sm:$0xff]   ;;  %v8246_v25 = vld [vmem:[#allocation6 + $0x624] ss:$8 sps:$4 sm:$0xff]   ;;  %v8288_v6 = vld [vmem:[#allocation6 + $0x694] ss:$8 sps:$4 sm:$0xff]  }
 0x25c   :  { %5160 = vmatpush1.bf16.msra.mxu0 %v8202_v56  ;;  %4978 = vmatpush1.bf16.msra.mxu1 %v8205_v26  ;;  %v8249_v56 = vld [vmem:[#allocation6 + $0x194] ss:$8 sps:$4 sm:$0xff]   ;;  %v8244_v26 = vld [vmem:[#allocation6 + $0x620] ss:$8 sps:$4 sm:$0xff]  }
 0x25d   :  { %5161 = vmatprep.subr.bf16.mxu0 %v8210_v27  ;;  %4979 = vmatprep.subr.bf16.mxu1 %v8213_v28  ;;  %v8247_v27 = vld [vmem:[#allocation6 + $0x190] ss:$8 sps:$4 sm:$0xff]   ;;  %v8252_v28 = vld [vmem:[#allocation6 + $0x634] ss:$8 sps:$4 sm:$0xff]  }
 0x260   :  { %5162 = vmatpush1.bf16.msra.mxu0 %v8208_v29  ;;  %4980 = vmatpush1.bf16.msra.mxu1 %v8211_v30  ;;  %v8255_v29 = vld [vmem:[#allocation6 + $0x1a4] ss:$8 sps:$4 sm:$0xff]   ;;  %v8250_v30 = vld [vmem:[#allocation6 + $0x630] ss:$8 sps:$4 sm:$0xff]  }
 0x261   :  { %5163 = vmatprep.subr.bf16.mxu0 %v8216_v31  ;;  %4981 = vmatprep.subr.bf16.mxu1 %v8219_v33  ;;  %v8253_v31 = vld [vmem:[#allocation6 + $0x1a0] ss:$8 sps:$4 sm:$0xff]   ;;  %v8258_v33 = vld [vmem:[#allocation6 + $0x644] ss:$8 sps:$4 sm:$0xff]  }
 0x264   :  { %5164 = vmatpush1.bf16.msra.mxu0 %v8214_v34  ;;  %4982 = vmatpush1.bf16.msra.mxu1 %v8217_v41  ;;  %v8261_v34 = vld [vmem:[#allocation6 + $0x1b4] ss:$8 sps:$4 sm:$0xff]   ;;  %v8256_v41 = vld [vmem:[#allocation6 + $0x640] ss:$8 sps:$4 sm:$0xff]  }
 0x265   :  { %5165 = vmatprep.subr.bf16.mxu0 %v8222_v42  ;;  %4983 = vmatprep.subr.bf16.mxu1 %v8225_v43  ;;  %v8259_v42 = vld [vmem:[#allocation6 + $0x1b0] ss:$8 sps:$4 sm:$0xff]   ;;  %v8264_v43 = vld [vmem:[#allocation6 + $0x654] ss:$8 sps:$4 sm:$0xff]  }
 0x266   :  { %v1940_v55 = vpop.f32.mrb[12].mxu1  ;;  %v9649_v1 = vpop.f32.mrb[12].mxu0 }
 0x267   :  { %v1941_v59 = vadd.f32 %v1940_v55, %v521_v46  ;;  %v1942_v3 = vpop.f32.mrb[13].mxu1  ;;  %v9652_v4 = vpop.f32.mrb[13].mxu0  ;;  %v8262_v46 = vld [vmem:[#allocation6 + $0x650] ss:$8 sps:$4 sm:$0xff]   ;;  %v8276_v55 = vld [vmem:[#allocation6 + $0x674] ss:$8 sps:$4 sm:$0xff]  }
 0x268   :  { %v1943_v5 = vadd.f32 %v1942_v3, %v525_v48  ;;  %5166 = vmatpush1.bf16.msra.mxu0 %v8220_v47  ;;  %v1944_v7 = vpop.f32.mrb[14].mxu1  ;;  %4984 = vmatpush1.bf16.msra.mxu1 %v8223_v53  ;;  %v2067_v10 = vpop.f32.mrb[14].mxu0  ;;  %v8265_v47 = vld [vmem:[#allocation6 + $0x1c0] ss:$8 sps:$4 sm:$0xff]   ;;  %v8270_v48 = vld [vmem:[#allocation6 + $0x664] ss:$8 sps:$4 sm:$0xff]  }
 0x269   :  { %v2284_v11 = vmax.f32 %v1941_v59, 0.0  ;;  %v1945_v13 = vpop.f32.mrb[15].mxu1  ;;  %5167 = vmatprep.subr.bf16.mxu0 %v8228_v49  ;;  %4985 = vmatprep.subr.bf16.mxu1 %v8231_v50  ;;  %v2068_v15 = vpop.f32.mrb[15].mxu0  ;;  %v8273_v53 = vld [vmem:[#allocation6 + $0x1d4] ss:$8 sps:$4 sm:$0xff]  }
 0x26a   :  { %v2285_v16 = vmax.f32 %v1943_v5, 0.0  ;;  %v8268_v49 = vld [vmem:[#allocation6 + $0x660] ss:$8 sps:$4 sm:$0xff]   ;;  %v8271_v50 = vld [vmem:[#allocation6 + $0x1d0] ss:$8 sps:$4 sm:$0xff]  }
 0x26b   :  { %v2311_v19 = vpack.c.bf16 %v2284_v11, %v2284_v11  ;;  %v8277_v59 = vld [vmem:[#allocation6 + $0x1e0] ss:$8 sps:$4 sm:$0xff]   ;;  %v8282_v11 = vld [vmem:[#allocation6 + $0x684] ss:$8 sps:$4 sm:$0xff]   ;;  %v8285_v13 = vld [vmem:[#allocation6 + $0x1f4] ss:$8 sps:$4 sm:$0xff]  }
 0x26c   :  { %v2312_v18 = vpack.c.bf16 %v2285_v16, %v2285_v16  ;;  %5168 = vmatpush1.bf16.msra.mxu0 %v8226_v62  ;;  %4986 = vmatpush1.bf16.msra.mxu1 %v8229_v38  ;;  %v8279_v62 = vld [vmem:[#allocation6 + $0x1e4] ss:$8 sps:$4 sm:$0xff]   ;;  %v8280_v16 = vld [vmem:[#allocation6 + $0x680] ss:$8 sps:$4 sm:$0xff]  }
 0x26d   :  { %5178 = vmatprep.subr.bf16.mxu0 %v8234_v8  ;;  %4987 = vmatprep.subr.bf16.mxu1 %v8237_v14 }
 0x26e   :  { %5169 = vmatprep.mubr.bf16.mxu0 %v2312_v18  ;;  %v8291_v18 = vld [vmem:[#allocation6 + $0x204] ss:$8 sps:$4 sm:$0xff]  }
 0x26f   :  { %5170 = vmatmul.mubr.bf16.vlgmr.msra.gmra.mrb[24].mxu0 %v2311_v19  ;;  %v8286_v19 = vld [vmem:[#allocation6 + $0x690] ss:$8 sps:$4 sm:$0xff]  }
 0x270   :  { %5179 = vmatpush1.bf16.msra.mxu0 %v8232_v17  ;;  %4988 = vmatpush1.bf16.msra.mxu1 %v8235_v57  ;;  %v8283_v17 = vld [vmem:[#allocation6 + $0x1f0] ss:$8 sps:$4 sm:$0xff]   ;;  %v2276_v57 = vmax.f32 %v9617_v51, 0.0  ;;  %v8300_v51 = vld [vmem:[#allocation6 + $0x6b4] ss:$8 sps:$4 sm:$0xff]  }
 0x271   :  { %5210 = vmatprep.mubr.bf16.mxu0 %v2314_v23  ;;  %5180 = vmatprep.subr.bf16.mxu0 %v8240_v20  ;;  %v8289_v20 = vld [vmem:[#allocation6 + $0x200] ss:$8 sps:$4 sm:$0xff]   ;;  %v8294_v23 = vld [vmem:[#allocation6 + $0x6a4] ss:$8 sps:$4 sm:$0xff]  }
 0x272   :  { %4989 = vmatprep.subr.bf16.mxu1 %v8243_v22  ;;  %v2303_v22 = vpack.c.bf16 %v2276_v57, %v2276_v57 }
 0x274   :  { %5181 = vmatpush1.bf16.msra.mxu0 %v8238_v21  ;;  %4990 = vmatpush1.bf16.msra.mxu1 %v8241_v24  ;;  %v2279_v21 = vmax.f32 %v9593_v12, 0.0  ;;  %v8297_v24 = vld [vmem:[#allocation6 + $0x214] ss:$8 sps:$4 sm:$0xff]   ;;  %v8301_v12 = vld [vmem:[#allocation6 + $0x220] ss:$8 sps:$4 sm:$0xff]  }
 0x275   :  { %5182 = vmatprep.subr.bf16.mxu0 %v8246_v25  ;;  %4991 = vmatprep.subr.bf16.mxu1 %v8249_v56  ;;  %v8292_v25 = vld [vmem:[#allocation6 + $0x6a0] ss:$8 sps:$4 sm:$0xff]   ;;  %v8295_v56 = vld [vmem:[#allocation6 + $0x210] ss:$8 sps:$4 sm:$0xff]  }
 0x278   :  { %5183 = vmatpush1.bf16.msra.mxu0 %v8244_v26  ;;  %4992 = vmatpush1.bf16.msra.mxu1 %v8247_v27  ;;  %v2306_v26 = vpack.c.bf16 %v2279_v21, %v2279_v21  ;;  %v8303_v27 = vld [vmem:[#allocation6 + $0x224] ss:$8 sps:$4 sm:$0xff]   ;;  %v8334_v21 = vld [vmem:[#allocation6 + $0x710] ss:$8 sps:$4 sm:$0xff]  }
 0x279   :  { %5184 = vmatprep.subr.bf16.mxu0 %v8252_v28  ;;  %4993 = vmatprep.subr.bf16.mxu1 %v8255_v29  ;;  %v8298_v28 = vld [vmem:[#allocation6 + $0x6b0] ss:$8 sps:$4 sm:$0xff]   ;;  %v8306_v29 = vld [vmem:[#allocation6 + $0x6c4] ss:$8 sps:$4 sm:$0xff]  }
 0x27c   :  { %5185 = vmatpush1.bf16.msra.mxu0 %v8250_v30  ;;  %4994 = vmatpush1.bf16.msra.mxu1 %v8253_v31  ;;  %v8309_v30 = vld [vmem:[#allocation6 + $0x234] ss:$8 sps:$4 sm:$0xff]   ;;  %v8304_v31 = vld [vmem:[#allocation6 + $0x6c0] ss:$8 sps:$4 sm:$0xff]  }
 0x27d   :  { %5186 = vmatprep.subr.bf16.mxu0 %v8258_v33  ;;  %4995 = vmatprep.subr.bf16.mxu1 %v8261_v34  ;;  %v8307_v33 = vld [vmem:[#allocation6 + $0x230] ss:$8 sps:$4 sm:$0xff]   ;;  %v8312_v34 = vld [vmem:[#allocation6 + $0x6d4] ss:$8 sps:$4 sm:$0xff]  }
 0x280   :  { %5187 = vmatpush1.bf16.msra.mxu0 %v8256_v41  ;;  %4996 = vmatpush1.bf16.msra.mxu1 %v8259_v42  ;;  %v8315_v41 = vld [vmem:[#allocation6 + $0x244] ss:$8 sps:$4 sm:$0xff]   ;;  %v8310_v42 = vld [vmem:[#allocation6 + $0x6d0] ss:$8 sps:$4 sm:$0xff]  }
 0x281   :  { %5188 = vmatprep.subr.bf16.mxu0 %v8264_v43  ;;  %4997 = vmatprep.subr.bf16.mxu1 %v8267_v45  ;;  %v8313_v43 = vld [vmem:[#allocation6 + $0x240] ss:$8 sps:$4 sm:$0xff]   ;;  %v8318_v45 = vld [vmem:[#allocation6 + $0x6e4] ss:$8 sps:$4 sm:$0xff]  }
 0x284   :  { %5189 = vmatpush1.bf16.msra.mxu0 %v8262_v46  ;;  %4998 = vmatpush1.bf16.msra.mxu1 %v8265_v47  ;;  %v8321_v46 = vld [vmem:[#allocation6 + $0x254] ss:$8 sps:$4 sm:$0xff]   ;;  %v9664_v47 = vld [vmem:[#allocation4 + $0x8] sm:$0xff] }
 0x285   :  { %5190 = vmatprep.subr.bf16.mxu0 %v8270_v48  ;;  %4999 = vmatprep.subr.bf16.mxu1 %v8273_v53  ;;  %v529_v48 = vrot.slane %v9664_v47, %v9571_v58  ;;  %v8316_v53 = vld [vmem:[#allocation6 + $0x6e0] ss:$8 sps:$4 sm:$0xff]  }
 0x286   :  { %v9654_v3 = vpop.f32.mrb[16].mxu0  ;;  %v9656_v5 = vpop.f32.mrb[16].mxu1 }
 0x287   :  { %v9658_v7 = vpop.f32.mrb[17].mxu0  ;;  %v9660_v38 = vpop.f32.mrb[17].mxu1 }
 0x288   :  { %5191 = vmatpush1.bf16.msra.mxu0 %v8268_v49  ;;  %5000 = vmatpush1.bf16.msra.mxu1 %v8271_v50  ;;  %v2149_v8 = vpop.f32.mrb[18].mxu0  ;;  %v2026_v10 = vpop.f32.mrb[18].mxu1  ;;  %v8319_v49 = vld [vmem:[#allocation6 + $0x250] ss:$8 sps:$4 sm:$0xff]   ;;  %v541_v50 = vrot.slane %v9664_v47, %v9625_v37 }
 0x289   :  { %5192 = vmatprep.subr.bf16.mxu0 %v8276_v55  ;;  %5001 = vmatprep.subr.bf16.mxu1 %v8279_v62  ;;  %v2150_v14 = vpop.f32.mrb[19].mxu0  ;;  %v2027_v15 = vpop.f32.mrb[19].mxu1  ;;  %v8324_v55 = vld [vmem:[#allocation6 + $0x6f4] ss:$8 sps:$4 sm:$0xff]   ;;  %v8327_v62 = vld [vmem:[#allocation6 + $0x264] ss:$8 sps:$4 sm:$0xff]  }
 0x28a   :  { %v8325_v8 = vld [vmem:[#allocation6 + $0x260] ss:$8 sps:$4 sm:$0xff]   ;;  %v8330_v14 = vld [vmem:[#allocation6 + $0x704] ss:$8 sps:$4 sm:$0xff]   ;;  %v8333_v15 = vld [vmem:[#allocation6 + $0x274] ss:$8 sps:$4 sm:$0xff]  }
 0x28c   :  { %5193 = vmatpush1.bf16.msra.mxu0 %v8274_v2  ;;  %5002 = vmatpush1.bf16.msra.mxu1 %v8277_v59  ;;  %v1982_v2 = vadd.f32 %v9633_v52, %v529_v48  ;;  %v8322_v59 = vld [vmem:[#allocation6 + $0x6f0] ss:$8 sps:$4 sm:$0xff]   ;;  %v8328_v52 = vld [vmem:[#allocation6 + $0x700] ss:$8 sps:$4 sm:$0xff]  }
 0x28d   :  { %5194 = vmatprep.subr.bf16.mxu0 %v8282_v11  ;;  %5003 = vmatprep.subr.bf16.mxu1 %v8285_v13  ;;  %v2025_v11 = vadd.f32 %v9660_v38, %v541_v50  ;;  %v8339_v38 = vld [vmem:[#allocation6 + $0x284] ss:$8 sps:$4 sm:$0xff]   ;;  %v8364_v48 = vld [vmem:[#allocation6 + $0x760] ss:$8 sps:$4 sm:$0xff]   ;;  %v2278_v50 = vmax.f32 %v9591_v9, 0.0 }
 0x28e   :  { %v8384_v9 = vld [vmem:[#allocation6 + $0x794] ss:$8 sps:$4 sm:$0xff]  }
 0x290   :  { %5195 = vmatpush1.bf16.msra.mxu0 %v8280_v16  ;;  %5004 = vmatpush1.bf16.msra.mxu1 %v8283_v17  ;;  %v2286_v17 = vmax.f32 %v1982_v2, 0.0  ;;  %v8370_v2 = vld [vmem:[#allocation6 + $0x770] ss:$8 sps:$4 sm:$0xff]  }
 0x291   :  { %5196 = vmatprep.subr.bf16.mxu0 %v8288_v6  ;;  %5014 = vmatprep.subr.bf16.mxu1 %v8291_v18  ;;  %v8331_v6 = vld [vmem:[#allocation6 + $0x270] ss:$8 sps:$4 sm:$0xff]   ;;  %v2289_v18 = vmax.f32 %v2025_v11, 0.0  ;;  %v8381_v11 = vld [vmem:[#allocation6 + $0x2f4] ss:$8 sps:$4 sm:$0xff]  }
 0x293   :  { %5006 = vmatmul.mubr.bf16.vlgmr.msra.gmra.mrb[32].mxu1 %v2303_v22  ;;  %v8337_v22 = vld [vmem:[#allocation6 + $0x280] ss:$8 sps:$4 sm:$0xff]  }
 0x294   :  { %5197 = vmatpush1.bf16.msra.mxu0 %v8286_v19  ;;  %5015 = vmatpush1.bf16.msra.mxu1 %v8289_v20  ;;  %v8336_v19 = vld [vmem:[#allocation6 + $0x714] ss:$8 sps:$4 sm:$0xff]   ;;  %v2313_v20 = vpack.c.bf16 %v2286_v17, %v2286_v17  ;;  %v8385_v17 = vld [vmem:[#allocation6 + $0x300] ss:$8 sps:$4 sm:$0xff]  }
 0x295   :  { %5046 = vmatprep.mubr.bf16.mxu1 %v2306_v26  ;;  %5198 = vmatprep.subr.bf16.mxu0 %v8294_v23  ;;  %v2316_v23 = vpack.c.bf16 %v2289_v18, %v2289_v18  ;;  %v8343_v26 = vld [vmem:[#allocation6 + $0x290] ss:$8 sps:$4 sm:$0xff]   ;;  %v8388_v18 = vld [vmem:[#allocation6 + $0x7a0] ss:$8 sps:$4 sm:$0xff]  }
 0x296   :  { %5016 = vmatprep.subr.bf16.mxu1 %v8297_v24  ;;  %v8342_v24 = vld [vmem:[#allocation6 + $0x724] ss:$8 sps:$4 sm:$0xff]  }
 0x298   :  { %5199 = vmatpush1.bf16.msra.mxu0 %v8292_v25  ;;  %5017 = vmatpush1.bf16.msra.mxu1 %v8295_v56  ;;  %v8345_v25 = vld [vmem:[#allocation6 + $0x294] ss:$8 sps:$4 sm:$0xff]   ;;  %v8340_v56 = vld [vmem:[#allocation6 + $0x720] ss:$8 sps:$4 sm:$0xff]  }
 0x299   :  { %5200 = vmatprep.subr.bf16.mxu0 %v8300_v51  ;;  %5018 = vmatprep.subr.bf16.mxu1 %v8303_v27  ;;  %v8348_v51 = vld [vmem:[#allocation6 + $0x734] ss:$8 sps:$4 sm:$0xff]   ;;  %v8351_v27 = vld [vmem:[#allocation6 + $0x2a4] ss:$8 sps:$4 sm:$0xff]  }
 0x29c   :  { %5201 = vmatpush1.bf16.msra.mxu0 %v8298_v28  ;;  %5019 = vmatpush1.bf16.msra.mxu1 %v8301_v12  ;;  %v8346_v28 = vld [vmem:[#allocation6 + $0x730] ss:$8 sps:$4 sm:$0xff]   ;;  %v8349_v12 = vld [vmem:[#allocation6 + $0x2a0] ss:$8 sps:$4 sm:$0xff]  }
 0x29d   :  { %5202 = vmatprep.subr.bf16.mxu0 %v8306_v29  ;;  %5020 = vmatprep.subr.bf16.mxu1 %v8309_v30  ;;  %v8354_v29 = vld [vmem:[#allocation6 + $0x744] ss:$8 sps:$4 sm:$0xff]   ;;  %v8357_v30 = vld [vmem:[#allocation6 + $0x2b4] ss:$8 sps:$4 sm:$0xff]  }
 0x2a0   :  { %5203 = vmatpush1.bf16.msra.mxu0 %v8304_v31  ;;  %5021 = vmatpush1.bf16.msra.mxu1 %v8307_v33  ;;  %v8352_v31 = vld [vmem:[#allocation6 + $0x740] ss:$8 sps:$4 sm:$0xff]   ;;  %v8355_v33 = vld [vmem:[#allocation6 + $0x2b0] ss:$8 sps:$4 sm:$0xff]  }
 0x2a1   :  { %5204 = vmatprep.subr.bf16.mxu0 %v8312_v34  ;;  %5022 = vmatprep.subr.bf16.mxu1 %v8315_v41  ;;  %v8360_v34 = vld [vmem:[#allocation6 + $0x754] ss:$8 sps:$4 sm:$0xff]   ;;  %v8363_v41 = vld [vmem:[#allocation6 + $0x2c4] ss:$8 sps:$4 sm:$0xff]  }
 0x2a4   :  { %5205 = vmatpush1.bf16.msra.mxu0 %v8310_v42  ;;  %5023 = vmatpush1.bf16.msra.mxu1 %v8313_v43  ;;  %v8358_v42 = vld [vmem:[#allocation6 + $0x750] ss:$8 sps:$4 sm:$0xff]   ;;  %v8361_v43 = vld [vmem:[#allocation6 + $0x2c0] ss:$8 sps:$4 sm:$0xff]  }
 0x2a5   :  { %5206 = vmatprep.subr.bf16.mxu0 %v8318_v45  ;;  %5024 = vmatprep.subr.bf16.mxu1 %v8321_v46  ;;  %v8366_v45 = vld [vmem:[#allocation6 + $0x764] ss:$8 sps:$4 sm:$0xff]   ;;  %v8369_v46 = vld [vmem:[#allocation6 + $0x2d4] ss:$8 sps:$4 sm:$0xff]  }
 0x2a6   :  { %v9671_v10 = vpop.f32.mrb[20].mxu0 }
 0x2a7   :  { %v9674_v13 = vpop.f32.mrb[21].mxu0 }
 0x2a8   :  { %5207 = vmatpush1.bf16.msra.mxu0 %v8316_v53  ;;  %5025 = vmatpush1.bf16.msra.mxu1 %v8319_v49  ;;  %v2231_v16 = vpop.f32.mrb[22].mxu0  ;;  %v8367_v53 = vld [vmem:[#allocation6 + $0x2d0] ss:$8 sps:$4 sm:$0xff]   ;;  %v8372_v49 = vld [vmem:[#allocation6 + $0x774] ss:$8 sps:$4 sm:$0xff]  }
 0x2a9   :  { %5208 = vmatprep.subr.bf16.mxu0 %v8324_v55  ;;  %5026 = vmatprep.subr.bf16.mxu1 %v8327_v62  ;;  %v2232_v57 = vpop.f32.mrb[23].mxu0  ;;  %v2281_v55 = vmax.f32 %v9639_v61, 0.0  ;;  %v8375_v62 = vld [vmem:[#allocation6 + $0x2e4] ss:$8 sps:$4 sm:$0xff]   ;;  %v8382_v61 = vld [vmem:[#allocation6 + $0x790] ss:$8 sps:$4 sm:$0xff]  }
 0x2aa   :  { %v8387_v16 = vld [vmem:[#allocation6 + $0x304] ss:$8 sps:$4 sm:$0xff]  }
 0x2ab   :  { %v8390_v57 = vld [vmem:[#allocation6 + $0x7a4] ss:$8 sps:$4 sm:$0xff]  }
 0x2ac   :  { %5209 = vmatpush1.bf16.msra.mxu0 %v8322_v59  ;;  %5027 = vmatpush1.bf16.msra.mxu1 %v8325_v8  ;;  %v8373_v59 = vld [vmem:[#allocation6 + $0x2e0] ss:$8 sps:$4 sm:$0xff]   ;;  %v8378_v8 = vld [vmem:[#allocation6 + $0x784] ss:$8 sps:$4 sm:$0xff]  }
 0x2ad   :  { %5219 = vmatprep.subr.bf16.mxu0 %v8330_v14  ;;  %5028 = vmatprep.subr.bf16.mxu1 %v8333_v15  ;;  %v8376_v14 = vld [vmem:[#allocation6 + $0x780] ss:$8 sps:$4 sm:$0xff]   ;;  %v8379_v15 = vld [vmem:[#allocation6 + $0x2f0] ss:$8 sps:$4 sm:$0xff]  }
 0x2af   :  { %5211 = vmatmul.mubr.bf16.vlgmr.msra.gmra.mrb[24].mxu0 %v2313_v20  ;;  %v2308_v20 = vpack.c.bf16 %v2281_v55, %v2281_v55 }
 0x2b0   :  { %5220 = vmatpush1.bf16.msra.mxu0 %v8328_v52  ;;  %5029 = vmatpush1.bf16.msra.mxu1 %v8331_v6  ;;  %v8393_v52 = vld [vmem:[#allocation6 + $0x314] ss:$8 sps:$4 sm:$0xff]   ;;  %v2305_v6 = vpack.c.bf16 %v2278_v50, %v2278_v50 }
 0x2b1   :  { %5221 = vmatprep.subr.bf16.mxu0 %v8336_v19  ;;  %5030 = vmatprep.subr.bf16.mxu1 %v8339_v38  ;;  %v8391_v19 = vld [vmem:[#allocation6 + $0x310] ss:$8 sps:$4 sm:$0xff]   ;;  %v8396_v38 = vld [vmem:[#allocation6 + $0x7b4] ss:$8 sps:$4 sm:$0xff]  }
 0x2b2   :  { %5251 = vmatprep.mubr.bf16.mxu0 %v2316_v23  ;;  %v8397_v23 = vld [vmem:[#allocation6 + $0x320] ss:$8 sps:$4 sm:$0xff]  }
 0x2b4   :  { %5222 = vmatpush1.bf16.msra.mxu0 %v8334_v21  ;;  %5031 = vmatpush1.bf16.msra.mxu1 %v8337_v22  ;;  %v8399_v21 = vld [vmem:[#allocation6 + $0x324] ss:$8 sps:$4 sm:$0xff]   ;;  %v8394_v22 = vld [vmem:[#allocation6 + $0x7b0] ss:$8 sps:$4 sm:$0xff]  }
 0x2b5   :  { %5223 = vmatprep.subr.bf16.mxu0 %v8342_v24  ;;  %5032 = vmatprep.subr.bf16.mxu1 %v8345_v25  ;;  %v8402_v24 = vld [vmem:[#allocation6 + $0x7c4] ss:$8 sps:$4 sm:$0xff]   ;;  %v8405_v25 = vld [vmem:[#allocation6 + $0x334] ss:$8 sps:$4 sm:$0xff]  }
 0x2b8   :  { %5224 = vmatpush1.bf16.msra.mxu0 %v8340_v56  ;;  %5033 = vmatpush1.bf16.msra.mxu1 %v8343_v26  ;;  %v8400_v56 = vld [vmem:[#allocation6 + $0x7c0] ss:$8 sps:$4 sm:$0xff]   ;;  %v8403_v26 = vld [vmem:[#allocation6 + $0x330] ss:$8 sps:$4 sm:$0xff]  }
 0x2b9   :  { %5225 = vmatprep.subr.bf16.mxu0 %v8348_v51  ;;  %5034 = vmatprep.subr.bf16.mxu1 %v8351_v27  ;;  %v8408_v51 = vld [vmem:[#allocation6 + $0x7d4] ss:$8 sps:$4 sm:$0xff]   ;;  %v8411_v27 = vld [vmem:[#allocation6 + $0x344] ss:$8 sps:$4 sm:$0xff]  }
 0x2bc   :  { %5226 = vmatpush1.bf16.msra.mxu0 %v8346_v28  ;;  %5035 = vmatpush1.bf16.msra.mxu1 %v8349_v12  ;;  %v9678_v28 = vld [vmem:[#allocation4 + $0x10] sm:$0xff]  ;;  %v537_v12 = vrot.slane %v9664_v47, %v9622_v32 }
 0x2bd   :  { %5227 = vmatprep.subr.bf16.mxu0 %v8354_v29  ;;  %5036 = vmatprep.subr.bf16.mxu1 %v8357_v30  ;;  %v8406_v29 = vld [vmem:[#allocation6 + $0x7d0] ss:$8 sps:$4 sm:$0xff]   ;;  %v8409_v30 = vld [vmem:[#allocation6 + $0x340] ss:$8 sps:$4 sm:$0xff]  }
 0x2c0   :  { %5228 = vmatpush1.bf16.msra.mxu0 %v8352_v31  ;;  %5037 = vmatpush1.bf16.msra.mxu1 %v8355_v33  ;;  %v8414_v31 = vld [vmem:[#allocation6 + $0x7e4] ss:$8 sps:$4 sm:$0xff]   ;;  %v8417_v33 = vld [vmem:[#allocation6 + $0x354] ss:$8 sps:$4 sm:$0xff]  }
 0x2c1   :  { %5229 = vmatprep.subr.bf16.mxu0 %v8360_v34  ;;  %5038 = vmatprep.subr.bf16.mxu1 %v8363_v41  ;;  %v9682_v34 = vpop.f32.mrb[20].mxu1  ;;  %v549_v41 = vrot.slane %v9678_v28, %v9580_v63 }
 0x2c2   :  { %v9687_v47 = vpop.f32.mrb[21].mxu1 }
 0x2c4   :  { %5230 = vmatpush1.bf16.msra.mxu0 %v8358_v42  ;;  %5039 = vmatpush1.bf16.msra.mxu1 %v8361_v43  ;;  %v2023_v42 = vadd.f32 %v9656_v5, %v537_v12  ;;  %v8412_v43 = vld [vmem:[#allocation6 + $0x7e0] ss:$8 sps:$4 sm:$0xff]   ;;  %v8426_v5 = vld [vmem:[#allocation6 + $0x804] ss:$8 sps:$4 sm:$0xff]  }
 0x2c5   :  { %5231 = vmatprep.subr.bf16.mxu0 %v8366_v45  ;;  %5040 = vmatprep.subr.bf16.mxu1 %v8369_v46  ;;  %v8415_v45 = vld [vmem:[#allocation6 + $0x350] ss:$8 sps:$4 sm:$0xff]   ;;  %v8420_v46 = vld [vmem:[#allocation6 + $0x7f4] ss:$8 sps:$4 sm:$0xff]   ;;  %v8462_v12 = vld [vmem:[#allocation6 + $0x864] ss:$8 sps:$4 sm:$0xff]  }
 0x2c6   :  { %v2288_v55 = vmax.f32 %v2023_v42, 0.0  ;;  %v8466_v42 = vld [vmem:[#allocation6 + $0x870] ss:$8 sps:$4 sm:$0xff]  }
 0x2c8   :  { %5232 = vmatpush1.bf16.msra.mxu0 %v8364_v48  ;;  %5041 = vmatpush1.bf16.msra.mxu1 %v8367_v53  ;;  %v8423_v48 = vld [vmem:[#allocation6 + $0x364] ss:$8 sps:$4 sm:$0xff]   ;;  %v2108_v53 = vpop.f32.mrb[22].mxu1 }
 0x2c9   :  { %5233 = vmatprep.subr.bf16.mxu0 %v8372_v49  ;;  %5042 = vmatprep.subr.bf16.mxu1 %v8375_v62  ;;  %v2066_v49 = vadd.f32 %v9652_v4, %v549_v41  ;;  %v2109_v50 = vpop.f32.mrb[23].mxu1  ;;  %v8418_v62 = vld [vmem:[#allocation6 + $0x7f0] ss:$8 sps:$4 sm:$0xff]   ;;  %v8471_v41 = vld [vmem:[#allocation6 + $0x3e4] ss:$8 sps:$4 sm:$0xff]  }
 0x2ca   :  { %v8475_v53 = vld [vmem:[#allocation6 + $0x3f0] ss:$8 sps:$4 sm:$0xff]   ;;  %v2280_v50 = vmax.f32 %v9635_v54, 0.0  ;;  %v8487_v54 = vld [vmem:[#allocation6 + $0x8c0] ss:$8 sps:$4 sm:$0xff]  }
 0x2cc   :  { %5234 = vmatpush1.bf16.msra.mxu0 %v8370_v2  ;;  %5043 = vmatpush1.bf16.msra.mxu1 %v8373_v59  ;;  %v8421_v2 = vld [vmem:[#allocation6 + $0x360] ss:$8 sps:$4 sm:$0xff]   ;;  %v8429_v59 = vld [vmem:[#allocation6 + $0x374] ss:$8 sps:$4 sm:$0xff]  }
 0x2cd   :  { %5235 = vmatprep.subr.bf16.mxu0 %v8378_v8  ;;  %5044 = vmatprep.subr.bf16.mxu1 %v8381_v11  ;;  %v2291_v8 = vmax.f32 %v2066_v49, 0.0  ;;  %v2315_v11 = vpack.c.bf16 %v2288_v55, %v2288_v55  ;;  %v8480_v49 = vld [vmem:[#allocation6 + $0x894] ss:$8 sps:$4 sm:$0xff]   ;;  %v8478_v55 = vld [vmem:[#allocation6 + $0x890] ss:$8 sps:$4 sm:$0xff]  }
 0x2cf   :  { %v2318_v4 = vpack.c.bf16 %v2291_v8, %v2291_v8  ;;  %v8484_v8 = vld [vmem:[#allocation6 + $0x8b0] ss:$8 sps:$4 sm:$0xff]  }
 0x2d0   :  { %5236 = vmatpush1.bf16.msra.mxu0 %v8376_v14  ;;  %5045 = vmatpush1.bf16.msra.mxu1 %v8379_v15  ;;  %v8424_v14 = vld [vmem:[#allocation6 + $0x800] ss:$8 sps:$4 sm:$0xff]   ;;  %v8427_v15 = vld [vmem:[#allocation6 + $0x370] ss:$8 sps:$4 sm:$0xff]  }
 0x2d1   :  { %5237 = vmatprep.subr.bf16.mxu0 %v8384_v9  ;;  %5055 = vmatprep.subr.bf16.mxu1 %v8387_v16  ;;  %v8432_v9 = vld [vmem:[#allocation6 + $0x814] ss:$8 sps:$4 sm:$0xff]   ;;  %v8435_v16 = vld [vmem:[#allocation6 + $0x384] ss:$8 sps:$4 sm:$0xff]  }
 0x2d3   :  { %5047 = vmatmul.mubr.bf16.vlgmr.msra.gmra.mrb[32].mxu1 %v2305_v6  ;;  %v8436_v6 = vld [vmem:[#allocation6 + $0x820] ss:$8 sps:$4 sm:$0xff]  }
 0x2d4   :  { %5238 = vmatpush1.bf16.msra.mxu0 %v8382_v61  ;;  %5056 = vmatpush1.bf16.msra.mxu1 %v8385_v17  ;;  %v8430_v61 = vld [vmem:[#allocation6 + $0x810] ss:$8 sps:$4 sm:$0xff]   ;;  %v8433_v17 = vld [vmem:[#allocation6 + $0x380] ss:$8 sps:$4 sm:$0xff]  }
 0x2d5   :  { %5087 = vmatprep.mubr.bf16.mxu1 %v2308_v20  ;;  %5239 = vmatprep.subr.bf16.mxu0 %v8390_v57  ;;  %v8438_v57 = vld [vmem:[#allocation6 + $0x824] ss:$8 sps:$4 sm:$0xff]  }
 0x2d6   :  { %5057 = vmatprep.subr.bf16.mxu1 %v8393_v52  ;;  %v8441_v52 = vld [vmem:[#allocation6 + $0x394] ss:$8 sps:$4 sm:$0xff]   ;;  %v8447_v20 = vld [vmem:[#allocation6 + $0x3a4] ss:$8 sps:$4 sm:$0xff]  }
 0x2d8   :  { %5240 = vmatpush1.bf16.msra.mxu0 %v8388_v18  ;;  %5058 = vmatpush1.bf16.msra.mxu1 %v8391_v19  ;;  %v8439_v18 = vld [vmem:[#allocation6 + $0x390] ss:$8 sps:$4 sm:$0xff]   ;;  %v8444_v19 = vld [vmem:[#allocation6 + $0x834] ss:$8 sps:$4 sm:$0xff]  }
 0x2d9   :  { %5241 = vmatprep.subr.bf16.mxu0 %v8396_v38  ;;  %5059 = vmatprep.subr.bf16.mxu1 %v8399_v21  ;;  %v8442_v38 = vld [vmem:[#allocation6 + $0x830] ss:$8 sps:$4 sm:$0xff]   ;;  %v8445_v21 = vld [vmem:[#allocation6 + $0x3a0] ss:$8 sps:$4 sm:$0xff]  }
 0x2dc   :  { %5242 = vmatpush1.bf16.msra.mxu0 %v8394_v22  ;;  %5060 = vmatpush1.bf16.msra.mxu1 %v8397_v23  ;;  %v8450_v22 = vld [vmem:[#allocation6 + $0x844] ss:$8 sps:$4 sm:$0xff]   ;;  %v8453_v23 = vld [vmem:[#allocation6 + $0x3b4] ss:$8 sps:$4 sm:$0xff]  }
 0x2dd   :  { %5243 = vmatprep.subr.bf16.mxu0 %v8402_v24  ;;  %5061 = vmatprep.subr.bf16.mxu1 %v8405_v25  ;;  %v8448_v24 = vld [vmem:[#allocation6 + $0x840] ss:$8 sps:$4 sm:$0xff]   ;;  %v8451_v25 = vld [vmem:[#allocation6 + $0x3b0] ss:$8 sps:$4 sm:$0xff]  }
 0x2e0   :  { %5244 = vmatpush1.bf16.msra.mxu0 %v8400_v56  ;;  %5062 = vmatpush1.bf16.msra.mxu1 %v8403_v26  ;;  %v8456_v56 = vld [vmem:[#allocation6 + $0x854] ss:$8 sps:$4 sm:$0xff]   ;;  %v8459_v26 = vld [vmem:[#allocation6 + $0x3c4] ss:$8 sps:$4 sm:$0xff]  }
 0x2e1   :  { %5245 = vmatprep.subr.bf16.mxu0 %v8408_v51  ;;  %5063 = vmatprep.subr.bf16.mxu1 %v8411_v27  ;;  %v8454_v51 = vld [vmem:[#allocation6 + $0x850] ss:$8 sps:$4 sm:$0xff]   ;;  %v8457_v27 = vld [vmem:[#allocation6 + $0x3c0] ss:$8 sps:$4 sm:$0xff]  }
 0x2e4   :  { %5246 = vmatpush1.bf16.msra.mxu0 %v8406_v29  ;;  %5064 = vmatpush1.bf16.msra.mxu1 %v8409_v30  ;;  %v8465_v29 = vld [vmem:[#allocation6 + $0x3d4] ss:$8 sps:$4 sm:$0xff]   ;;  %v8460_v30 = vld [vmem:[#allocation6 + $0x860] ss:$8 sps:$4 sm:$0xff]  }
 0x2e5   :  { %5247 = vmatprep.subr.bf16.mxu0 %v8414_v31  ;;  %5065 = vmatprep.subr.bf16.mxu1 %v8417_v33  ;;  %v8463_v31 = vld [vmem:[#allocation6 + $0x3d0] ss:$8 sps:$4 sm:$0xff]   ;;  %v8468_v33 = vld [vmem:[#allocation6 + $0x874] ss:$8 sps:$4 sm:$0xff]  }
 0x2e8   :  { %5248 = vmatpush1.bf16.msra.mxu0 %v8412_v43  ;;  %5066 = vmatpush1.bf16.msra.mxu1 %v8415_v45  ;;  %v8469_v43 = vld [vmem:[#allocation6 + $0x3e0] ss:$8 sps:$4 sm:$0xff]   ;;  %v8474_v45 = vld [vmem:[#allocation6 + $0x884] ss:$8 sps:$4 sm:$0xff]  }
 0x2e9   :  { %5249 = vmatprep.subr.bf16.mxu0 %v8420_v46  ;;  %5067 = vmatprep.subr.bf16.mxu1 %v8423_v48  ;;  %v8477_v46 = vld [vmem:[#allocation6 + $0x3f4] ss:$8 sps:$4 sm:$0xff]   ;;  %v8472_v48 = vld [vmem:[#allocation6 + $0x880] ss:$8 sps:$4 sm:$0xff]  }
 0x2ec   :  { %5250 = vmatpush1.bf16.msra.mxu0 %v8418_v62  ;;  %5068 = vmatpush1.bf16.msra.mxu1 %v8421_v2  ;;  %v8483_v62 = vld [vmem:[#allocation6 + $0x8a4] ss:$8 sps:$4 sm:$0xff]   ;;  %v2307_v2 = vpack.c.bf16 %v2280_v50, %v2280_v50 }
 0x2ed   :  { %5260 = vmatprep.subr.bf16.mxu0 %v8426_v5  ;;  %5069 = vmatprep.subr.bf16.mxu1 %v8429_v59  ;;  %v8481_v5 = vld [vmem:[#allocation6 + $0x8a0] ss:$8 sps:$4 sm:$0xff]   ;;  %v8486_v59 = vld [vmem:[#allocation6 + $0x8b4] ss:$8 sps:$4 sm:$0xff]   ;;  %v8537_v50 = vld [vmem:[#allocation6 + $0x9c4] ss:$8 sps:$4 sm:$0xff]  }
 0x2ef   :  { %5252 = vmatmul.mubr.bf16.vlgmr.msra.gmra.mrb[24].mxu0 %v2315_v11  ;;  %v8489_v11 = vld [vmem:[#allocation6 + $0x8c4] ss:$8 sps:$4 sm:$0xff]  }
 0x2f0   :  { %5261 = vmatpush1.bf16.msra.mxu0 %v8424_v14  ;;  %5292 = vmatprep.mubr.bf16.mxu0 %v2318_v4  ;;  %v8492_v14 = vld [vmem:[#allocation6 + $0x8d4] ss:$8 sps:$4 sm:$0xff]   ;;  %v545_v4 = vrot.slane %v9678_v28, %v9607_v40 }
 0x2f1   :  { %5070 = vmatpush1.bf16.msra.mxu1 %v8427_v15  ;;  %5262 = vmatprep.subr.bf16.mxu0 %v8432_v9  ;;  %v8490_v15 = vld [vmem:[#allocation6 + $0x8d0] ss:$8 sps:$4 sm:$0xff]   ;;  %v557_v9 = vrot.slane %v9678_v28, %v9604_v39 }
 0x2f2   :  { %5071 = vmatprep.subr.bf16.mxu1 %v8435_v16  ;;  %v8495_v16 = vld [vmem:[#allocation6 + $0x8e4] ss:$8 sps:$4 sm:$0xff]  }
 0x2f4   :  { %5263 = vmatpush1.bf16.msra.mxu0 %v8430_v61  ;;  %v8493_v61 = vld [vmem:[#allocation6 + $0x8e0] ss:$8 sps:$4 sm:$0xff]  }
 0x2f5   :  { %5072 = vmatpush1.bf16.msra.mxu1 %v8433_v17  ;;  %5264 = vmatprep.subr.bf16.mxu0 %v8438_v57  ;;  %v2107_v17 = vadd.f32 %v9687_v47, %v557_v9  ;;  %v2064_v57 = vadd.f32 %v9649_v1, %v545_v4  ;;  %v8507_v1 = vld [vmem:[#allocation6 + $0x924] ss:$8 sps:$4 sm:$0xff]   ;;  %v8505_v47 = vld [vmem:[#allocation6 + $0x920] ss:$8 sps:$4 sm:$0xff]   ;;  %v565_v4 = vrot.slane %v9678_v28, %v9576_v60  ;;  %v8552_v60 = vld [vmem:[#allocation6 + $0xa14] ss:$8 sps:$4 sm:$0xff]  }
 0x2f6   :  { %5073 = vmatprep.subr.bf16.mxu1 %v8441_v52  ;;  %v8498_v52 = vld [vmem:[#allocation6 + $0x8f4] ss:$8 sps:$4 sm:$0xff]  }
 0x2f8   :  { %5265 = vmatpush1.bf16.msra.mxu0 %v8436_v6  ;;  %v8496_v6 = vld [vmem:[#allocation6 + $0x8f0] ss:$8 sps:$4 sm:$0xff]  }
 0x2f9   :  { %5074 = vmatpush1.bf16.msra.mxu1 %v8439_v18  ;;  %5266 = vmatprep.subr.bf16.mxu0 %v8444_v19  ;;  %v2293_v18 = vmax.f32 %v2107_v17, 0.0  ;;  %v2290_v19 = vmax.f32 %v2064_v57, 0.0  ;;  %v8541_v57 = vld [vmem:[#allocation6 + $0x9e0] ss:$8 sps:$4 sm:$0xff]  }
 0x2fa   :  { %5075 = vmatprep.subr.bf16.mxu1 %v8447_v20  ;;  %v8501_v20 = vld [vmem:[#allocation6 + $0x904] ss:$8 sps:$4 sm:$0xff]  }
 0x2fc   :  { %5267 = vmatpush1.bf16.msra.mxu0 %v8442_v38  ;;  %v8499_v38 = vld [vmem:[#allocation6 + $0x900] ss:$8 sps:$4 sm:$0xff]  }
 0x2fd   :  { %5076 = vmatpush1.bf16.msra.mxu1 %v8445_v21  ;;  %5268 = vmatprep.subr.bf16.mxu0 %v8450_v22  ;;  %v2320_v21 = vpack.c.bf16 %v2293_v18, %v2293_v18  ;;  %v2317_v22 = vpack.c.bf16 %v2290_v19, %v2290_v19  ;;  %v8544_v19 = vld [vmem:[#allocation6 + $0x9f0] ss:$8 sps:$4 sm:$0xff]  }
 0x2fe   :  { %5077 = vmatprep.subr.bf16.mxu1 %v8453_v23  ;;  %v8504_v23 = vld [vmem:[#allocation6 + $0x914] ss:$8 sps:$4 sm:$0xff]  }
 0x300   :  { %5269 = vmatpush1.bf16.msra.mxu0 %v8448_v24  ;;  %v8502_v24 = vld [vmem:[#allocation6 + $0x910] ss:$8 sps:$4 sm:$0xff]  }
 0x301   :  { %5078 = vmatpush1.bf16.msra.mxu1 %v8451_v25  ;;  %5270 = vmatprep.subr.bf16.mxu0 %v8456_v56  ;;  %v8510_v25 = vld [vmem:[#allocation6 + $0x934] ss:$8 sps:$4 sm:$0xff]   ;;  %v8508_v56 = vld [vmem:[#allocation6 + $0x930] ss:$8 sps:$4 sm:$0xff]  }
 0x302   :  { %5079 = vmatprep.subr.bf16.mxu1 %v8459_v26  ;;  %v8513_v26 = vld [vmem:[#allocation6 + $0x944] ss:$8 sps:$4 sm:$0xff]  }
 0x304   :  { %5271 = vmatpush1.bf16.msra.mxu0 %v8454_v51  ;;  %v8511_v51 = vld [vmem:[#allocation6 + $0x940] ss:$8 sps:$4 sm:$0xff]  }
 0x305   :  { %5080 = vmatpush1.bf16.msra.mxu1 %v8457_v27  ;;  %5272 = vmatprep.subr.bf16.mxu0 %v8462_v12  ;;  %v8516_v27 = vld [vmem:[#allocation6 + $0x954] ss:$8 sps:$4 sm:$0xff]   ;;  %v8514_v12 = vld [vmem:[#allocation6 + $0x950] ss:$8 sps:$4 sm:$0xff]  }
 0x306   :  { %5081 = vmatprep.subr.bf16.mxu1 %v8465_v29  ;;  %v8519_v29 = vld [vmem:[#allocation6 + $0x964] ss:$8 sps:$4 sm:$0xff]  }
 0x308   :  { %5273 = vmatpush1.bf16.msra.mxu0 %v8460_v30  ;;  %v8517_v30 = vld [vmem:[#allocation6 + $0x960] ss:$8 sps:$4 sm:$0xff]  }
 0x309   :  { %5082 = vmatpush1.bf16.msra.mxu1 %v8463_v31  ;;  %5274 = vmatprep.subr.bf16.mxu0 %v8468_v33  ;;  %v8522_v31 = vld [vmem:[#allocation6 + $0x974] ss:$8 sps:$4 sm:$0xff]   ;;  %v8520_v33 = vld [vmem:[#allocation6 + $0x970] ss:$8 sps:$4 sm:$0xff]  }
 0x30a   :  { %5083 = vmatprep.subr.bf16.mxu1 %v8471_v41  ;;  %v8525_v41 = vld [vmem:[#allocation6 + $0x984] ss:$8 sps:$4 sm:$0xff]  }
 0x30c   :  { %5275 = vmatpush1.bf16.msra.mxu0 %v8466_v42  ;;  %v8523_v42 = vld [vmem:[#allocation6 + $0x980] ss:$8 sps:$4 sm:$0xff]  }
 0x30d   :  { %5084 = vmatpush1.bf16.msra.mxu1 %v8469_v43  ;;  %5276 = vmatprep.subr.bf16.mxu0 %v8474_v45  ;;  %v8528_v43 = vld [vmem:[#allocation6 + $0x994] ss:$8 sps:$4 sm:$0xff]   ;;  %v8526_v45 = vld [vmem:[#allocation6 + $0x990] ss:$8 sps:$4 sm:$0xff]  }
 0x30e   :  { %5085 = vmatprep.subr.bf16.mxu1 %v8477_v46  ;;  %v8531_v46 = vld [vmem:[#allocation6 + $0x9a4] ss:$8 sps:$4 sm:$0xff]  }
 0x310   :  { %5277 = vmatpush1.bf16.msra.mxu0 %v8472_v48  ;;  %v8529_v48 = vld [vmem:[#allocation6 + $0x9a0] ss:$8 sps:$4 sm:$0xff]  }
 0x311   :  { %5086 = vmatpush1.bf16.msra.mxu1 %v8475_v53  ;;  %5278 = vmatprep.subr.bf16.mxu0 %v8480_v49  ;;  %v8534_v53 = vld [vmem:[#allocation6 + $0x9b4] ss:$8 sps:$4 sm:$0xff]   ;;  %v8532_v49 = vld [vmem:[#allocation6 + $0x9b0] ss:$8 sps:$4 sm:$0xff]  }
 0x314   :  { %5088 = vmatmul.mubr.bf16.vlgmr.msra.gmra.mrb[32].mxu1 %v2307_v2  ;;  %5279 = vmatpush1.bf16.msra.mxu0 %v8478_v55  ;;  %v8535_v55 = vld [vmem:[#allocation6 + $0x9c0] ss:$8 sps:$4 sm:$0xff]   ;;  %v8540_v2 = vld [vmem:[#allocation6 + $0x9d4] ss:$8 sps:$4 sm:$0xff]  }
 0x315   :  { %5280 = vmatprep.subr.bf16.mxu0 %v8483_v62  ;;  %5646 = vmatprep.mubr.bf16.mxu1 %v9249_v0  ;;  %v9698_v62 = vpop.f32.mrb[24].mxu1 }
 0x318   :  { %5281 = vmatpush1.bf16.msra.mxu0 %v8481_v5  ;;  %v9700_v5 = vpop.f32.mrb[25].mxu1 }
 0x319   :  { %5282 = vmatprep.subr.bf16.mxu0 %v8486_v59  ;;  %v2190_v59 = vpop.f32.mrb[26].mxu1 }
 0x31a   :  { %v561_v59 = vrot.slane %v9678_v28, %v9571_v58  ;;  %v8595_v58 = vld [vmem:[#allocation6 + $0xb00] ss:$8 sps:$4 sm:$0xff]  }
 0x31c   :  { %5283 = vmatpush1.bf16.msra.mxu0 %v8484_v8  ;;  %v553_v8 = vrot.slane %v9678_v28, %v9599_v35 }
 0x31d   :  { %5284 = vmatprep.subr.bf16.mxu0 %v8489_v11  ;;  %v2191_v11 = vpop.f32.mrb[27].mxu1 }
 0x31e   :  { %v8589_v11 = vld [vmem:[#allocation6 + $0xae0] ss:$8 sps:$4 sm:$0xff]  }
 0x320   :  { %5285 = vmatpush1.bf16.msra.mxu0 %v8487_v54  ;;  %v8538_v54 = vld [vmem:[#allocation6 + $0x9d0] ss:$8 sps:$4 sm:$0xff]  }
 0x321   :  { %5286 = vmatprep.subr.bf16.mxu0 %v8492_v14  ;;  %v9704_v14 = vpop.f32.mrb[28].mxu1 }
 0x322   :  { %v7629_v9 = vpop.f32.mrb[29].mxu1 }
 0x323   :  { %v8594_v9 = vld [vmem:[#allocation6 + $0xaf4] ss:$8 sps:$4 sm:$0xff]  }
 0x324   :  { %5287 = vmatpush1.bf16.msra.mxu0 %v8490_v15  ;;  %v8543_v15 = vld [vmem:[#allocation6 + $0x9e4] ss:$8 sps:$4 sm:$0xff]  }
 0x325   :  { %5288 = vmatprep.subr.bf16.mxu0 %v8495_v16  ;;  %v2271_v16 = vpop.f32.mrb[30].mxu1 }
 0x326   :  { %v7630_v17 = vpop.f32.mrb[31].mxu1 }
 0x327   :  { %v8597_v17 = vld [vmem:[#allocation6 + $0xb04] ss:$8 sps:$4 sm:$0xff]  }
 0x328   :  { %5289 = vmatpush1.bf16.msra.mxu0 %v8493_v61  ;;  %v2105_v61 = vadd.f32 %v9682_v34, %v553_v8  ;;  %v8550_v34 = vld [vmem:[#allocation6 + $0xa10] ss:$8 sps:$4 sm:$0xff]   ;;  %v8591_v8 = vld [vmem:[#allocation6 + $0xae4] ss:$8 sps:$4 sm:$0xff]  }
 0x329   :  { %5290 = vmatprep.subr.bf16.mxu0 %v8498_v52  ;;  %v8546_v52 = vld [vmem:[#allocation6 + $0x9f4] ss:$8 sps:$4 sm:$0xff]  }
 0x32a   :  { %v2292_v18 = vmax.f32 %v2105_v61, 0.0 }
 0x32c   :  { %5291 = vmatpush1.bf16.msra.mxu0 %v8496_v6  ;;  %v2148_v6 = vadd.f32 %v9658_v7, %v565_v4  ;;  %v8553_v7 = vld [vmem:[#allocation6 + $0xa20] ss:$8 sps:$4 sm:$0xff]   ;;  %v8592_v4 = vld [vmem:[#allocation6 + $0xaf0] ss:$8 sps:$4 sm:$0xff]  }
 0x32d   :  { %5301 = vmatprep.subr.bf16.mxu0 %v8501_v20  ;;  %v8549_v20 = vld [vmem:[#allocation6 + $0xa04] ss:$8 sps:$4 sm:$0xff]  }
 0x32f   :  { %5293 = vmatmul.mubr.bf16.vlgmr.msra.gmra.mrb[24].mxu0 %v2317_v22  ;;  %v8547_v22 = vld [vmem:[#allocation6 + $0xa00] ss:$8 sps:$4 sm:$0xff]  }
 0x330   :  { %5302 = vmatpush1.bf16.msra.mxu0 %v8499_v38  ;;  %5333 = vmatprep.mubr.bf16.mxu0 %v2320_v21  ;;  %v2295_v38 = vmax.f32 %v2148_v6, 0.0  ;;  %v2319_v21 = vpack.c.bf16 %v2292_v18, %v2292_v18  ;;  %v8600_v18 = vld [vmem:[#allocation6 + $0xb14] ss:$8 sps:$4 sm:$0xff]  }
 0x331   :  { %5303 = vmatprep.subr.bf16.mxu0 %v8504_v23 }
 0x332   :  { %v2322_v23 = vpack.c.bf16 %v2295_v38, %v2295_v38  ;;  %v8705_v38 = vld [vmem:[#allocation9 + $0x24] ss:$8 sps:$4 sm:$0xff]  }
 0x334   :  { %5304 = vmatpush1.bf16.msra.mxu0 %v8502_v24  ;;  %v8555_v24 = vld [vmem:[#allocation6 + $0xa24] ss:$8 sps:$4 sm:$0xff]  }
 0x335   :  { %5305 = vmatprep.subr.bf16.mxu0 %v8507_v1  ;;  %v8558_v1 = vld [vmem:[#allocation6 + $0xa34] ss:$8 sps:$4 sm:$0xff]  }
 0x338   :  { %5306 = vmatpush1.bf16.msra.mxu0 %v8505_v47  ;;  %v8556_v47 = vld [vmem:[#allocation6 + $0xa30] ss:$8 sps:$4 sm:$0xff]  }
 0x339   :  { %5307 = vmatprep.subr.bf16.mxu0 %v8510_v25  ;;  %v8561_v25 = vld [vmem:[#allocation6 + $0xa44] ss:$8 sps:$4 sm:$0xff]  }
 0x33c   :  { %5308 = vmatpush1.bf16.msra.mxu0 %v8508_v56  ;;  %v8559_v56 = vld [vmem:[#allocation6 + $0xa40] ss:$8 sps:$4 sm:$0xff]  }
 0x33d   :  { %5309 = vmatprep.subr.bf16.mxu0 %v8513_v26  ;;  %v8564_v26 = vld [vmem:[#allocation6 + $0xa54] ss:$8 sps:$4 sm:$0xff]  }
 0x340   :  { %5310 = vmatpush1.bf16.msra.mxu0 %v8511_v51  ;;  %v8562_v51 = vld [vmem:[#allocation6 + $0xa50] ss:$8 sps:$4 sm:$0xff]  }
 0x341   :  { %5311 = vmatprep.subr.bf16.mxu0 %v8516_v27  ;;  %v8567_v27 = vld [vmem:[#allocation6 + $0xa64] ss:$8 sps:$4 sm:$0xff]  }
 0x344   :  { %5312 = vmatpush1.bf16.msra.mxu0 %v8514_v12  ;;  %v8565_v12 = vld [vmem:[#allocation6 + $0xa60] ss:$8 sps:$4 sm:$0xff]  }
 0x345   :  { %5313 = vmatprep.subr.bf16.mxu0 %v8519_v29  ;;  %v8570_v29 = vld [vmem:[#allocation6 + $0xa74] ss:$8 sps:$4 sm:$0xff]  }
 0x348   :  { %5314 = vmatpush1.bf16.msra.mxu0 %v8517_v30  ;;  %v8568_v30 = vld [vmem:[#allocation6 + $0xa70] ss:$8 sps:$4 sm:$0xff]  }
 0x349   :  { %5315 = vmatprep.subr.bf16.mxu0 %v8522_v31  ;;  %v8573_v31 = vld [vmem:[#allocation6 + $0xa84] ss:$8 sps:$4 sm:$0xff]  }
 0x34c   :  { %5316 = vmatpush1.bf16.msra.mxu0 %v8520_v33  ;;  %v8571_v33 = vld [vmem:[#allocation6 + $0xa80] ss:$8 sps:$4 sm:$0xff]  }
 0x34d   :  { %5317 = vmatprep.subr.bf16.mxu0 %v8525_v41  ;;  %v8576_v41 = vld [vmem:[#allocation6 + $0xa94] ss:$8 sps:$4 sm:$0xff]  }
 0x350   :  { %5318 = vmatpush1.bf16.msra.mxu0 %v8523_v42  ;;  %v8574_v42 = vld [vmem:[#allocation6 + $0xa90] ss:$8 sps:$4 sm:$0xff]  }
 0x351   :  { %5319 = vmatprep.subr.bf16.mxu0 %v8528_v43  ;;  %v8579_v43 = vld [vmem:[#allocation6 + $0xaa4] ss:$8 sps:$4 sm:$0xff]  }
 0x354   :  { %5320 = vmatpush1.bf16.msra.mxu0 %v8526_v45  ;;  %v8577_v45 = vld [vmem:[#allocation6 + $0xaa0] ss:$8 sps:$4 sm:$0xff]  }
 0x355   :  { %5321 = vmatprep.subr.bf16.mxu0 %v8531_v46  ;;  %v8582_v46 = vld [vmem:[#allocation6 + $0xab4] ss:$8 sps:$4 sm:$0xff]  }
 0x358   :  { %5322 = vmatpush1.bf16.msra.mxu0 %v8529_v48  ;;  %v8580_v48 = vld [vmem:[#allocation6 + $0xab0] ss:$8 sps:$4 sm:$0xff]  }
 0x359   :  { %5323 = vmatprep.subr.bf16.mxu0 %v8534_v53  ;;  %v8585_v53 = vld [vmem:[#allocation6 + $0xac4] ss:$8 sps:$4 sm:$0xff]  }
 0x35c   :  { %5324 = vmatpush1.bf16.msra.mxu0 %v8532_v49  ;;  %v8583_v49 = vld [vmem:[#allocation6 + $0xac0] ss:$8 sps:$4 sm:$0xff]  }
 0x35d   :  { %5325 = vmatprep.subr.bf16.mxu0 %v8537_v50  ;;  %v8588_v50 = vld [vmem:[#allocation6 + $0xad4] ss:$8 sps:$4 sm:$0xff]  }
 0x360   :  { %5326 = vmatpush1.bf16.msra.mxu0 %v8535_v55  ;;  %v8586_v55 = vld [vmem:[#allocation6 + $0xad0] ss:$8 sps:$4 sm:$0xff]  }
 0x361   :  { %5327 = vmatprep.subr.bf16.mxu0 %v8540_v2  ;;  %v573_v2 = vrot.slane %v9678_v28, %v9625_v37  ;;  %v8693_v37 = vld [vmem:[#allocation9 + $0x4] ss:$8 sps:$4 sm:$0xff]  }
 0x362   :  { %5614 = vmatprep.subr.bf16.mxu1 %v8693_v37  ;;  %v8636_v37 = vld [vmem:[#allocation6 + $0xbd4] ss:$8 sps:$4 sm:$0xff]  }
 0x364   :  { %5328 = vmatpush1.bf16.msra.mxu0 %v8538_v54  ;;  %v2189_v54 = vadd.f32 %v9700_v5, %v573_v2  ;;  %v8699_v5 = vld [vmem:[#allocation9 + $0x14] ss:$8 sps:$4 sm:$0xff]   ;;  %v8627_v2 = vld [vmem:[#allocation6 + $0xba4] ss:$8 sps:$4 sm:$0xff]  }
 0x365   :  { %5329 = vmatprep.subr.bf16.mxu0 %v8543_v15  ;;  %v2146_v15 = vadd.f32 %v9654_v3, %v561_v59  ;;  %v8697_v3 = vld [vmem:[#allocation9 + $0x10] ss:$8 sps:$4 sm:$0xff]  }
 0x366   :  { %v2297_v16 = vmax.f32 %v2189_v54, 0.0  ;;  %v8742_v59 = vld [vmem:[#allocation12 + $0x20] ss:$16 sps:$4 sm:$0xff]  }
 0x367   :  { %v2294_v61 = vmax.f32 %v2146_v15, 0.0  ;;  %v8630_v54 = vld [vmem:[#allocation6 + $0xbb4] ss:$8 sps:$4 sm:$0xff]  }
 0x368   :  { %5330 = vmatpush1.bf16.msra.mxu0 %v8541_v57  ;;  %v8691_v57 = vld [vmem:[#allocation9] ss:$8 sps:$4 sm:$0xff]  }
 0x369   :  { %5331 = vmatprep.subr.bf16.mxu0 %v8546_v52  ;;  %v2324_v52 = vpack.c.bf16 %v2297_v16, %v2297_v16  ;;  %v2321_v6 = vpack.c.bf16 %v2294_v61, %v2294_v61  ;;  %5615 = vmatpush1.bf16.msra.mxu1 %v8691_v57  ;;  %v8745_v15 = vld [vmem:[#allocation12 + $0x40] ss:$16 sps:$4 sm:$0xff]   ;;  %v8753_v61 = vld [vmem:[#allocation12 + $0x84] ss:$16 sps:$4 sm:$0xff]  }
 0x36a   :  { %5616 = vmatprep.subr.bf16.mxu1 %v8699_v5  ;;  %v8748_v16 = vld [vmem:[#allocation12 + $0x60] ss:$16 sps:$4 sm:$0xff]  }
 0x36b   :  { %v8751_v57 = vld [vmem:[#allocation12 + $0x80] ss:$16 sps:$4 sm:$0xff]  }
 0x36c   :  { %5332 = vmatpush1.bf16.msra.mxu0 %v8544_v19  ;;  %v8598_v19 = vld [vmem:[#allocation6 + $0xb10] ss:$8 sps:$4 sm:$0xff]   ;;  %v8639_v5 = vld [vmem:[#allocation6 + $0xbe4] ss:$8 sps:$4 sm:$0xff]  }
 0x36d   :  { %5342 = vmatprep.subr.bf16.mxu0 %v8549_v20  ;;  %v8603_v20 = vld [vmem:[#allocation6 + $0xb24] ss:$8 sps:$4 sm:$0xff]   ;;  %5617 = vmatpush1.bf16.msra.mxu1 %v8697_v3 }
 0x36e   :  { %5618 = vmatprep.subr.bf16.mxu1 %v8705_v38  ;;  %v8637_v38 = vld [vmem:[#allocation6 + $0xbe0] ss:$8 sps:$4 sm:$0xff]  }
 0x36f   :  { %5334 = vmatmul.mubr.bf16.vlgmr.msra.gmra.mrb[24].mxu0 %v2319_v21  ;;  %v8703_v21 = vld [vmem:[#allocation9 + $0x20] ss:$8 sps:$4 sm:$0xff]  }
 0x370   :  { %5343 = vmatpush1.bf16.msra.mxu0 %v8547_v22  ;;  %5374 = vmatprep.mubr.bf16.mxu0 %v2322_v23  ;;  %v8601_v22 = vld [vmem:[#allocation6 + $0xb20] ss:$8 sps:$4 sm:$0xff]  }
 0x371   :  { %5344 = vmatprep.subr.bf16.mxu0 %v8552_v60  ;;  %v8606_v60 = vld [vmem:[#allocation6 + $0xb34] ss:$8 sps:$4 sm:$0xff]   ;;  %5619 = vmatpush1.bf16.msra.mxu1 %v8703_v21 }
 0x372   :  { %v8711_v23 = vld [vmem:[#allocation9 + $0x34] ss:$8 sps:$4 sm:$0xff]  }
 0x373   :  { %5620 = vmatprep.subr.bf16.mxu1 %v8711_v23  ;;  %v8757_v23 = vld [vmem:[#allocation12 + $0xc0] ss:$16 sps:$4 sm:$0xff]  }
 0x374   :  { %5345 = vmatpush1.bf16.msra.mxu0 %v8550_v34  ;;  %v8709_v34 = vld [vmem:[#allocation9 + $0x30] ss:$8 sps:$4 sm:$0xff]  }
 0x375   :  { %5346 = vmatprep.subr.bf16.mxu0 %v8555_v24  ;;  %v8604_v24 = vld [vmem:[#allocation6 + $0xb30] ss:$8 sps:$4 sm:$0xff]   ;;  %5621 = vmatpush1.bf16.msra.mxu1 %v8709_v34 }
 0x378   :  { %5347 = vmatpush1.bf16.msra.mxu0 %v8553_v7  ;;  %v8609_v7 = vld [vmem:[#allocation6 + $0xb44] ss:$8 sps:$4 sm:$0xff]  }
 0x379   :  { %5348 = vmatprep.subr.bf16.mxu0 %v8558_v1  ;;  %v8717_v1 = vld [vmem:[#allocation9 + $0x44] ss:$8 sps:$4 sm:$0xff]  }
 0x37a   :  { %5622 = vmatprep.subr.bf16.mxu1 %v8717_v1 }
 0x37c   :  { %5349 = vmatpush1.bf16.msra.mxu0 %v8556_v47  ;;  %v8715_v47 = vld [vmem:[#allocation9 + $0x40] ss:$8 sps:$4 sm:$0xff]  }
 0x37d   :  { %5350 = vmatprep.subr.bf16.mxu0 %v8561_v25  ;;  %v8607_v25 = vld [vmem:[#allocation6 + $0xb40] ss:$8 sps:$4 sm:$0xff]   ;;  %5623 = vmatpush1.bf16.msra.mxu1 %v8715_v47  ;;  %v8645_v47 = vld [vmem:[#allocation6 + $0xc04] ss:$8 sps:$4 sm:$0xff]  }
 0x380   :  { %5351 = vmatpush1.bf16.msra.mxu0 %v8559_v56  ;;  %v8612_v56 = vld [vmem:[#allocation6 + $0xb54] ss:$8 sps:$4 sm:$0xff]  }
 0x381   :  { %5352 = vmatprep.subr.bf16.mxu0 %v8564_v26  ;;  %v8723_v26 = vld [vmem:[#allocation9 + $0x54] ss:$8 sps:$4 sm:$0xff]  }
 0x382   :  { %5624 = vmatprep.subr.bf16.mxu1 %v8723_v26  ;;  %v8643_v26 = vld [vmem:[#allocation6 + $0xc00] ss:$8 sps:$4 sm:$0xff]  }
 0x384   :  { %5353 = vmatpush1.bf16.msra.mxu0 %v8562_v51  ;;  %v8721_v51 = vld [vmem:[#allocation9 + $0x50] ss:$8 sps:$4 sm:$0xff]  }
 0x385   :  { %5354 = vmatprep.subr.bf16.mxu0 %v8567_v27  ;;  %v8610_v27 = vld [vmem:[#allocation6 + $0xb50] ss:$8 sps:$4 sm:$0xff]   ;;  %5625 = vmatpush1.bf16.msra.mxu1 %v8721_v51 }
 0x388   :  { %5355 = vmatpush1.bf16.msra.mxu0 %v8565_v12  ;;  %v8615_v12 = vld [vmem:[#allocation6 + $0xb64] ss:$8 sps:$4 sm:$0xff]  }
 0x389   :  { %5356 = vmatprep.subr.bf16.mxu0 %v8570_v29  ;;  %v8729_v29 = vld [vmem:[#allocation9 + $0x64] ss:$8 sps:$4 sm:$0xff]  }
 0x38a   :  { %5626 = vmatprep.subr.bf16.mxu1 %v8729_v29  ;;  %v8763_v29 = vld [vmem:[#allocation12 + $0x100] ss:$16 sps:$4 sm:$0xff]  }
 0x38c   :  { %5357 = vmatpush1.bf16.msra.mxu0 %v8568_v30  ;;  %v8727_v30 = vld [vmem:[#allocation9 + $0x60] ss:$8 sps:$4 sm:$0xff]  }
 0x38d   :  { %5358 = vmatprep.subr.bf16.mxu0 %v8573_v31  ;;  %v8613_v31 = vld [vmem:[#allocation6 + $0xb60] ss:$8 sps:$4 sm:$0xff]   ;;  %5627 = vmatpush1.bf16.msra.mxu1 %v8727_v30 }
 0x38e   :  { %v8768_v30 = vld [vmem:[#allocation12 + $0x124] ss:$16 sps:$4 sm:$0xff]  }
 0x390   :  { %5359 = vmatpush1.bf16.msra.mxu0 %v8571_v33  ;;  %v8618_v33 = vld [vmem:[#allocation6 + $0xb74] ss:$8 sps:$4 sm:$0xff]  }
 0x391   :  { %5360 = vmatprep.subr.bf16.mxu0 %v8576_v41  ;;  %v8735_v41 = vld [vmem:[#allocation9 + $0x74] ss:$8 sps:$4 sm:$0xff]  }
 0x392   :  { %5628 = vmatprep.subr.bf16.mxu1 %v8735_v41  ;;  %v8766_v41 = vld [vmem:[#allocation12 + $0x120] ss:$16 sps:$4 sm:$0xff]  }
 0x394   :  { %5361 = vmatpush1.bf16.msra.mxu0 %v8574_v42  ;;  %v8733_v42 = vld [vmem:[#allocation9 + $0x70] ss:$8 sps:$4 sm:$0xff]  }
 0x395   :  { %5362 = vmatprep.subr.bf16.mxu0 %v8579_v43  ;;  %v8616_v43 = vld [vmem:[#allocation6 + $0xb70] ss:$8 sps:$4 sm:$0xff]   ;;  %5629 = vmatpush1.bf16.msra.mxu1 %v8733_v42 }
 0x396   :  { %v8771_v42 = vld [vmem:[#allocation12 + $0x144] ss:$16 sps:$4 sm:$0xff]  }
 0x398   :  { %5363 = vmatpush1.bf16.msra.mxu0 %v8577_v45  ;;  %v8621_v45 = vld [vmem:[#allocation6 + $0xb84] ss:$8 sps:$4 sm:$0xff]   ;;  %5647 = vmatmul.mubr.bf16.vlgmr.msra.gmra.mrb[36].mxu1 %v9536_v36  ;;  %v8750_v36 = vld [vmem:[#allocation12 + $0x64] ss:$16 sps:$4 sm:$0xff]  }
 0x399   :  { %5364 = vmatprep.subr.bf16.mxu0 %v8582_v46  ;;  %v8619_v46 = vld [vmem:[#allocation6 + $0xb80] ss:$8 sps:$4 sm:$0xff]  }
 0x39c   :  { %5365 = vmatpush1.bf16.msra.mxu0 %v8580_v48  ;;  %v8624_v48 = vld [vmem:[#allocation6 + $0xb94] ss:$8 sps:$4 sm:$0xff]  }
 0x39d   :  { %5366 = vmatprep.subr.bf16.mxu0 %v8585_v53  ;;  %v8739_v53 = vld [vmem:[#allocation12] ss:$16 sps:$4 sm:$0xff]  }
 0x3a0   :  { %5367 = vmatpush1.bf16.msra.mxu0 %v8583_v49  ;;  %v8741_v49 = vld [vmem:[#allocation12 + $0x4] ss:$16 sps:$4 sm:$0xff]  }
 0x3a1   :  { %5368 = vmatprep.subr.bf16.mxu0 %v8588_v50  ;;  %v8622_v50 = vld [vmem:[#allocation6 + $0xb90] ss:$8 sps:$4 sm:$0xff]   ;;  %6069 = vmatprep.subr.bf16.mxu1 %v8741_v49  ;;  %v8657_v49 = vld [vmem:[#allocation6 + $0xc44] ss:$8 sps:$4 sm:$0xff]  }
 0x3a2   :  { %6070 = vmatpush1.bf16.msra.mxu1 %v8739_v53  ;;  %v8652_v53 = vld [vmem:[#allocation6 + $0xc30] ss:$8 sps:$4 sm:$0xff]  }
 0x3a4   :  { %5369 = vmatpush1.bf16.msra.mxu0 %v8586_v55  ;;  %v8744_v55 = vld [vmem:[#allocation12 + $0x24] ss:$16 sps:$4 sm:$0xff]  }
 0x3a5   :  { %5370 = vmatprep.subr.bf16.mxu0 %v8591_v8  ;;  %6071 = vmatprep.subr.bf16.mxu1 %v8744_v55  ;;  %v8747_v8 = vld [vmem:[#allocation12 + $0x44] ss:$16 sps:$4 sm:$0xff]  }
 0x3a6   :  { %6072 = vmatpush1.bf16.msra.mxu1 %v8742_v59  ;;  %v8777_v55 = vld [vmem:[#allocation12 + $0x184] ss:$16 sps:$4 sm:$0xff]   ;;  %v8660_v59 = vld [vmem:[#allocation6 + $0xc54] ss:$8 sps:$4 sm:$0xff]  }
 0x3a7   :  { %6073 = vmatprep.subr.bf16.mxu1 %v8747_v8  ;;  %v8775_v8 = vld [vmem:[#allocation12 + $0x180] ss:$16 sps:$4 sm:$0xff]  }
 0x3a8   :  { %5371 = vmatpush1.bf16.msra.mxu0 %v8589_v11  ;;  %v8625_v11 = vld [vmem:[#allocation6 + $0xba0] ss:$8 sps:$4 sm:$0xff]  }
 0x3a9   :  { %5372 = vmatprep.subr.bf16.mxu0 %v8594_v9  ;;  %v8628_v9 = vld [vmem:[#allocation6 + $0xbb0] ss:$8 sps:$4 sm:$0xff]  }
 0x3aa   :  { %6074 = vmatpush1.bf16.msra.mxu1 %v8745_v15  ;;  %v8661_v15 = vld [vmem:[#allocation6 + $0xc60] ss:$8 sps:$4 sm:$0xff]  }
 0x3ab   :  { %6075 = vmatprep.subr.bf16.mxu1 %v8750_v36  ;;  %v8666_v36 = vld [vmem:[#allocation6 + $0xc74] ss:$8 sps:$4 sm:$0xff]  }
 0x3ac   :  { %5373 = vmatpush1.bf16.msra.mxu0 %v8592_v4  ;;  %v8633_v4 = vld [vmem:[#allocation6 + $0xbc4] ss:$8 sps:$4 sm:$0xff]  }
 0x3ad   :  { %5383 = vmatprep.subr.bf16.mxu0 %v8597_v17  ;;  %v8631_v17 = vld [vmem:[#allocation6 + $0xbc0] ss:$8 sps:$4 sm:$0xff]  }
 0x3ae   :  { %6076 = vmatpush1.bf16.msra.mxu1 %v8748_v16  ;;  %v8667_v16 = vld [vmem:[#allocation6 + $0xc80] ss:$8 sps:$4 sm:$0xff]  }
 0x3af   :  { %5375 = vmatmul.mubr.bf16.vlgmr.msra.gmra.mrb[24].mxu0 %v2321_v6  ;;  %6077 = vmatprep.subr.bf16.mxu1 %v8753_v61  ;;  %v8634_v6 = vld [vmem:[#allocation6 + $0xbd0] ss:$8 sps:$4 sm:$0xff]   ;;  %v8672_v61 = vld [vmem:[#allocation6 + $0xc94] ss:$8 sps:$4 sm:$0xff]  }
 0x3b0   :  { %5384 = vmatpush1.bf16.msra.mxu0 %v8595_v58  ;;  %5415 = vmatprep.mubr.bf16.mxu0 %v2324_v52  ;;  %v9717_v58 = vld [vmem:[#allocation4 + $0x18] sm:$0x7]  ;;  %v8756_v52 = vld [vmem:[#allocation12 + $0xa4] ss:$16 sps:$4 sm:$0xff]  }
 0x3b1   :  { %5385 = vmatprep.subr.bf16.mxu0 %v8600_v18  ;;  %v569_v18 = vrot.slane %v9678_v28, %v9622_v32  ;;  %v581_v3 = vrot.slane %v9717_v58, %v9580_v63  ;;  %v8762_v28 = vld [vmem:[#allocation12 + $0xe4] ss:$16 sps:$4 sm:$0xff]  }
 0x3b2   :  { %6078 = vmatpush1.bf16.msra.mxu1 %v8751_v57  ;;  %v8673_v57 = vld [vmem:[#allocation6 + $0xca0] ss:$8 sps:$4 sm:$0xff]  }
 0x3b3   :  { %6079 = vmatprep.subr.bf16.mxu1 %v8756_v52  ;;  %v2187_v21 = vadd.f32 %v9698_v62, %v569_v18  ;;  %v8678_v52 = vld [vmem:[#allocation6 + $0xcb4] ss:$8 sps:$4 sm:$0xff]   ;;  %v8681_v18 = vld [vmem:[#allocation6 + $0xcc4] ss:$8 sps:$4 sm:$0xff]  }
 0x3b4   :  { %5386 = vmatpush1.bf16.msra.mxu0 %v8598_v19  ;;  %v8754_v19 = vld [vmem:[#allocation12 + $0xa0] ss:$16 sps:$4 sm:$0xff]  }
 0x3b5   :  { %5387 = vmatprep.subr.bf16.mxu0 %v8603_v20  ;;  %v8759_v20 = vld [vmem:[#allocation12 + $0xc4] ss:$16 sps:$4 sm:$0xff]  }
 0x3b6   :  { %6080 = vmatpush1.bf16.msra.mxu1 %v8754_v19  ;;  %v8682_v19 = vld [vmem:[#allocation6 + $0xcd0] ss:$8 sps:$4 sm:$0xff]  }
 0x3b7   :  { %6081 = vmatprep.subr.bf16.mxu1 %v8759_v20  ;;  %v577_v20 = vrot.slane %v9717_v58, %v9607_v40 }
 0x3b8   :  { %5388 = vmatpush1.bf16.msra.mxu0 %v8601_v22  ;;  %v8642_v22 = vld [vmem:[#allocation6 + $0xbf4] ss:$8 sps:$4 sm:$0xff]  }
 0x3b9   :  { %5389 = vmatprep.subr.bf16.mxu0 %v8606_v60  ;;  %v2230_v60 = vadd.f32 %v9674_v13, %v581_v3  ;;  %v8765_v13 = vld [vmem:[#allocation12 + $0x104] ss:$16 sps:$4 sm:$0xff]   ;;  %v8684_v3 = vld [vmem:[#allocation6 + $0xcd4] ss:$8 sps:$4 sm:$0xff]  }
 0x3ba   :  { %6082 = vmatpush1.bf16.msra.mxu1 %v8757_v23  ;;  %v2228_v23 = vadd.f32 %v9671_v10, %v577_v20  ;;  %v8708_v10 = vld [vmem:[#allocation6 + $0xd24] ss:$8 sps:$4 sm:$0xff]  }
 0x3bb   :  { %6083 = vmatprep.subr.bf16.mxu1 %v8762_v28  ;;  %v8690_v28 = vld [vmem:[#allocation6 + $0xcf4] ss:$8 sps:$4 sm:$0xff]  }
 0x3bc   :  { %5390 = vmatpush1.bf16.msra.mxu0 %v8604_v24  ;;  %v8640_v24 = vld [vmem:[#allocation6 + $0xbf0] ss:$8 sps:$4 sm:$0xff]  }
 0x3bd   :  { %5391 = vmatprep.subr.bf16.mxu0 %v8609_v7  ;;  %v2296_v7 = vmax.f32 %v2187_v21, 0.0  ;;  %v8685_v21 = vld [vmem:[#allocation6 + $0xce0] ss:$8 sps:$4 sm:$0xff]  }
 0x3bf   :  { %v2323_v51 = vpack.c.bf16 %v2296_v7, %v2296_v7  ;;  %v2298_v7 = vmax.f32 %v2228_v23, 0.0  ;;  %v8787_v23 = vld [vmem:[#allocation12 + $0x8] ss:$16 sps:$4 sm:$0xff]  }
 0x3c0   :  { %5392 = vmatpush1.bf16.msra.mxu0 %v8607_v25  ;;  %v2299_v25 = vmax.f32 %v2230_v60, 0.0  ;;  %v8780_v60 = vld [vmem:[#allocation12 + $0x1a4] ss:$16 sps:$4 sm:$0xff]  }
 0x3c1   :  { %5393 = vmatprep.subr.bf16.mxu0 %v8612_v56  ;;  %v8760_v56 = vld [vmem:[#allocation12 + $0xe0] ss:$16 sps:$4 sm:$0xff]  }
 0x3c2   :  { %6084 = vmatpush1.bf16.msra.mxu1 %v8760_v56  ;;  %v8700_v56 = vld [vmem:[#allocation6 + $0xd10] ss:$8 sps:$4 sm:$0xff]  }
 0x3c3   :  { %6085 = vmatprep.subr.bf16.mxu1 %v8765_v13  ;;  %v8706_v13 = vld [vmem:[#allocation6 + $0xd20] ss:$8 sps:$4 sm:$0xff]  }
 0x3c4   :  { %5394 = vmatpush1.bf16.msra.mxu0 %v8610_v27  ;;  %v8648_v27 = vld [vmem:[#allocation6 + $0xc14] ss:$8 sps:$4 sm:$0xff]  }
 0x3c5   :  { %5395 = vmatprep.subr.bf16.mxu0 %v8615_v12  ;;  %v2326_v12 = vpack.c.bf16 %v2299_v25, %v2299_v25  ;;  %v2325_v25 = vpack.c.bf16 %v2298_v7, %v2298_v7  ;;  %v8793_v7 = vld [vmem:[#allocation12 + $0x48] ss:$16 sps:$4 sm:$0xff]  }
 0x3c6   :  { %6086 = vmatpush1.bf16.msra.mxu1 %v8763_v29  ;;  %v8726_v29 = vld [vmem:[#allocation6 + $0xd54] ss:$8 sps:$4 sm:$0xff]  }
 0x3c7   :  { %6087 = vmatprep.subr.bf16.mxu1 %v8768_v30  ;;  %v8724_v30 = vld [vmem:[#allocation6 + $0xd50] ss:$8 sps:$4 sm:$0xff]  }
 0x3c8   :  { %5396 = vmatpush1.bf16.msra.mxu0 %v8613_v31  ;;  %v8646_v31 = vld [vmem:[#allocation6 + $0xc10] ss:$8 sps:$4 sm:$0xff]  }
 0x3c9   :  { %5397 = vmatprep.subr.bf16.mxu0 %v8618_v33  ;;  %v8651_v33 = vld [vmem:[#allocation6 + $0xc24] ss:$8 sps:$4 sm:$0xff]  }
 0x3ca   :  { %6088 = vmatpush1.bf16.msra.mxu1 %v8766_v41 }
 0x3cb   :  { %6089 = vmatprep.subr.bf16.mxu1 %v8771_v42  ;;  %v8738_v42 = vld [vmem:[#allocation6 + $0xd74] ss:$8 sps:$4 sm:$0xff]  }
 0x3cc   :  { %5398 = vmatpush1.bf16.msra.mxu0 %v8616_v43  ;;  %v8649_v43 = vld [vmem:[#allocation6 + $0xc20] ss:$8 sps:$4 sm:$0xff]  }
 0x3cd   :  { %5399 = vmatprep.subr.bf16.mxu0 %v8621_v45  ;;  %v8654_v45 = vld [vmem:[#allocation6 + $0xc34] ss:$8 sps:$4 sm:$0xff]  }
 0x3d0   :  { %5400 = vmatpush1.bf16.msra.mxu0 %v8619_v46  ;;  %v8769_v46 = vld [vmem:[#allocation12 + $0x140] ss:$16 sps:$4 sm:$0xff]  }
 0x3d1   :  { %5401 = vmatprep.subr.bf16.mxu0 %v8624_v48  ;;  %v8774_v48 = vld [vmem:[#allocation12 + $0x164] ss:$16 sps:$4 sm:$0xff]   ;;  %6090 = vmatpush1.bf16.msra.mxu1 %v8769_v46 }
 0x3d2   :  { %6091 = vmatprep.subr.bf16.mxu1 %v8774_v48 }
 0x3d4   :  { %5402 = vmatpush1.bf16.msra.mxu0 %v8622_v50  ;;  %v8772_v50 = vld [vmem:[#allocation12 + $0x160] ss:$16 sps:$4 sm:$0xff]  }
 0x3d5   :  { %5403 = vmatprep.subr.bf16.mxu0 %v8627_v2  ;;  %v8655_v2 = vld [vmem:[#allocation6 + $0xc40] ss:$8 sps:$4 sm:$0xff]   ;;  %6092 = vmatpush1.bf16.msra.mxu1 %v8772_v50 }
 0x3d6   :  { %6093 = vmatprep.subr.bf16.mxu1 %v8777_v55  ;;  %v8783_v50 = vld [vmem:[#allocation12 + $0x1c4] ss:$16 sps:$4 sm:$0xff]   ;;  %v8781_v55 = vld [vmem:[#allocation12 + $0x1c0] ss:$16 sps:$4 sm:$0xff]  }
 0x3d8   :  { %5404 = vmatpush1.bf16.msra.mxu0 %v8625_v11  ;;  %v8658_v11 = vld [vmem:[#allocation6 + $0xc50] ss:$8 sps:$4 sm:$0xff]  }
 0x3d9   :  { %5405 = vmatprep.subr.bf16.mxu0 %v8630_v54  ;;  %v8663_v54 = vld [vmem:[#allocation6 + $0xc64] ss:$8 sps:$4 sm:$0xff]   ;;  %6094 = vmatpush1.bf16.msra.mxu1 %v8775_v8  ;;  %v5522_v8 = vld [vmem:[#allocation10] sm:$0x3] }
 0x3da   :  { %6095 = vmatprep.subr.bf16.mxu1 %v8780_v60 }
 0x3dc   :  { %5406 = vmatpush1.bf16.msra.mxu0 %v8628_v9  ;;  %v8664_v9 = vld [vmem:[#allocation6 + $0xc70] ss:$8 sps:$4 sm:$0xff]  }
 0x3dd   :  { %5407 = vmatprep.subr.bf16.mxu0 %v8633_v4  ;;  %v8669_v4 = vld [vmem:[#allocation6 + $0xc84] ss:$8 sps:$4 sm:$0xff]  }
 0x3e0   :  { %5408 = vmatpush1.bf16.msra.mxu0 %v8631_v17  ;;  %v8670_v17 = vld [vmem:[#allocation6 + $0xc90] ss:$8 sps:$4 sm:$0xff]  }
 0x3e1   :  { %5409 = vmatprep.subr.bf16.mxu0 %v8636_v37  ;;  %v8675_v37 = vld [vmem:[#allocation6 + $0xca4] ss:$8 sps:$4 sm:$0xff]  }
 0x3e4   :  { %5410 = vmatpush1.bf16.msra.mxu0 %v8634_v6  ;;  %v8676_v6 = vld [vmem:[#allocation6 + $0xcb0] ss:$8 sps:$4 sm:$0xff]  }
 0x3e5   :  { %5411 = vmatprep.subr.bf16.mxu0 %v8639_v5  ;;  %v8679_v5 = vld [vmem:[#allocation6 + $0xcc0] ss:$8 sps:$4 sm:$0xff]  }
 0x3e7   :  { %v9725_v32 = vpop.f32.mrb[32].mxu1 }
 0x3e8   :  { %v9727_v34 = vpop.f32.mrb[33].mxu1  ;;  %5412 = vmatpush1.bf16.msra.mxu0 %v8637_v38  ;;  %v8687_v38 = vld [vmem:[#allocation6 + $0xce4] ss:$8 sps:$4 sm:$0xff]  }
 0x3e9   :  { %v5093_v1 = vpop.f32.mrb[34].mxu1  ;;  %5413 = vmatprep.subr.bf16.mxu0 %v8642_v22  ;;  %v8778_v22 = vld [vmem:[#allocation12 + $0x1a0] ss:$16 sps:$4 sm:$0xff]  }
 0x3ea   :  { %v5094_v62 = vpop.f32.mrb[35].mxu1  ;;  %6096 = vmatpush1.bf16.msra.mxu1 %v8778_v22  ;;  %v8696_v1 = vld [vmem:[#allocation6 + $0xd04] ss:$8 sps:$4 sm:$0xff]  }
 0x3eb   :  { %v8702_v62 = vld [vmem:[#allocation6 + $0xd14] ss:$8 sps:$4 sm:$0xff]   ;;  %6097 = vmatprep.subr.bf16.mxu1 %v8783_v50  ;;  %v8834_v50 = vld [vmem:[#allocation12 + $0x1ec] ss:$16 sps:$4 sm:$0xff]  }
 0x3ec   :  { %5414 = vmatpush1.bf16.msra.mxu0 %v8640_v24  ;;  %v8688_v24 = vld [vmem:[#allocation6 + $0xcf0] ss:$8 sps:$4 sm:$0xff]  }
 0x3ed   :  { %5424 = vmatprep.subr.bf16.mxu0 %v8645_v47  ;;  %v8694_v47 = vld [vmem:[#allocation6 + $0xd00] ss:$8 sps:$4 sm:$0xff]  }
 0x3ee   :  { %6098 = vmatpush1.bf16.msra.mxu1 %v8781_v55  ;;  %v6157_v55 = vld [vmem:[#allocation15] sm:$0x7] }
 0x3ef   :  { %5416 = vmatmul.mubr.bf16.vlgmr.msra.gmra.mrb[24].mxu0 %v2323_v51  ;;  %v8712_v51 = vld [vmem:[#allocation6 + $0xd30] ss:$8 sps:$4 sm:$0xff]  }
 0x3f0   :  { %5425 = vmatpush1.bf16.msra.mxu0 %v8643_v26  ;;  %5456 = vmatprep.mubr.bf16.mxu0 %v2326_v12  ;;  %v8714_v26 = vld [vmem:[#allocation6 + $0xd34] ss:$8 sps:$4 sm:$0xff]   ;;  %v8718_v12 = vld [vmem:[#allocation6 + $0xd40] ss:$8 sps:$4 sm:$0xff]  }
 0x3f1   :  { %5426 = vmatprep.subr.bf16.mxu0 %v8648_v27  ;;  %v8720_v27 = vld [vmem:[#allocation6 + $0xd44] ss:$8 sps:$4 sm:$0xff]  }
 0x3f4   :  { %5427 = vmatpush1.bf16.msra.mxu0 %v8646_v31  ;;  %v585_v31 = vrot.slane %v9717_v58, %v9599_v35 }
 0x3f5   :  { %5428 = vmatprep.subr.bf16.mxu0 %v8651_v33  ;;  %v8730_v33 = vld [vmem:[#allocation6 + $0xd60] ss:$8 sps:$4 sm:$0xff]  }
 0x3f6   :  { %v2269_v41 = vadd.f32 %v9704_v14, %v585_v31  ;;  %v8789_v14 = vld [vmem:[#allocation12 + $0xc] ss:$16 sps:$4 sm:$0xff]   ;;  %v8814_v31 = vld [vmem:[#allocation12 + $0x128] ss:$16 sps:$4 sm:$0xff]  }
 0x3f8   :  { %5429 = vmatpush1.bf16.msra.mxu0 %v8649_v43  ;;  %v8736_v43 = vld [vmem:[#allocation6 + $0xd70] ss:$8 sps:$4 sm:$0xff]  }
 0x3f9   :  { %5430 = vmatprep.subr.bf16.mxu0 %v8654_v45  ;;  %v2300_v45 = vmax.f32 %v2269_v41, 0.0  ;;  %v8822_v41 = vld [vmem:[#allocation12 + $0x16c] ss:$16 sps:$4 sm:$0xff]  }
 0x3fb   :  { %v2327_v46 = vpack.c.bf16 %v2300_v45, %v2300_v45  ;;  %v8823_v45 = vld [vmem:[#allocation12 + $0x188] ss:$16 sps:$4 sm:$0xff]  }
 0x3fc   :  { %5431 = vmatpush1.bf16.msra.mxu0 %v8652_v53 }
 0x3fd   :  { %5432 = vmatprep.subr.bf16.mxu0 %v8657_v49 }
 0x400   :  { %5433 = vmatpush1.bf16.msra.mxu0 %v8655_v2  ;;  %v8786_v2 = vld [vmem:[#allocation12 + $0x1e4] ss:$16 sps:$4 sm:$0xff]  }
 0x401   :  { %5434 = vmatprep.subr.bf16.mxu0 %v8660_v59  ;;  %v8784_v59 = vld [vmem:[#allocation12 + $0x1e0] ss:$16 sps:$4 sm:$0xff]   ;;  %6099 = vmatprep.subr.bf16.mxu1 %v8786_v2  ;;  %v6171_v2 = vsel %vm6169_vm1, %v6157_v55, 0 }
 0x402   :  { %6100 = vmatpush1.bf16.msra.mxu1 %v8784_v59  ;;  %v6155_v59 = vld [vmem:[%s9805_s26] sm:$0xff]  ;;  %v8864_v55 = vld [vmem:[#allocation18 + $0xa0] sm:$0xff]  }
 0x403   :  { %6110 = vmatprep.subr.bf16.mxu1 %v8789_v14  ;;  %v6156_v14 = vpack.c.bf16 %v6155_v59, %v6155_v59  ;;  %v8866_v59 = vld [vmem:[#allocation18 + $0xa8] sm:$0xff]  }
 0x404   :  { %5435 = vmatpush1.bf16.msra.mxu0 %v8658_v11  ;;  %v2760_v11 = vld [vmem:[#allocation7] sm:$0x3] }
 0x405   :  { %5436 = vmatprep.subr.bf16.mxu0 %v8663_v54  ;;  %v5527_v54 = vrot.slane %v5522_v8, %v9607_v40 }
 0x408   :  { %5437 = vmatpush1.bf16.msra.mxu0 %v8661_v15  ;;  %v5531_v15 = vrot.slane %v5522_v8, %v9580_v63  ;;  %v8835_v8 = vld [vmem:[#allocation19] sm:$0xff]  }
 0x409   :  { %5438 = vmatprep.subr.bf16.mxu0 %v8666_v36  ;;  %v2765_v36 = vrot.slane %v2760_v11, %v9607_v40 }
 0x40c   :  { %5439 = vmatpush1.bf16.msra.mxu0 %v8664_v9  ;;  %v2769_v9 = vrot.slane %v2760_v11, %v9580_v63  ;;  %v8836_v11 = vld [vmem:[#allocation19 + $0x8] sm:$0xff]  }
 0x40d   :  { %5440 = vmatprep.subr.bf16.mxu0 %v8669_v4 }
 0x410   :  { %5441 = vmatpush1.bf16.msra.mxu0 %v8667_v16 }
 0x411   :  { %5442 = vmatprep.subr.bf16.mxu0 %v8672_v61  ;;  %v7669_v61 = vadd.f32 %v9725_v32, %v2765_v36  ;;  %v8790_v32 = vld [vmem:[#allocation12 + $0x28] ss:$16 sps:$4 sm:$0xff]  }
 0x412   :  { %v8839_v36 = vld [vmem:[#allocation18 + $0x40] sm:$0xff]  }
 0x414   :  { %5443 = vmatpush1.bf16.msra.mxu0 %v8670_v17  ;;  %v7671_v17 = vadd.f32 %v9727_v34, %v2769_v9  ;;  %v8795_v34 = vld [vmem:[#allocation12 + $0x4c] ss:$16 sps:$4 sm:$0xff]  }
 0x415   :  { %5444 = vmatprep.subr.bf16.mxu0 %v8675_v37 }
 0x418   :  { %5445 = vmatpush1.bf16.msra.mxu0 %v8673_v57 }
 0x419   :  { %5446 = vmatprep.subr.bf16.mxu0 %v8678_v52 }
 0x41c   :  { %5447 = vmatpush1.bf16.msra.mxu0 %v8676_v6 }
 0x41d   :  { %5448 = vmatprep.subr.bf16.mxu0 %v8681_v18 }
 0x420   :  { %5449 = vmatpush1.bf16.msra.mxu0 %v8679_v5 }
 0x421   :  { %5450 = vmatprep.subr.bf16.mxu0 %v8684_v3 }
 0x424   :  { %5451 = vmatpush1.bf16.msra.mxu0 %v8682_v19 }
 0x425   :  { %5452 = vmatprep.subr.bf16.mxu0 %v8687_v38 }
 0x428   :  { %5453 = vmatpush1.bf16.msra.mxu0 %v8685_v21 }
 0x429   :  { %5454 = vmatprep.subr.bf16.mxu0 %v8690_v28 }
 0x42c   :  { %5455 = vmatpush1.bf16.msra.mxu0 %v8688_v24  ;;  %v8792_v24 = vld [vmem:[#allocation12 + $0x2c] ss:$16 sps:$4 sm:$0xff]  }
 0x42d   :  { %5465 = vmatprep.subr.bf16.mxu0 %v8696_v1  ;;  %v8798_v1 = vld [vmem:[#allocation12 + $0x6c] ss:$16 sps:$4 sm:$0xff]  }
 0x42f   :  { %5457 = vmatmul.mubr.bf16.vlgmr.msra.gmra.mrb[24].mxu0 %v2325_v25  ;;  %v8801_v25 = vld [vmem:[#allocation12 + $0x8c] ss:$16 sps:$4 sm:$0xff]  }
 0x430   :  { %5466 = vmatpush1.bf16.msra.mxu0 %v8694_v47  ;;  %5497 = vmatprep.mubr.bf16.mxu0 %v9249_v0  ;;  %v8732_v0 = vld [vmem:[#allocation6 + $0xd64] ss:$8 sps:$4 sm:$0xff]  }
 0x431   :  { %5467 = vmatprep.subr.bf16.mxu0 %v8702_v62  ;;  %v8796_v47 = vld [vmem:[#allocation12 + $0x68] ss:$16 sps:$4 sm:$0xff]  }
 0x432   :  { %v8799_v62 = vld [vmem:[#allocation12 + $0x88] ss:$16 sps:$4 sm:$0xff]  }
 0x434   :  { %5468 = vmatpush1.bf16.msra.mxu0 %v8700_v56  ;;  %v8804_v56 = vld [vmem:[#allocation12 + $0xac] ss:$16 sps:$4 sm:$0xff]  }
 0x435   :  { %5469 = vmatprep.subr.bf16.mxu0 %v8708_v10  ;;  %v8802_v10 = vld [vmem:[#allocation12 + $0xa8] ss:$16 sps:$4 sm:$0xff]  }
 0x438   :  { %5470 = vmatpush1.bf16.msra.mxu0 %v8706_v13  ;;  %v8807_v13 = vld [vmem:[#allocation12 + $0xcc] ss:$16 sps:$4 sm:$0xff]  }
 0x439   :  { %5471 = vmatprep.subr.bf16.mxu0 %v8714_v26  ;;  %v8805_v26 = vld [vmem:[#allocation12 + $0xc8] ss:$16 sps:$4 sm:$0xff]  }
 0x43c   :  { %5472 = vmatpush1.bf16.msra.mxu0 %v8712_v51  ;;  %v8810_v51 = vld [vmem:[#allocation12 + $0xec] ss:$16 sps:$4 sm:$0xff]  }
 0x43d   :  { %5473 = vmatprep.subr.bf16.mxu0 %v8720_v27  ;;  %v8808_v27 = vld [vmem:[#allocation12 + $0xe8] ss:$16 sps:$4 sm:$0xff]  }
 0x440   :  { %5474 = vmatpush1.bf16.msra.mxu0 %v8718_v12  ;;  %v8813_v12 = vld [vmem:[#allocation12 + $0x10c] ss:$16 sps:$4 sm:$0xff]  }
 0x441   :  { %5475 = vmatprep.subr.bf16.mxu0 %v8726_v29  ;;  %v8811_v29 = vld [vmem:[#allocation12 + $0x108] ss:$16 sps:$4 sm:$0xff]  }
 0x444   :  { %5476 = vmatpush1.bf16.msra.mxu0 %v8724_v30  ;;  %v8816_v30 = vld [vmem:[#allocation12 + $0x12c] ss:$16 sps:$4 sm:$0xff]  }
 0x445   :  { %5477 = vmatprep.subr.bf16.mxu0 %v8732_v0  ;;  %v8819_v0 = vld [vmem:[#allocation12 + $0x14c] ss:$16 sps:$4 sm:$0xff]  }
 0x448   :  { %5478 = vmatpush1.bf16.msra.mxu0 %v8730_v33  ;;  %v8817_v33 = vld [vmem:[#allocation12 + $0x148] ss:$16 sps:$4 sm:$0xff]  }
 0x449   :  { %5479 = vmatprep.subr.bf16.mxu0 %v8738_v42  ;;  %v8820_v42 = vld [vmem:[#allocation12 + $0x168] ss:$16 sps:$4 sm:$0xff]  }
 0x44c   :  { %5480 = vmatpush1.bf16.msra.mxu0 %v8736_v43  ;;  %v8825_v43 = vld [vmem:[#allocation12 + $0x18c] ss:$16 sps:$4 sm:$0xff]  }
 0x44f   :  { %5498 = vmatmul.mubr.bf16.vlgmr.msra.gmra.mrb[24].mxu0 %v2327_v46  ;;  %v8828_v46 = vld [vmem:[#allocation12 + $0x1ac] ss:$16 sps:$4 sm:$0xff]  }
 0x46b   :  { %v5648_v48 = vpop.f32.mrb[36].mxu1 }
 0x46c   :  { %v5650_v53 = vpop.f32.mrb[37].mxu1  ;;  %v5649_v4 = vadd.f32 %v5648_v48, %v5527_v54  ;;  %v8826_v48 = vld [vmem:[#allocation12 + $0x1a8] ss:$16 sps:$4 sm:$0xff]  }
 0x46d   :  { %v5652_v49 = vpop.f32.mrb[38].mxu1  ;;  %v5651_v16 = vadd.f32 %v5650_v53, %v5531_v15  ;;  %v8831_v53 = vld [vmem:[#allocation12 + $0x1cc] ss:$16 sps:$4 sm:$0xff]   ;;  %v8838_v15 = vld [vmem:[#allocation19 + $0x18] sm:$0xff]  }
 0x46e   :  { %v5653_v58 = vpop.f32.mrb[39].mxu1  ;;  %v5657_v57 = vmax.f32 %v5649_v4, 0.0  ;;  %v8829_v49 = vld [vmem:[#allocation12 + $0x1c8] ss:$16 sps:$4 sm:$0xff]  }
 0x46f   :  { %v5658_v18 = vmax.f32 %v5651_v16, 0.0  ;;  %v8832_v58 = vld [vmem:[#allocation12 + $0x1e8] ss:$16 sps:$4 sm:$0xff]  }
 0x470   :  { %v8837_v54 = vld [vmem:[#allocation19 + $0x10] sm:$0xff]  }
 0x522   :  { %v5499_v37 = vpop.f32.mrb[24].mxu0 }
 0x523   :  { %v7670_v52 = vadd.f32 %v7669_v61, %v5499_v37  ;;  %v5501_v6 = vpop.f32.mrb[25].mxu0 }
 0x524   :  { %v7672_v5 = vadd.f32 %v7671_v17, %v5501_v6  ;;  %v5503_v3 = vpop.f32.mrb[26].mxu0  ;;  %v9758_v17 = vld [vmem:[#allocation13] sm:$0xf] }
 0x525   :  { %v5655_v19 = vmax.f32 %v7670_v52, 0.0  ;;  %v5504_v20 = vpop.f32.mrb[27].mxu0  ;;  %v5736_v52 = vrot.slane %v9758_v17, %v9580_v63  ;;  %v7493_v3 = vld [vmem:[#allocation16] ss:$0 sm:$0xff]  ;;  %v8842_v63 = vld [vmem:[#allocation18 + $0x8] sm:$0xff]  }
 0x526   :  { %v5656_v38 = vmax.f32 %v7672_v5, 0.0 }
 0x527   :  { %v5659_v21 = vadd.f32 %v5657_v57, %v5655_v19 }
 0x528   :  { %v5660_v22 = vadd.f32 %v5658_v18, %v5656_v38 }
 0x529   :  { %v9742_v28 = vpack.c.bf16 %v5659_v21, %v5659_v21 }
 0x52a   :  { %v5662_v60 = vpack.c.bf16 %v5660_v22, %v5660_v22 }
 0x52c   :  { %6101 = vmatprep.mubr.bf16.mxu1 %v5662_v60 }
 0x52d   :  { %6102 = vmatmul.mubr.bf16.vlgmr.msra.gmra.mrb[40].mxu1 %v9742_v28 }
 0x52e   :  { %6111 = vmatpush1.bf16.msra.mxu1 %v8787_v23  ;;  %6142 = vmatprep.mubr.bf16.mxu1 %v5662_v60 }
 0x52f   :  { %6112 = vmatprep.subr.bf16.mxu1 %v8792_v24 }
 0x532   :  { %6113 = vmatpush1.bf16.msra.mxu1 %v8790_v32  ;;  %v8841_v32 = vld [vmem:[#allocation18 + $0x48] sm:$0xff]  }
 0x533   :  { %6114 = vmatprep.subr.bf16.mxu1 %v8795_v34 }
 0x536   :  { %6115 = vmatpush1.bf16.msra.mxu1 %v8793_v7  ;;  %v8843_v7 = vld [vmem:[#allocation18 + $0x50] sm:$0xff]  }
 0x537   :  { %6116 = vmatprep.subr.bf16.mxu1 %v8798_v1  ;;  %v8844_v1 = vld [vmem:[#allocation18 + $0x10] sm:$0xff]  }
 0x53a   :  { %6117 = vmatpush1.bf16.msra.mxu1 %v8796_v47  ;;  %v8845_v47 = vld [vmem:[#allocation18 + $0x58] sm:$0xff]  }
 0x53b   :  { %6118 = vmatprep.subr.bf16.mxu1 %v8801_v25  ;;  %v8846_v25 = vld [vmem:[#allocation18 + $0x18] sm:$0xff]  }
 0x53e   :  { %6119 = vmatpush1.bf16.msra.mxu1 %v8799_v62  ;;  %v8847_v62 = vld [vmem:[#allocation18 + $0x60] sm:$0xff]  }
 0x53f   :  { %6120 = vmatprep.subr.bf16.mxu1 %v8804_v56  ;;  %v8848_v56 = vld [vmem:[#allocation18 + $0x20] sm:$0xff]  }
 0x542   :  { %6121 = vmatpush1.bf16.msra.mxu1 %v8802_v10  ;;  %v8849_v10 = vld [vmem:[#allocation18 + $0x68] sm:$0xff]  }
 0x543   :  { %6122 = vmatprep.subr.bf16.mxu1 %v8807_v13  ;;  %v8850_v13 = vld [vmem:[#allocation18 + $0x28] sm:$0xff]  }
 0x546   :  { %6123 = vmatpush1.bf16.msra.mxu1 %v8805_v26  ;;  %v5732_v26 = vrot.slane %v9758_v17, %v9607_v40 }
 0x547   :  { %6124 = vmatprep.subr.bf16.mxu1 %v8810_v51  ;;  %v8851_v51 = vld [vmem:[#allocation18 + $0x70] sm:$0xff]  }
 0x54a   :  { %6125 = vmatpush1.bf16.msra.mxu1 %v8808_v27  ;;  %v5744_v27 = vrot.slane %v9758_v17, %v9604_v39  ;;  %v8858_v39 = vld [vmem:[#allocation18 + $0x88] sm:$0xff]  }
 0x54b   :  { %6126 = vmatprep.subr.bf16.mxu1 %v8813_v12  ;;  %v8852_v12 = vld [vmem:[#allocation18 + $0x30] sm:$0xff]  }
 0x54e   :  { %6127 = vmatpush1.bf16.msra.mxu1 %v8811_v29 }
 0x54f   :  { %6128 = vmatprep.subr.bf16.mxu1 %v8816_v30  ;;  %v8853_v30 = vld [vmem:[#allocation18 + $0x78] sm:$0xff]  }
 0x552   :  { %6129 = vmatpush1.bf16.msra.mxu1 %v8814_v31 }
 0x553   :  { %6130 = vmatprep.subr.bf16.mxu1 %v8819_v0  ;;  %v8854_v0 = vld [vmem:[#allocation18 + $0x38] sm:$0xff]  }
 0x556   :  { %6131 = vmatpush1.bf16.msra.mxu1 %v8817_v33 }
 0x557   :  { %6132 = vmatprep.subr.bf16.mxu1 %v8822_v41  ;;  %v8855_v41 = vld [vmem:[#allocation18 + $0xc0] sm:$0xff]  }
 0x55a   :  { %6133 = vmatpush1.bf16.msra.mxu1 %v8820_v42 }
 0x55b   :  { %6134 = vmatprep.subr.bf16.mxu1 %v8825_v43  ;;  %v8856_v43 = vld [vmem:[#allocation18 + $0x80] sm:$0xff]  }
 0x55e   :  { %6135 = vmatpush1.bf16.msra.mxu1 %v8823_v45  ;;  %v8857_v45 = vld [vmem:[#allocation18 + $0xc8] sm:$0xff]  }
 0x55f   :  { %6136 = vmatprep.subr.bf16.mxu1 %v8828_v46 }
 0x562   :  { %6137 = vmatpush1.bf16.msra.mxu1 %v8826_v48  ;;  %v8859_v48 = vld [vmem:[#allocation18 + $0xd0] sm:$0xff]  }
 0x563   :  { %6138 = vmatprep.subr.bf16.mxu1 %v8831_v53  ;;  %v8860_v53 = vld [vmem:[#allocation18 + $0x90] sm:$0xff]  }
 0x566   :  { %6139 = vmatpush1.bf16.msra.mxu1 %v8829_v49  ;;  %v8861_v49 = vld [vmem:[#allocation18 + $0xd8] sm:$0xff]  }
 0x567   :  { %6140 = vmatprep.subr.bf16.mxu1 %v8834_v50  ;;  %v8862_v50 = vld [vmem:[#allocation18 + $0x98] sm:$0xff]  }
 0x56a   :  { %6141 = vmatpush1.bf16.msra.mxu1 %v8832_v58  ;;  %v8863_v58 = vld [vmem:[#allocation18 + $0xe0] sm:$0xff]  }
 0x56b   :  { %7631 = vmatprep.subr.bf16.mxu1 %v9250_v44 }
 0x56d   :  { %6143 = vmatmul.mubr.bf16.vlgmr.msra.gmra.mrb[44].mxu1 %v9742_v28  ;;  %v8840_v28 = vld [vmem:[#allocation18] sm:$0xff]  }
 0x56e   :  { %7632 = vmatpush3.bf16.msra.mxu1 %v6171_v2  ;;  %7633 = vmatprep.mubr.msk.bf16.mxu1 %vm9251_vm0, %v9250_v44  ;;  %v8865_v2 = vld [vmem:[#allocation18 + $0xe8] sm:$0xff]  }
 0x56f   :  { %7637 = vmatprep.subr.bf16.mxu1 %v9250_v44 }
 0x575   :  { %7634 = vmatmul.mubr.msk.bf16.vlgmr.msra.gmra.mrb[48].mxu1 %vm6165_vm2, %v6156_v14  ;;  %v5740_v14 = vrot.slane %v9758_v17, %v9599_v35  ;;  %v8871_v35 = vld [vmem:[#allocation22] sm:$0xff]   ;;  %v8874_v17 = vld [vmem:[#allocation22 + $0x18] sm:$0xff]  }
 0x576   :  { %7645 = vmatprep.mubr.msk.bf16.mxu1 %vm9251_vm0, %v9250_v44  ;;  %7638 = vmatpush3.bf16.msra.mxu1 %v8835_v8  ;;  %v8867_v8 = vld [vmem:[#allocation18 + $0xf0] sm:$0xff]  }
 0x577   :  { %7639 = vmatprep.subr.bf16.mxu1 %v9250_v44 }
 0x57a   :  { %7640 = vmatpush3.bf16.msra.mxu1 %v8836_v11  ;;  %v8868_v11 = vld [vmem:[#allocation18 + $0xb0] sm:$0xff]  }
 0x57b   :  { %7641 = vmatprep.subr.bf16.mxu1 %v9250_v44 }
 0x57e   :  { %7642 = vmatpush3.bf16.msra.mxu1 %v8837_v54 }
 0x57f   :  { %7643 = vmatprep.subr.bf16.mxu1 %v9250_v44 }
 0x582   :  { %7644 = vmatpush3.bf16.msra.mxu1 %v8838_v15  ;;  %v8869_v15 = vld [vmem:[#allocation18 + $0xf8] sm:$0xff]  }
 0x583   :  { %7558 = vmatprep.subr.bf16.mxu1 %v8839_v36  ;;  %v8870_v36 = vld [vmem:[#allocation18 + $0xb8] sm:$0xff]  }
 0x600   :  { %v6103_v9 = vpop.f32.mrb[40].mxu1 }
 0x601   :  { %v6105_v4 = vpop.f32.mrb[41].mxu1  ;;  %v6104_v29 = vadd.f32 %v6103_v9, %v5732_v26 }
 0x602   :  { %v6107_v16 = vpop.f32.mrb[42].mxu1  ;;  %v6106_v5 = vadd.f32 %v6105_v4, %v5736_v52  ;;  %v8877_v52 = vld [vmem:[#allocation22 + $0x30] sm:$0xff]  }
 0x603   :  { %v6108_v61 = vpop.f32.mrb[43].mxu1  ;;  %v6151_v33 = vmax.f32 %v6104_v29, 0.0  ;;  %v8872_v16 = vld [vmem:[#allocation22 + $0x8] sm:$0xff]  }
 0x604   :  { %v6152_v21 = vmax.f32 %v6106_v5, 0.0  ;;  %v8873_v61 = vld [vmem:[#allocation22 + $0x10] sm:$0xff]  }
 0x605   :  { %v6214_v40 = vpack.c.bf16 %v6151_v33, %v6151_v33 }
 0x606   :  { %v6215_v34 = vpack.c.bf16 %v6152_v21, %v6152_v21 }
 0x640   :  { %v9760_v37 = vpop.f32.mrb[44].mxu1 }
 0x641   :  { %v6146_v57 = vpop.f32.mrb[45].mxu1  ;;  %v6145_v54 = vadd.f32 %v9760_v37, %v5740_v14  ;;  %v8875_v37 = vld [vmem:[#allocation22 + $0x20] sm:$0xff]  }
 0x642   :  { %v6148_v6 = vpop.f32.mrb[46].mxu1  ;;  %v6147_v31 = vadd.f32 %v6146_v57, %v5744_v27  ;;  %v8876_v57 = vld [vmem:[#allocation22 + $0x28] sm:$0xff]  }
 0x643   :  { %v6149_v18 = vpop.f32.mrb[47].mxu1  ;;  %v6153_v9 = vmax.f32 %v6145_v54, 0.0  ;;  %v8878_v6 = vld [vmem:[#allocation22 + $0x38] sm:$0xff]  }
 0x644   :  { %v6154_v42 = vmax.f32 %v6147_v31, 0.0 }
 0x645   :  { %v6216_v4 = vpack.c.bf16 %v6153_v9, %v6153_v9 }
 0x646   :  { %v6217_v46 = vpack.c.bf16 %v6154_v42, %v6154_v42 }
 0x648   :  { %v6207_v19 = vpop.f32.mrb[48].mxu1 }
 0x649   :  { %v6208_v20 = vadd.f32 %v7493_v3, %v6207_v19  ;;  %v7635_v38 = vpop.f32.mrb[49].mxu1 }
 0x64a   :  { %v6210_v22 = vpop.f32.mrb[50].mxu1 }
 0x64b   :  { %v6213_v60 = vmax.f32 %v6208_v20, 0.0  ;;  %v7636_v23 = vpop.f32.mrb[51].mxu1 }
 0x64d   :  { %v6282_v24 = vpack.c.bf16 %v6213_v60, %v6213_v60 }
 0x64f   :  { %7646 = vmatmul.mubr.msk.bf16.vlgmr.msra.gmra.mrb[52].mxu1 %vm6315_vm3, %v6282_v24 }
 0x650   :  { %7559 = vmatpush3.bf16.msra.mxu1 %v8840_v28  ;;  %6583 = vmatprep.mubr.bf16.mxu1 %v6215_v34 }
 0x651   :  { %7560 = vmatprep.subr.bf16.mxu1 %v8841_v32 }
 0x654   :  { %7561 = vmatpush3.bf16.msra.mxu1 %v8842_v63  ;;  %v7532_v63 = vld [vmem:[#allocation21] ss:$0 sm:$0xff] }
 0x655   :  { %7562 = vmatprep.subr.bf16.mxu1 %v8843_v7 }
 0x658   :  { %7563 = vmatpush3.bf16.msra.mxu1 %v8844_v1 }
 0x659   :  { %7564 = vmatprep.subr.bf16.mxu1 %v8845_v47 }
 0x65c   :  { %7565 = vmatpush3.bf16.msra.mxu1 %v8846_v25 }
 0x65d   :  { %7566 = vmatprep.subr.bf16.mxu1 %v8847_v62  ;;  %v7533_v62 = vld [vmem:[#allocation24] ss:$0 sm:$0xff] }
 0x660   :  { %7567 = vmatpush3.bf16.msra.mxu1 %v8848_v56 }
 0x661   :  { %7568 = vmatprep.subr.bf16.mxu1 %v8849_v10 }
 0x664   :  { %7569 = vmatpush3.bf16.msra.mxu1 %v8850_v13 }
 0x665   :  { %7570 = vmatprep.subr.bf16.mxu1 %v8851_v51 }
 0x668   :  { %7571 = vmatpush3.bf16.msra.mxu1 %v8852_v12 }
 0x669   :  { %7572 = vmatprep.subr.bf16.mxu1 %v8853_v30 }
 0x66c   :  { %7573 = vmatpush3.bf16.msra.mxu1 %v8854_v0 }
 0x66d   :  { %7580 = vmatprep.subr.bf16.mxu1 %v8855_v41 }
 0x66f   :  { %6584 = vmatmul.mubr.bf16.vlgmr.msra.gmra.mrb[56].mxu1 %v6214_v40 }
 0x670   :  { %7581 = vmatpush3.bf16.msra.mxu1 %v8856_v43  ;;  %6623 = vmatprep.mubr.bf16.mxu1 %v6217_v46 }
 0x671   :  { %7582 = vmatprep.subr.bf16.mxu1 %v8857_v45 }
 0x674   :  { %7583 = vmatpush3.bf16.msra.mxu1 %v8858_v39 }
 0x675   :  { %7584 = vmatprep.subr.bf16.mxu1 %v8859_v48 }
 0x678   :  { %7585 = vmatpush3.bf16.msra.mxu1 %v8860_v53 }
 0x679   :  { %7586 = vmatprep.subr.bf16.mxu1 %v8861_v49 }
 0x67c   :  { %7587 = vmatpush3.bf16.msra.mxu1 %v8862_v50 }
 0x67d   :  { %7588 = vmatprep.subr.bf16.mxu1 %v8863_v58 }
 0x680   :  { %7589 = vmatpush3.bf16.msra.mxu1 %v8864_v55 }
 0x681   :  { %7590 = vmatprep.subr.bf16.mxu1 %v8865_v2 }
 0x684   :  { %7591 = vmatpush3.bf16.msra.mxu1 %v8866_v59 }
 0x685   :  { %7592 = vmatprep.subr.bf16.mxu1 %v8867_v8 }
 0x688   :  { %7593 = vmatpush3.bf16.msra.mxu1 %v8868_v11 }
 0x689   :  { %7594 = vmatprep.subr.bf16.mxu1 %v8869_v15 }
 0x68c   :  { %7595 = vmatpush3.bf16.msra.mxu1 %v8870_v36 }
 0x68d   :  { %7649 = vmatprep.subr.bf16.mxu1 %v9250_v44 }
 0x68f   :  { %6624 = vmatmul.mubr.bf16.vlgmr.msra.gmra.mrb[60].mxu1 %v6216_v4 }
 0x690   :  { %7665 = vmatprep.mubr.msk.bf16.mxu1 %vm9251_vm0, %v9250_v44  ;;  %7650 = vmatpush3.bf16.msra.mxu1 %v8871_v35 }
 0x691   :  { %7651 = vmatprep.subr.bf16.mxu1 %v9250_v44 }
 0x694   :  { %7652 = vmatpush3.bf16.msra.mxu1 %v8872_v16 }
 0x695   :  { %7653 = vmatprep.subr.bf16.mxu1 %v9250_v44 }
 0x698   :  { %7654 = vmatpush3.bf16.msra.mxu1 %v8873_v61 }
 0x699   :  { %7655 = vmatprep.subr.bf16.mxu1 %v9250_v44 }
 0x69c   :  { %7656 = vmatpush3.bf16.msra.mxu1 %v8874_v17 }
 0x69d   :  { %7657 = vmatprep.subr.bf16.mxu1 %v9250_v44 }
 0x6a0   :  { %7658 = vmatpush3.bf16.msra.mxu1 %v8875_v37 }
 0x6a1   :  { %7659 = vmatprep.subr.bf16.mxu1 %v9250_v44 }
 0x6a4   :  { %7660 = vmatpush3.bf16.msra.mxu1 %v8876_v57 }
 0x6a5   :  { %7661 = vmatprep.subr.bf16.mxu1 %v9250_v44 }
 0x6a8   :  { %7662 = vmatpush3.bf16.msra.mxu1 %v8877_v52 }
 0x6a9   :  { %7663 = vmatprep.subr.bf16.mxu1 %v9250_v44 }
 0x6ac   :  { %7664 = vmatpush3.bf16.msra.mxu1 %v8878_v6 }
 0x722   :  { %v6353_v18 = vpop.f32.mrb[52].mxu1 }
 0x723   :  { %v7647_v5 = vpop.f32.mrb[53].mxu1 }
 0x724   :  { %v6356_v3 = vpop.f32.mrb[54].mxu1 }
 0x725   :  { %v7648_v19 = vpop.f32.mrb[55].mxu1 }
 0x742   :  { %v7574_v20 = vpop.f32.mrb[56].mxu1 }
 0x743   :  { %v7575_v38 = vpop.f32.mrb[57].mxu1 }
 0x744   :  { %v7576_v21 = vadd.f32 %v7575_v38, %v7574_v20  ;;  %v7577_v22 = vpop.f32.mrb[58].mxu1 }
 0x745   :  { %v7578_v60 = vpop.f32.mrb[59].mxu1 }
 0x746   :  { %v6586_v23 = vadd.f32 %v7576_v21, %v6353_v18 }
 0x762   :  { %v7596_v28 = vpop.f32.mrb[60].mxu1 }
 0x763   :  { %v7597_v24 = vpop.f32.mrb[61].mxu1 }
 0x764   :  { %v7598_v32 = vadd.f32 %v7597_v24, %v7596_v28  ;;  %v7599_v34 = vpop.f32.mrb[62].mxu1 }
 0x765   :  { %v7600_v7 = vpop.f32.mrb[63].mxu1 }
 0x766   :  { %v6626_v1 = vadd.f32 %v7598_v32, %v6586_v23 }
 0x768   :  { %v6638_v44 = vadd.f32 %v7532_v63, %v6626_v1 }
 0x76a   :  { %v6639_v47 = vmax.f32 %v6638_v44, 0.0 }
 0x76c   :  { %v6640_v25 = vpack.c.bf16 %v6639_v47, %v6639_v47 }
 0x76e   :  { %7666 = vmatmul.mubr.bf16.vlgmr.msra.gmra.mrb[64].mxu1 %v6640_v25 }
 0x841   :  { %v6746_v56 = vpop.f32.mrb[64].mxu1 }
 0x842   :  { %v6747_v10 = vadd.f32 %v7533_v62, %v6746_v56  ;;  %v7667_v13 = vpop.f32.mrb[65].mxu1 }
 0x843   :  { %v6749_v26 = vpop.f32.mrb[66].mxu1 }
 0x844   :  { %6752 = vst [vmem:[%s9801_s17] sm:$0xff] %v6747_v10  ;;  %v7668_v51 = vpop.f32.mrb[67].mxu1 }
 0x845   :  { %6757 = vsyncpa [#allocation3], 1 }
 0x846   :  { %6758 = vsyncpa [#allocation5], 1 }
 0x847   :  { %6759 = vsyncpa [#allocation8], 1 }
 0x848   :  { %6760 = vsyncpa [#allocation11], 1 }
 0x849   :  { %6761 = vsyncpa [#allocation14], 1 }
 0x84a   :  { %6762 = vsyncpa [#allocation17], 1 }
 0x84b   :  { %6763 = vsyncpa [#allocation20], 1 }
 0x84c   :  { %6764 = vsyncpa [#allocation23], 1 }

</bundles_post_ra>
